<compile_context>
chip_gen: v7x
topology: tpu7x:2x2x1
jax: 0.10.0
libtpu: 0.0.40
codegen_flags: <defaults>
</compile_context>

<pallas_src>
import jax
import jax.numpy as jnp
import numpy as np
from jax import lax
from jax.experimental import pallas as pl
from jax.experimental.pallas import tpu as pltpu

NEG_SLOPE = 0.01       # PyTorch LeakyReLU default negative_slope
LIN_PAD = 256          # per-sample padded length (multiple of 128 for lane tiling)

# Per layer: (Ci, Co, K, stride, Lin, Lout, apply_leaky_relu)
# Layer 0's Ci is padded 7 -> 8; layer 4 is the FC expressed as a K=7 "conv"
# evaluated at position 0 of each sample (Lout = 1).
_LAYERS = (
    (8,  8,  7, 3, LIN_PAD, 67, True),
    (8,  16, 5, 2, 67,      32, True),
    (16, 16, 3, 2, 32,      15, True),
    (16, 16, 3, 2, 15,      7,  True),
    (16, 3,  7, 7, 7,       1,  False),
)


def glasses_kernel(x_ref, w_ref, b_ref, s1_ref, s2_ref, s3_ref, s4_ref,
                   s5_ref, out_ref):
    sel_refs = (s1_ref, s2_ref, s3_ref, s4_ref, s5_ref)

    w_all = w_ref[...]                       # (5, 16, 112) bf16, tap-major slabs
    b_all = b_ref[...]                       # (5, 16, 1)   f32
    a = x_ref[...].astype(jnp.float32)       # (8, TN*256)  flattened batch tile

    for li, (ci, co, k, _s, _lin, _lout, act) in enumerate(_LAYERS):
        w = w_all[li, :co, :ci * k]          # (Co, Ci*K) bf16
        b = b_all[li, :co, :]                # (Co, 1)    f32
        sel = sel_refs[li][...]              # (F, TN*Lout) bf16 0/1 block-diag
        f = sel.shape[0]                     # F = TN*Lin - (K-1)

        # im2col on the sublane (channel) axis: K contiguous lane-shifted
        # views concatenated -> (Ci*K, F).  f32 pieces are 8-row aligned so
        # the concat is layout-free; one cast to bf16 for the MXU.
        stacked = jnp.concatenate([a[:, t:t + f] for t in range(k)], axis=0)

        # (1) conv as a single 2-D MXU matmul with batch folded into lanes.
        z = jnp.dot(w, stacked.astype(jnp.bfloat16),
                    preferred_element_type=jnp.float32)          # (Co, F)

        # (2) stride + per-sample repack as one 2-D matmul against the
        # 0/1 selection matrix (each output column selects exactly one column
        # of z, so adding the bias afterwards is exact).
        z = jnp.dot(z.astype(jnp.bfloat16), sel,
                    preferred_element_type=jnp.float32)          # (Co, TN*Lout)

        a = z + b                                                # f32 bias add
        if act:
            a = jnp.where(a > 0, a, NEG_SLOPE * a)               # f32 LeakyReLU

    out_ref[0] = a                           # (3, TN) lane-dense logits


def _tap_major(w):
    """(Co, Ci, K) weight -> (Co, K*Ci), row index t*Ci + c (matches im2col)."""
    co, ci, k = w.shape
    return jnp.transpose(w, (0, 2, 1)).reshape(co, k * ci)


def _sel_block_diag(tn, lin, lout, stride, k):
    """0/1 (TN*Lin-(K-1), TN*Lout): column n*Lout+j selects row n*Lin+stride*j."""
    f = tn * lin - (k - 1)
    rows = np.arange(f)[:, None]
    cols = np.arange(tn * lout)[None, :]
    tgt = (cols // lout) * lin + stride * (cols % lout)
    return jnp.asarray(rows == tgt, dtype=jnp.bfloat16)


def glasses_forward(x, params, tn=8):
    # tn = samples per grid step.  The block-diagonal sel matrices are
    # O(tn^2) VMEM (~3 MB at tn=8 in bf16), safe for v5e/v6e/v7x scoped VMEM;
    # raise tn (and vmem_limit_bytes) per generation if batch-dominated.
    (w1, b1, w2, b2, w3, b3, w4, b4, wfc, bfc) = params
    n, cin, length = x.shape
    assert (cin, length) == (7, 206), (cin, length)

    n_pad = -(-n // tn) * tn
    g = n_pad // tn

    # Pack input: pad batch -> n_pad, channels 7 -> 8, length 206 -> 256,
    # then channel-major flatten to (8, n_pad*256) in bf16.
    xp = jnp.pad(x, ((0, n_pad - n), (0, 1), (0, LIN_PAD - length)))
    xp = jnp.transpose(xp, (1, 0, 2)).reshape(8, n_pad * LIN_PAD)
    xp = xp.astype(jnp.bfloat16)

    # Pack all five tap-major weight matrices into one bf16 array and the
    # five biases into one f32 array (collapses many tiny DMAs).
    w1p = jnp.pad(w1, ((0, 0), (0, 1), (0, 0)))          # 7 -> 8 in-channels
    w_list = [_tap_major(w1p), _tap_major(w2), _tap_major(w3), _tap_major(w4),
              _tap_major(wfc.reshape(3, 16, 7))]         # FC in torch Flatten order
    b_list = [b1, b2, b3, b4, bfc]
    w_all = jnp.zeros((5, 16, 112), jnp.float32)
    b_all = jnp.zeros((5, 16, 1), jnp.float32)
    for i, (wm, bv) in enumerate(zip(w_list, b_list)):
        w_all = w_all.at[i, :wm.shape[0], :wm.shape[1]].set(wm)
        b_all = b_all.at[i, :bv.shape[0], 0].set(bv)
    w_all = w_all.astype(jnp.bfloat16)

    sels = [_sel_block_diag(tn, lin, lout, s, k)
            for (_ci, _co, k, s, lin, lout, _act) in _LAYERS]

    def const_spec(a):
        nd = a.ndim
        return pl.BlockSpec(a.shape, lambda i, nd=nd: (0,) * nd)

    out = pl.pallas_call(
        glasses_kernel,
        out_shape=jax.ShapeDtypeStruct((g, 3, tn), jnp.float32),
        grid=(g,),
        in_specs=[pl.BlockSpec((8, tn * LIN_PAD), lambda i: (0, i)),
                  const_spec(w_all), const_spec(b_all)]
                 + [const_spec(s) for s in sels],
        out_specs=pl.BlockSpec((1, 3, tn), lambda i: (i, 0, 0)),
        compiler_params=pltpu.CompilerParams(
            dimension_semantics=("parallel",)),   # v7x: shard batch over 2 TCs
    )(xp, w_all, b_all, *sels)

    # (G, 3, TN) lane-dense kernel output -> (N, 3) like the PyTorch module.
    return jnp.transpose(out, (0, 2, 1)).reshape(n_pad, 3)[:n]


def init_params(key):
    """Deterministic init matching PyTorch default shapes (uniform ±1/sqrt(fan_in))."""
    def conv_init(k, co, ci, ksz):
        k1, k2 = jax.random.split(k)
        bound = 1.0 / float(ci * ksz) ** 0.5
        w = jax.random.uniform(k1, (co, ci, ksz), jnp.float32, -bound, bound)
        b = jax.random.uniform(k2, (co,), jnp.float32, -bound, bound)
        return w, b

    keys = jax.random.split(key, 5)
    w1, b1 = conv_init(keys[0], 8, 7, 7)
    w2, b2 = conv_init(keys[1], 16, 8, 5)
    w3, b3 = conv_init(keys[2], 16, 16, 3)
    w4, b4 = conv_init(keys[3], 16, 16, 3)
    k1, k2 = jax.random.split(keys[4])
    bound = 1.0 / 112.0 ** 0.5
    wfc = jax.random.uniform(k1, (3, 112), jnp.float32, -bound, bound)
    bfc = jax.random.uniform(k2, (3,), jnp.float32, -bound, bound)
    return (w1, b1, w2, b2, w3, b3, w4, b4, wfc, bfc)


def reference_forward(x, params):
    """Plain-JAX f32 reference (mirrors the PyTorch forward exactly)."""
    (w1, b1, w2, b2, w3, b3, w4, b4, wfc, bfc) = params

    def conv(v, w, b, s):
        y = lax.conv_general_dilated(v, w, window_strides=(s,),
                                     padding='VALID',
                                     dimension_numbers=('NCH', 'OIH', 'NCH'))
        return y + b[None, :, None]

    def lrelu(v):
        return jnp.where(v > 0, v, NEG_SLOPE * v)

    y = lrelu(conv(x, w1, b1, 3))
    y = lrelu(conv(y, w2, b2, 2))
    y = lrelu(conv(y, w3, b3, 2))
    y = lrelu(conv(y, w4, b4, 2))
    y = y.reshape(x.shape[0], -1)
    return y @ wfc.T + bfc[None, :]


if __name__ == "__main__":
    key = jax.random.PRNGKey(0)
    pkey, xkey = jax.random.split(key)
    params = init_params(pkey)
    # Input: batch=2, 7 channels, length 206 (required so Flatten yields 112).
    x = jax.random.normal(xkey, (2, 7, 206), jnp.float32)

    out = jax.block_until_ready(glasses_forward(x, params))
    ref = reference_forward(x, params)

    assert out.shape == (2, 3), out.shape
    # bf16 MXU operands (f32 accumulate) vs f32 reference: expect ~1e-2 abs.
    assert jnp.allclose(out, ref, atol=5e-2, rtol=5e-2), (out, ref)
    print("KERNEL_OK")
</pallas_src>

<mosaic_0001>
module attributes {stable_mosaic.version = 11 : i64} {
  func.func @glasses_kernel(%arg0: i32, %arg1: memref<8x2048xbf16, #tpu.memory_space<vmem>>, %arg2: memref<5x16x112xbf16, #tpu.memory_space<vmem>>, %arg3: memref<5x16x1xf32, #tpu.memory_space<vmem>>, %arg4: memref<2042x536xbf16, #tpu.memory_space<vmem>>, %arg5: memref<532x256xbf16, #tpu.memory_space<vmem>>, %arg6: memref<254x120xbf16, #tpu.memory_space<vmem>>, %arg7: memref<118x56xbf16, #tpu.memory_space<vmem>>, %arg8: memref<50x8xbf16, #tpu.memory_space<vmem>>, %arg9: memref<1x3x8xf32, #tpu.memory_space<vmem>>) attributes {dimension_semantics = [#tpu.dimension_semantics<parallel>], iteration_bounds = array<i64: 1>, scalar_prefetch = 0 : i64, scratch_operands = 0 : i64, tpu.core_type = #tpu.core_type<tc>, window_params = [{transform_indices = @transform_0, window_bounds = array<i64: 8, 2048>}, {pipeline_mode = #tpu.pipeline_mode<synchronous>, transform_indices = @transform_1, window_bounds = array<i64: 5, 16, 112>}, {pipeline_mode = #tpu.pipeline_mode<synchronous>, transform_indices = @transform_2, window_bounds = array<i64: 5, 16, 1>}, {pipeline_mode = #tpu.pipeline_mode<synchronous>, transform_indices = @transform_3, window_bounds = array<i64: 2042, 536>}, {pipeline_mode = #tpu.pipeline_mode<synchronous>, transform_indices = @transform_4, window_bounds = array<i64: 532, 256>}, {pipeline_mode = #tpu.pipeline_mode<synchronous>, transform_indices = @transform_5, window_bounds = array<i64: 254, 120>}, {pipeline_mode = #tpu.pipeline_mode<synchronous>, transform_indices = @transform_6, window_bounds = array<i64: 118, 56>}, {pipeline_mode = #tpu.pipeline_mode<synchronous>, transform_indices = @transform_7, window_bounds = array<i64: 50, 8>}, {transform_indices = @transform_8, window_bounds = array<i64: 1, 3, 8>}]} {
    %c0 = arith.constant 0 : index
    %c0_0 = arith.constant 0 : index
    %c0_1 = arith.constant 0 : index
    %0 = vector.load %arg2[%c0, %c0_0, %c0_1] : memref<5x16x112xbf16, #tpu.memory_space<vmem>>, vector<5x16x112xbf16>
    %c0_2 = arith.constant 0 : index
    %c0_3 = arith.constant 0 : index
    %c0_4 = arith.constant 0 : index
    %1 = vector.load %arg3[%c0_2, %c0_3, %c0_4] : memref<5x16x1xf32, #tpu.memory_space<vmem>>, vector<5x16x1xf32>
    %c0_5 = arith.constant 0 : index
    %c0_6 = arith.constant 0 : index
    %2 = vector.load %arg1[%c0_5, %c0_6] : memref<8x2048xbf16, #tpu.memory_space<vmem>>, vector<8x2048xbf16>
    %3 = arith.extf %2 : vector<8x2048xbf16> to vector<8x2048xf32>
    %4 = vector.extract_strided_slice %0 {offsets = [0, 0, 0], sizes = [1, 8, 56], strides = [1, 1, 1]} : vector<5x16x112xbf16> to vector<1x8x56xbf16>
    %5 = vector.shape_cast %4 : vector<1x8x56xbf16> to vector<8x56xbf16>
    %6 = vector.extract_strided_slice %1 {offsets = [0, 0, 0], sizes = [1, 8, 1], strides = [1, 1, 1]} : vector<5x16x1xf32> to vector<1x8x1xf32>
    %7 = vector.shape_cast %6 : vector<1x8x1xf32> to vector<8x1xf32>
    %c0_7 = arith.constant 0 : index
    %c0_8 = arith.constant 0 : index
    %8 = vector.load %arg4[%c0_7, %c0_8] : memref<2042x536xbf16, #tpu.memory_space<vmem>>, vector<2042x536xbf16>
    %9 = vector.extract_strided_slice %3 {offsets = [0, 0], sizes = [8, 2042], strides = [1, 1]} : vector<8x2048xf32> to vector<8x2042xf32>
    %10 = vector.extract_strided_slice %3 {offsets = [0, 1], sizes = [8, 2042], strides = [1, 1]} : vector<8x2048xf32> to vector<8x2042xf32>
    %11 = vector.extract_strided_slice %3 {offsets = [0, 2], sizes = [8, 2042], strides = [1, 1]} : vector<8x2048xf32> to vector<8x2042xf32>
    %12 = vector.extract_strided_slice %3 {offsets = [0, 3], sizes = [8, 2042], strides = [1, 1]} : vector<8x2048xf32> to vector<8x2042xf32>
    %13 = vector.extract_strided_slice %3 {offsets = [0, 4], sizes = [8, 2042], strides = [1, 1]} : vector<8x2048xf32> to vector<8x2042xf32>
    %14 = vector.extract_strided_slice %3 {offsets = [0, 5], sizes = [8, 2042], strides = [1, 1]} : vector<8x2048xf32> to vector<8x2042xf32>
    %15 = vector.extract_strided_slice %3 {offsets = [0, 6], sizes = [8, 2042], strides = [1, 1]} : vector<8x2048xf32> to vector<8x2042xf32>
    %16 = tpu.concatenate %9, %10, %11, %12, %13, %14, %15 in 0 : vector<8x2042xf32>, vector<8x2042xf32>, vector<8x2042xf32>, vector<8x2042xf32>, vector<8x2042xf32>, vector<8x2042xf32>, vector<8x2042xf32> -> vector<56x2042xf32>
    %17 = arith.truncf %16 : vector<56x2042xf32> to vector<56x2042xbf16>
    %cst = arith.constant dense<0.000000e+00> : vector<8x2042xf32>
    %18 = tpu.matmul %5, %17, %cst {dimension_numbers = #tpu.dot_dimension_numbers<[1], [0], [0], [1], [0, 0, 1, 1], [], []>} : vector<8x56xbf16>, vector<56x2042xbf16>, vector<8x2042xf32> -> vector<8x2042xf32>
    %19 = arith.truncf %18 : vector<8x2042xf32> to vector<8x2042xbf16>
    %cst_9 = arith.constant dense<0.000000e+00> : vector<8x536xf32>
    %20 = tpu.matmul %19, %8, %cst_9 {dimension_numbers = #tpu.dot_dimension_numbers<[1], [0], [0], [1], [0, 0, 1, 1], [], []>} : vector<8x2042xbf16>, vector<2042x536xbf16>, vector<8x536xf32> -> vector<8x536xf32>
    %21 = vector.broadcast %7 : vector<8x1xf32> to vector<8x536xf32>
    %22 = arith.addf %20, %21 : vector<8x536xf32>
    %cst_10 = arith.constant 0.000000e+00 : f32
    %23 = vector.broadcast %cst_10 : f32 to vector<8x536xf32>
    %24 = arith.cmpf ogt, %22, %23 : vector<8x536xf32>
    %cst_11 = arith.constant 0.00999999977 : f32
    %25 = vector.broadcast %cst_11 : f32 to vector<8x536xf32>
    %26 = arith.mulf %25, %22 : vector<8x536xf32>
    %27 = arith.select %24, %22, %26 : vector<8x536xi1>, vector<8x536xf32>
    %28 = vector.extract_strided_slice %0 {offsets = [1, 0, 0], sizes = [1, 16, 40], strides = [1, 1, 1]} : vector<5x16x112xbf16> to vector<1x16x40xbf16>
    %29 = vector.shape_cast %28 : vector<1x16x40xbf16> to vector<16x40xbf16>
    %30 = vector.extract_strided_slice %1 {offsets = [1, 0, 0], sizes = [1, 16, 1], strides = [1, 1, 1]} : vector<5x16x1xf32> to vector<1x16x1xf32>
    %31 = vector.shape_cast %30 : vector<1x16x1xf32> to vector<16x1xf32>
    %c0_12 = arith.constant 0 : index
    %c0_13 = arith.constant 0 : index
    %32 = vector.load %arg5[%c0_12, %c0_13] : memref<532x256xbf16, #tpu.memory_space<vmem>>, vector<532x256xbf16>
    %33 = vector.extract_strided_slice %27 {offsets = [0, 0], sizes = [8, 532], strides = [1, 1]} : vector<8x536xf32> to vector<8x532xf32>
    %34 = vector.extract_strided_slice %27 {offsets = [0, 1], sizes = [8, 532], strides = [1, 1]} : vector<8x536xf32> to vector<8x532xf32>
    %35 = vector.extract_strided_slice %27 {offsets = [0, 2], sizes = [8, 532], strides = [1, 1]} : vector<8x536xf32> to vector<8x532xf32>
    %36 = vector.extract_strided_slice %27 {offsets = [0, 3], sizes = [8, 532], strides = [1, 1]} : vector<8x536xf32> to vector<8x532xf32>
    %37 = vector.extract_strided_slice %27 {offsets = [0, 4], sizes = [8, 532], strides = [1, 1]} : vector<8x536xf32> to vector<8x532xf32>
    %38 = tpu.concatenate %33, %34, %35, %36, %37 in 0 : vector<8x532xf32>, vector<8x532xf32>, vector<8x532xf32>, vector<8x532xf32>, vector<8x532xf32> -> vector<40x532xf32>
    %39 = arith.truncf %38 : vector<40x532xf32> to vector<40x532xbf16>
    %cst_14 = arith.constant dense<0.000000e+00> : vector<16x532xf32>
    %40 = tpu.matmul %29, %39, %cst_14 {dimension_numbers = #tpu.dot_dimension_numbers<[1], [0], [0], [1], [0, 0, 1, 1], [], []>} : vector<16x40xbf16>, vector<40x532xbf16>, vector<16x532xf32> -> vector<16x532xf32>
    %41 = arith.truncf %40 : vector<16x532xf32> to vector<16x532xbf16>
    %cst_15 = arith.constant dense<0.000000e+00> : vector<16x256xf32>
    %42 = tpu.matmul %41, %32, %cst_15 {dimension_numbers = #tpu.dot_dimension_numbers<[1], [0], [0], [1], [0, 0, 1, 1], [], []>} : vector<16x532xbf16>, vector<532x256xbf16>, vector<16x256xf32> -> vector<16x256xf32>
    %43 = vector.broadcast %31 : vector<16x1xf32> to vector<16x256xf32>
    %44 = arith.addf %42, %43 : vector<16x256xf32>
    %cst_16 = arith.constant 0.000000e+00 : f32
    %45 = vector.broadcast %cst_16 : f32 to vector<16x256xf32>
    %46 = arith.cmpf ogt, %44, %45 : vector<16x256xf32>
    %cst_17 = arith.constant 0.00999999977 : f32
    %47 = vector.broadcast %cst_17 : f32 to vector<16x256xf32>
    %48 = arith.mulf %47, %44 : vector<16x256xf32>
    %49 = arith.select %46, %44, %48 : vector<16x256xi1>, vector<16x256xf32>
    %50 = vector.extract_strided_slice %0 {offsets = [2, 0, 0], sizes = [1, 16, 48], strides = [1, 1, 1]} : vector<5x16x112xbf16> to vector<1x16x48xbf16>
    %51 = vector.shape_cast %50 : vector<1x16x48xbf16> to vector<16x48xbf16>
    %52 = vector.extract_strided_slice %1 {offsets = [2, 0, 0], sizes = [1, 16, 1], strides = [1, 1, 1]} : vector<5x16x1xf32> to vector<1x16x1xf32>
    %53 = vector.shape_cast %52 : vector<1x16x1xf32> to vector<16x1xf32>
    %c0_18 = arith.constant 0 : index
    %c0_19 = arith.constant 0 : index
    %54 = vector.load %arg6[%c0_18, %c0_19] : memref<254x120xbf16, #tpu.memory_space<vmem>>, vector<254x120xbf16>
    %55 = vector.extract_strided_slice %49 {offsets = [0, 0], sizes = [16, 254], strides = [1, 1]} : vector<16x256xf32> to vector<16x254xf32>
    %56 = vector.extract_strided_slice %49 {offsets = [0, 1], sizes = [16, 254], strides = [1, 1]} : vector<16x256xf32> to vector<16x254xf32>
    %57 = vector.extract_strided_slice %49 {offsets = [0, 2], sizes = [16, 254], strides = [1, 1]} : vector<16x256xf32> to vector<16x254xf32>
    %58 = tpu.concatenate %55, %56, %57 in 0 : vector<16x254xf32>, vector<16x254xf32>, vector<16x254xf32> -> vector<48x254xf32>
    %59 = arith.truncf %58 : vector<48x254xf32> to vector<48x254xbf16>
    %cst_20 = arith.constant dense<0.000000e+00> : vector<16x254xf32>
    %60 = tpu.matmul %51, %59, %cst_20 {dimension_numbers = #tpu.dot_dimension_numbers<[1], [0], [0], [1], [0, 0, 1, 1], [], []>} : vector<16x48xbf16>, vector<48x254xbf16>, vector<16x254xf32> -> vector<16x254xf32>
    %61 = arith.truncf %60 : vector<16x254xf32> to vector<16x254xbf16>
    %cst_21 = arith.constant dense<0.000000e+00> : vector<16x120xf32>
    %62 = tpu.matmul %61, %54, %cst_21 {dimension_numbers = #tpu.dot_dimension_numbers<[1], [0], [0], [1], [0, 0, 1, 1], [], []>} : vector<16x254xbf16>, vector<254x120xbf16>, vector<16x120xf32> -> vector<16x120xf32>
    %63 = vector.broadcast %53 : vector<16x1xf32> to vector<16x120xf32>
    %64 = arith.addf %62, %63 : vector<16x120xf32>
    %cst_22 = arith.constant 0.000000e+00 : f32
    %65 = vector.broadcast %cst_22 : f32 to vector<16x120xf32>
    %66 = arith.cmpf ogt, %64, %65 : vector<16x120xf32>
    %cst_23 = arith.constant 0.00999999977 : f32
    %67 = vector.broadcast %cst_23 : f32 to vector<16x120xf32>
    %68 = arith.mulf %67, %64 : vector<16x120xf32>
    %69 = arith.select %66, %64, %68 : vector<16x120xi1>, vector<16x120xf32>
    %70 = vector.extract_strided_slice %0 {offsets = [3, 0, 0], sizes = [1, 16, 48], strides = [1, 1, 1]} : vector<5x16x112xbf16> to vector<1x16x48xbf16>
    %71 = vector.shape_cast %70 : vector<1x16x48xbf16> to vector<16x48xbf16>
    %72 = vector.extract_strided_slice %1 {offsets = [3, 0, 0], sizes = [1, 16, 1], strides = [1, 1, 1]} : vector<5x16x1xf32> to vector<1x16x1xf32>
    %73 = vector.shape_cast %72 : vector<1x16x1xf32> to vector<16x1xf32>
    %c0_24 = arith.constant 0 : index
    %c0_25 = arith.constant 0 : index
    %74 = vector.load %arg7[%c0_24, %c0_25] : memref<118x56xbf16, #tpu.memory_space<vmem>>, vector<118x56xbf16>
    %75 = vector.extract_strided_slice %69 {offsets = [0, 0], sizes = [16, 118], strides = [1, 1]} : vector<16x120xf32> to vector<16x118xf32>
    %76 = vector.extract_strided_slice %69 {offsets = [0, 1], sizes = [16, 118], strides = [1, 1]} : vector<16x120xf32> to vector<16x118xf32>
    %77 = vector.extract_strided_slice %69 {offsets = [0, 2], sizes = [16, 118], strides = [1, 1]} : vector<16x120xf32> to vector<16x118xf32>
    %78 = tpu.concatenate %75, %76, %77 in 0 : vector<16x118xf32>, vector<16x118xf32>, vector<16x118xf32> -> vector<48x118xf32>
    %79 = arith.truncf %78 : vector<48x118xf32> to vector<48x118xbf16>
    %cst_26 = arith.constant dense<0.000000e+00> : vector<16x118xf32>
    %80 = tpu.matmul %71, %79, %cst_26 {dimension_numbers = #tpu.dot_dimension_numbers<[1], [0], [0], [1], [0, 0, 1, 1], [], []>} : vector<16x48xbf16>, vector<48x118xbf16>, vector<16x118xf32> -> vector<16x118xf32>
    %81 = arith.truncf %80 : vector<16x118xf32> to vector<16x118xbf16>
    %cst_27 = arith.constant dense<0.000000e+00> : vector<16x56xf32>
    %82 = tpu.matmul %81, %74, %cst_27 {dimension_numbers = #tpu.dot_dimension_numbers<[1], [0], [0], [1], [0, 0, 1, 1], [], []>} : vector<16x118xbf16>, vector<118x56xbf16>, vector<16x56xf32> -> vector<16x56xf32>
    %83 = vector.broadcast %73 : vector<16x1xf32> to vector<16x56xf32>
    %84 = arith.addf %82, %83 : vector<16x56xf32>
    %cst_28 = arith.constant 0.000000e+00 : f32
    %85 = vector.broadcast %cst_28 : f32 to vector<16x56xf32>
    %86 = arith.cmpf ogt, %84, %85 : vector<16x56xf32>
    %cst_29 = arith.constant 0.00999999977 : f32
    %87 = vector.broadcast %cst_29 : f32 to vector<16x56xf32>
    %88 = arith.mulf %87, %84 : vector<16x56xf32>
    %89 = arith.select %86, %84, %88 : vector<16x56xi1>, vector<16x56xf32>
    %90 = vector.extract_strided_slice %0 {offsets = [4, 0, 0], sizes = [1, 3, 112], strides = [1, 1, 1]} : vector<5x16x112xbf16> to vector<1x3x112xbf16>
    %91 = vector.shape_cast %90 : vector<1x3x112xbf16> to vector<3x112xbf16>
    %92 = vector.extract_strided_slice %1 {offsets = [4, 0, 0], sizes = [1, 3, 1], strides = [1, 1, 1]} : vector<5x16x1xf32> to vector<1x3x1xf32>
    %93 = vector.shape_cast %92 : vector<1x3x1xf32> to vector<3x1xf32>
    %c0_30 = arith.constant 0 : index
    %c0_31 = arith.constant 0 : index
    %94 = vector.load %arg8[%c0_30, %c0_31] : memref<50x8xbf16, #tpu.memory_space<vmem>>, vector<50x8xbf16>
    %95 = vector.extract_strided_slice %89 {offsets = [0, 0], sizes = [16, 50], strides = [1, 1]} : vector<16x56xf32> to vector<16x50xf32>
    %96 = vector.extract_strided_slice %89 {offsets = [0, 1], sizes = [16, 50], strides = [1, 1]} : vector<16x56xf32> to vector<16x50xf32>
    %97 = vector.extract_strided_slice %89 {offsets = [0, 2], sizes = [16, 50], strides = [1, 1]} : vector<16x56xf32> to vector<16x50xf32>
    %98 = vector.extract_strided_slice %89 {offsets = [0, 3], sizes = [16, 50], strides = [1, 1]} : vector<16x56xf32> to vector<16x50xf32>
    %99 = vector.extract_strided_slice %89 {offsets = [0, 4], sizes = [16, 50], strides = [1, 1]} : vector<16x56xf32> to vector<16x50xf32>
    %100 = vector.extract_strided_slice %89 {offsets = [0, 5], sizes = [16, 50], strides = [1, 1]} : vector<16x56xf32> to vector<16x50xf32>
    %101 = vector.extract_strided_slice %89 {offsets = [0, 6], sizes = [16, 50], strides = [1, 1]} : vector<16x56xf32> to vector<16x50xf32>
    %102 = tpu.concatenate %95, %96, %97, %98, %99, %100, %101 in 0 : vector<16x50xf32>, vector<16x50xf32>, vector<16x50xf32>, vector<16x50xf32>, vector<16x50xf32>, vector<16x50xf32>, vector<16x50xf32> -> vector<112x50xf32>
    %103 = arith.truncf %102 : vector<112x50xf32> to vector<112x50xbf16>
    %cst_32 = arith.constant dense<0.000000e+00> : vector<3x50xf32>
    %104 = tpu.matmul %91, %103, %cst_32 {dimension_numbers = #tpu.dot_dimension_numbers<[1], [0], [0], [1], [0, 0, 1, 1], [], []>} : vector<3x112xbf16>, vector<112x50xbf16>, vector<3x50xf32> -> vector<3x50xf32>
    %105 = arith.truncf %104 : vector<3x50xf32> to vector<3x50xbf16>
    %cst_33 = arith.constant dense<0.000000e+00> : vector<3x8xf32>
    %106 = tpu.matmul %105, %94, %cst_33 {dimension_numbers = #tpu.dot_dimension_numbers<[1], [0], [0], [1], [0, 0, 1, 1], [], []>} : vector<3x50xbf16>, vector<50x8xbf16>, vector<3x8xf32> -> vector<3x8xf32>
    %107 = vector.broadcast %93 : vector<3x1xf32> to vector<3x8xf32>
    %108 = arith.addf %106, %107 : vector<3x8xf32>
    %c0_34 = arith.constant 0 : index
    %c0_35 = arith.constant 0 : index
    %c0_36 = arith.constant 0 : index
    %109 = vector.load %arg9[%c0_34, %c0_35, %c0_36] : memref<1x3x8xf32, #tpu.memory_space<vmem>>, vector<1x3x8xf32>
    %110 = vector.shape_cast %109 : vector<1x3x8xf32> to vector<3x8xf32>
    %111 = vector.shape_cast %108 : vector<3x8xf32> to vector<1x3x8xf32>
    tpu.vector_store %arg9[%c0_34, %c0_35, %c0_36], %111 {strides = array<i32>} : memref<1x3x8xf32, #tpu.memory_space<vmem>>, vector<1x3x8xf32>,
    return
  }
  func.func @transform_0(%arg0: i32) -> (i32, i32) {
    %c0_i32 = arith.constant 0 : i32
    %c0_i32_0 = arith.constant 0 : i32
    return %c0_i32, %arg0 : i32, i32
  }
  func.func @transform_1(%arg0: i32) -> (i32, i32, i32) {
    %c0_i32 = arith.constant 0 : i32
    %c0_i32_0 = arith.constant 0 : i32
    %c0_i32_1 = arith.constant 0 : i32
    %c0_i32_2 = arith.constant 0 : i32
    return %c0_i32, %c0_i32_0, %c0_i32_1 : i32, i32, i32
  }
  func.func @transform_2(%arg0: i32) -> (i32, i32, i32) {
    %c0_i32 = arith.constant 0 : i32
    %c0_i32_0 = arith.constant 0 : i32
    %c0_i32_1 = arith.constant 0 : i32
    %c0_i32_2 = arith.constant 0 : i32
    return %c0_i32, %c0_i32_0, %c0_i32_1 : i32, i32, i32
  }
  func.func @transform_3(%arg0: i32) -> (i32, i32) {
    %c0_i32 = arith.constant 0 : i32
    %c0_i32_0 = arith.constant 0 : i32
    %c0_i32_1 = arith.constant 0 : i32
    return %c0_i32, %c0_i32_0 : i32, i32
  }
  func.func @transform_4(%arg0: i32) -> (i32, i32) {
    %c0_i32 = arith.constant 0 : i32
    %c0_i32_0 = arith.constant 0 : i32
    %c0_i32_1 = arith.constant 0 : i32
    return %c0_i32, %c0_i32_0 : i32, i32
  }
  func.func @transform_5(%arg0: i32) -> (i32, i32) {
    %c0_i32 = arith.constant 0 : i32
    %c0_i32_0 = arith.constant 0 : i32
    %c0_i32_1 = arith.constant 0 : i32
    return %c0_i32, %c0_i32_0 : i32, i32
  }
  func.func @transform_6(%arg0: i32) -> (i32, i32) {
    %c0_i32 = arith.constant 0 : i32
    %c0_i32_0 = arith.constant 0 : i32
    %c0_i32_1 = arith.constant 0 : i32
    return %c0_i32, %c0_i32_0 : i32, i32
  }
  func.func @transform_7(%arg0: i32) -> (i32, i32) {
    %c0_i32 = arith.constant 0 : i32
    %c0_i32_0 = arith.constant 0 : i32
    %c0_i32_1 = arith.constant 0 : i32
    return %c0_i32, %c0_i32_0 : i32, i32
  }
  func.func @transform_8(%arg0: i32) -> (i32, i32, i32) {
    %c0_i32 = arith.constant 0 : i32
    %c0_i32_0 = arith.constant 0 : i32
    %c0_i32_1 = arith.constant 0 : i32
    return %arg0, %c0_i32, %c0_i32_0 : i32, i32, i32
  }
}

</mosaic_0001>

<bundles_post_ra>
// kernel: tpu_custom_call.1
= control target key start
LH: loop header
LB: loop body
LE: loop exit
PB: predicated region body
PF: predicated region fallthrough
CT: control target
= control target key end

     0   :  { %s10000_s9 = smov 126   ;;  %s10001_s10 = smov 127   ;;  %v10005_v7 = vmov 0   ;;  %vm886_vm0 = vcmask 1039360   ;;  %vm1014_vm1 = vcmask 1022976   ;;  %vm950_vm2 = vcmask 1031168   ;;  %s13072_s0 = inlined_call_operand.vmem [shape: bf16[8,2048], index: 0, kind: input, shape index: {}]   ;;  %s13073_s1 = inlined_call_operand.vmem [shape: bf16[5,16,112], index: 1, kind: input, shape index: {}]   ;;  %s13074_s3 = inlined_call_operand.vmem [shape: bf16[2042,536], index: 3, kind: input, shape index: {}]   ;;  %s13075_s2 = inlined_call_operand.vmem [shape: f32[5,16,1], index: 2, kind: input, shape index: {}]   ;;  %s13076_s4 = inlined_call_operand.vmem [shape: bf16[532,256], index: 4, kind: input, shape index: {}]   ;;  %s13077_s5 = inlined_call_operand.vmem [shape: bf16[254,120], index: 5, kind: input, shape index: {}]   ;;  %s13078_s6 = inlined_call_operand.vmem [shape: bf16[118,56], index: 6, kind: input, shape index: {}]   ;;  %s13079_s7 = inlined_call_operand.vmem [shape: bf16[50,8], index: 7, kind: input, shape index: {}]   ;;  %s13080_s8 = inlined_call_operand.vmem [shape: f32[1,3,8], index: 8, kind: output, shape index: {}]  }
   0x1   :  { %v46_v0 = vld [vmem:[%s13072_s0] sm:$0xff]  ;;  %v10060_v1 = vld [vmem:[%s13072_s0 + $0x8] sm:$0xff]  ;;  %s10002_s11 = smov 125   ;;  %s10003_s12 = smov 123   ;;  %v10085_v6 = vld [vmem:[%s13072_s0 + $0x10] sm:$0xff]  ;;  %1387 = vmatprep.mubr.bf16.mxu0 %v10005_v7  ;;  %1428 = vmatprep.mubr.bf16.mxu1 %v10005_v7  ;;  %vm1142_vm3 = vcmask 1006592  }
   0x2   :  { %v10062_v2 = vunpack.c.h.bf16 %v46_v0  ;;  %v10065_v3 = vunpack.c.l.bf16 %v10060_v1  ;;  %v10071_v5 = vunpack.c.l.bf16 %v46_v0  ;;  %s10004_s13 = smov 124   ;;  %v57_v8 = vunpack.c.h.bf16 %v10060_v1  ;;  %8869 = vset.pattern.permute.xlu0 %v10005_v7  ;;  %8910 = vset.pattern.permute.xlu1 %v10005_v7  ;;  %s10006_s16 = smov 122   ;;  %v10111_v12 = vld [vmem:[%s13072_s0 + $0x18] sm:$0xff]  ;;  %v10116_v13 = vld [vmem:[%s13072_s0 + $0x20] sm:$0xff]  ;;  %v10145_v20 = vld [vmem:[%s13072_s0 + $0x28] sm:$0xff] }
   0x3   :  { %v58_v10 = vunpack.c.l.bf16 %v10085_v6  ;;  %v59_v14 = vunpack.c.h.bf16 %v10085_v6  ;;  %v60_v15 = vunpack.c.l.bf16 %v10111_v12  ;;  %v61_v16 = vunpack.c.h.bf16 %v10111_v12  ;;  %v10150_v21 = vld [vmem:[%s13072_s0 + $0x30] sm:$0xff]  ;;  %v10179_v28 = vld [vmem:[%s13072_s0 + $0x38] sm:$0xff] }
   0x4   :  { %v8664_v4 = vpack.i.bf16 %v10065_v3, %v10062_v2  ;;  %v8684_v9 = vpack.i.bf16 %v10062_v2, %v10071_v5  ;;  %v62_v17 = vunpack.c.l.bf16 %v10116_v13  ;;  %v65_v22 = vunpack.c.h.bf16 %v10145_v20 }
   0x5   :  { %v8694_v11 = vpack.i.bf16 %v58_v10, %v57_v8  ;;  %v8719_v18 = vpack.i.bf16 %v60_v15, %v59_v14  ;;  %v66_v23 = vunpack.c.l.bf16 %v10150_v21  ;;  %v63_v24 = vunpack.c.h.bf16 %v10116_v13 }
   0x6   :  { %8665 = vrot.lane.b32.xlu1 %v8664_v4, %s10000_s9  ;;  %8660 = vrot.lane.b32.xlu0 %v8664_v4, %s10001_s10  ;;  %v8724_v19 = vpack.i.bf16 %v62_v17, %v61_v16  ;;  %v64_v25 = vunpack.c.l.bf16 %v10145_v20  ;;  %v68_v29 = vunpack.c.l.bf16 %v10179_v28  ;;  %v67_v30 = vunpack.c.h.bf16 %v10150_v21 }
   0x7   :  { %v8784_v26 = vpack.i.bf16 %v66_v23, %v65_v22  ;;  %v10188_v31 = vunpack.c.h.bf16 %v10179_v28  ;;  %vm1078_vm4 = vcmask 1014784   ;;  %vm1206_vm5 = vcmask 998400  }
   0x8   :  { %v8779_v27 = vpack.i.bf16 %v64_v25, %v63_v24  ;;  %v8839_v32 = vpack.i.bf16 %v68_v29, %v67_v30  ;;  %vm1306_vm6 = vcmask 1043456   ;;  %vm1302_vm7 = vcmask 457728  }
   0x9   :  { %vm5030_vm8 = vcmask 1044480   ;;  %vm6205_vm14 = vcmask 326656   ;;  %vm10008_vm15 = vmmov 0  }
   0xa   :  { %8670 = vrot.lane.b32.xlu1 %v8664_v4, %s10002_s11  ;;  %854 = vrot.lane.b32.xlu0 %v10071_v5, %s10001_s10 }
   0xe   :  { %982 = vrot.lane.b32.xlu1 %v10071_v5, %s10002_s11  ;;  %918 = vrot.lane.b32.xlu0 %v10071_v5, %s10000_s9 }
  0x12   :  { %8680 = vrot.lane.b32.xlu1 %v8664_v4, %s10003_s12  ;;  %8675 = vrot.lane.b32.xlu0 %v8664_v4, %s10004_s13 }
  0x16   :  { %1110 = vrot.lane.b32.xlu1 %v10071_v5, %s10003_s12  ;;  %1046 = vrot.lane.b32.xlu0 %v10071_v5, %s10004_s13 }
  0x1a   :  { %1178 = vrot.lane.b32.xlu1 %v10065_v3, %s10006_s16  ;;  %8685 = vrot.lane.b32.xlu0 %v8684_v9, %s10006_s16 }
  0x1e   :  { %8695 = vrot.lane.b32.xlu1 %v8694_v11, %s10000_s9  ;;  %8690 = vrot.lane.b32.xlu0 %v8694_v11, %s10001_s10 }
  0x22   :  { %8705 = vrot.lane.b32.xlu1 %v8694_v11, %s10004_s13  ;;  %8700 = vrot.lane.b32.xlu0 %v8694_v11, %s10002_s11 }
  0x26   :  { %8715 = vrot.lane.b32.xlu1 %v8694_v11, %s10006_s16  ;;  %8710 = vrot.lane.b32.xlu0 %v8694_v11, %s10003_s12 }
  0x2a   :  { %8720 = vrot.lane.b32.xlu0 %v8719_v18, %s10001_s10  ;;  %8725 = vrot.lane.b32.xlu1 %v8724_v19, %s10001_s10 }
  0x2e   :  { %8730 = vrot.lane.b32.xlu0 %v8719_v18, %s10000_s9  ;;  %8735 = vrot.lane.b32.xlu1 %v8719_v18, %s10002_s11 }
  0x32   :  { %8740 = vrot.lane.b32.xlu0 %v8724_v19, %s10000_s9  ;;  %8745 = vrot.lane.b32.xlu1 %v8724_v19, %s10002_s11 }
  0x36   :  { %8750 = vrot.lane.b32.xlu0 %v8719_v18, %s10004_s13  ;;  %8755 = vrot.lane.b32.xlu1 %v8719_v18, %s10003_s12 }
  0x3a   :  { %8760 = vrot.lane.b32.xlu0 %v8724_v19, %s10004_s13  ;;  %8765 = vrot.lane.b32.xlu1 %v8724_v19, %s10003_s12 }
  0x3e   :  { %8770 = vrot.lane.b32.xlu0 %v8719_v18, %s10006_s16  ;;  %8775 = vrot.lane.b32.xlu1 %v8724_v19, %s10006_s16 }
  0x42   :  { %8785 = vrot.lane.b32.xlu1 %v8784_v26, %s10001_s10  ;;  %8780 = vrot.lane.b32.xlu0 %v8779_v27, %s10001_s10 }
  0x46   :  { %8795 = vrot.lane.b32.xlu1 %v8779_v27, %s10002_s11  ;;  %8790 = vrot.lane.b32.xlu0 %v8779_v27, %s10000_s9 }
  0x4a   :  { %8805 = vrot.lane.b32.xlu1 %v8784_v26, %s10002_s11  ;;  %8800 = vrot.lane.b32.xlu0 %v8784_v26, %s10000_s9 }
  0x4e   :  { %8815 = vrot.lane.b32.xlu1 %v8779_v27, %s10003_s12  ;;  %8810 = vrot.lane.b32.xlu0 %v8779_v27, %s10004_s13 }
  0x52   :  { %8825 = vrot.lane.b32.xlu1 %v8784_v26, %s10003_s12  ;;  %8820 = vrot.lane.b32.xlu0 %v8784_v26, %s10004_s13 }
  0x56   :  { %8835 = vrot.lane.b32.xlu1 %v8784_v26, %s10006_s16  ;;  %8830 = vrot.lane.b32.xlu0 %v8779_v27, %s10006_s16 }
  0x5a   :  { %884 = vrot.lane.b32.xlu1 %v10188_v31, %s10001_s10  ;;  %8840 = vrot.lane.b32.xlu0 %v8839_v32, %s10001_s10 }
  0x5e   :  { %8850 = vrot.lane.b32.xlu1 %v8839_v32, %s10002_s11  ;;  %8845 = vrot.lane.b32.xlu0 %v8839_v32, %s10000_s9 }
  0x62   :  { %1012 = vrot.lane.b32.xlu1 %v10188_v31, %s10002_s11  ;;  %948 = vrot.lane.b32.xlu0 %v10188_v31, %s10000_s9 }
  0x66   :  { %8860 = vrot.lane.b32.xlu1 %v8839_v32, %s10003_s12  ;;  %8855 = vrot.lane.b32.xlu0 %v8839_v32, %s10004_s13 }
  0x6a   :  { %1076 = vrot.lane.b32.xlu0 %v10188_v31, %s10004_s13  ;;  %1140 = vrot.lane.b32.xlu1 %v10188_v31, %s10003_s12 }
  0x6e   :  { %8865 = vrot.lane.b32.xlu0 %v8839_v32, %s10006_s16  ;;  %1204 = vrot.lane.b32.xlu1 %v10188_v31, %s10006_s16 }
  0x78   :  { %v10212_v33 = vpop.permute.xlu1 %8665  ;;  %v10214_v34 = vpop.permute.xlu0 %8660 }
  0x79   :  { %v8663_v35 = vunpack.i.h.bf16 %v10214_v34  ;;  %v8662_v36 = vunpack.i.l.bf16 %v10214_v34  ;;  %v8668_v37 = vunpack.i.h.bf16 %v10212_v33  ;;  %v8667_v38 = vunpack.i.l.bf16 %v10212_v33 }
  0x7b   :  { %v888_v39 = vsel %vm886_vm0, %v8662_v36, %v8663_v35  ;;  %v952_v47 = vsel %vm950_vm2, %v8667_v38, %v8668_v37 }
  0x7c   :  { %v10223_v40 = vpop.permute.xlu1 %8670  ;;  %v855_v41 = vpop.permute.xlu0 %854  ;;  %v1239_v42 = vpack.c.bf16 %v888_v39, %v10062_v2 }
  0x7d   :  { %v8673_v43 = vunpack.i.h.bf16 %v10223_v40  ;;  %v8672_v44 = vunpack.i.l.bf16 %v10223_v40  ;;  %v887_v45 = vsel %vm886_vm0, %v855_v41, %v8662_v36 }
  0x7e   :  { %1355 = vmatprep.subr.bf16.mxu0 %v1239_v42  ;;  %v1238_v46 = vpack.c.bf16 %v887_v45, %v10071_v5 }
  0x7f   :  { %v1016_v48 = vsel %vm1014_vm1, %v8672_v44, %v8673_v43 }
  0x80   :  { %v983_v49 = vpop.permute.xlu1 %982  ;;  %1356 = vmatpush1.bf16.msra.mxu0 %v1238_v46  ;;  %v919_v50 = vpop.permute.xlu0 %918  ;;  %v1255_v51 = vpack.c.bf16 %v1016_v48, %v952_v47  ;;  %v10263_v48 = vld [vmem:[%s13073_s1] sm:$0xf] }
  0x81   :  { %v1015_v52 = vsel %vm1014_vm1, %v983_v49, %v8672_v44  ;;  %v951_v53 = vsel %vm950_vm2, %v919_v50, %v8667_v38 }
  0x82   :  { %v1254_v54 = vpack.c.bf16 %v1015_v52, %v951_v53  ;;  %1357 = vmatprep.subr.bf16.mxu0 %v1255_v51 }
  0x84   :  { %v10238_v55 = vpop.permute.xlu1 %8680  ;;  %1358 = vmatpush1.bf16.msra.mxu0 %v1254_v54  ;;  %v10240_v56 = vpop.permute.xlu0 %8675 }
  0x85   :  { %v8683_v57 = vunpack.i.h.bf16 %v10238_v55  ;;  %v8682_v58 = vunpack.i.l.bf16 %v10238_v55  ;;  %v8678_v59 = vunpack.i.h.bf16 %v10240_v56  ;;  %v8677_v60 = vunpack.i.l.bf16 %v10240_v56 }
  0x87   :  { %v1080_v61 = vsel %vm1078_vm4, %v8677_v60, %v8678_v59  ;;  %v1144_v62 = vsel %vm1142_vm3, %v8682_v58, %v8683_v57 }
  0x88   :  { %v1111_v63 = vpop.permute.xlu1 %1110  ;;  %v1047_v0 = vpop.permute.xlu0 %1046  ;;  %v1271_v2 = vpack.c.bf16 %v1144_v62, %v1080_v61 }
  0x89   :  { %v1143_v4 = vsel %vm1142_vm3, %v1111_v63, %v8682_v58  ;;  %v1079_v5 = vsel %vm1078_vm4, %v1047_v0, %v8677_v60 }
  0x8a   :  { %v1270_v9 = vpack.c.bf16 %v1143_v4, %v1079_v5  ;;  %1359 = vmatprep.subr.bf16.mxu0 %v1271_v2 }
  0x8c   :  { %v1179_v11 = vpop.permute.xlu1 %1178  ;;  %v8686_v18 = vpop.permute.xlu0 %8685  ;;  %1360 = vmatpush1.bf16.msra.mxu0 %v1270_v9 }
  0x8d   :  { %v8688_v19 = vunpack.i.h.bf16 %v8686_v18  ;;  %v8687_v26 = vunpack.i.l.bf16 %v8686_v18 }
  0x8f   :  { %v1208_v27 = vsel %vm1206_vm5, %v8688_v19, %v1179_v11  ;;  %v1207_v32 = vsel %vm1206_vm5, %v8687_v26, %v8688_v19 }
  0x90   :  { %v1287_v36 = vpack.c.bf16 %v1208_v27, %v1208_v27  ;;  %v10254_v38 = vpop.permute.xlu1 %8695  ;;  %v8691_v39 = vpop.permute.xlu0 %8690  ;;  %v1286_v41 = vpack.c.bf16 %v1207_v32, %v1207_v32 }
  0x91   :  { %v8698_v42 = vunpack.i.h.bf16 %v10254_v38  ;;  %v8693_v44 = vunpack.i.h.bf16 %v8691_v39  ;;  %v8692_v45 = vunpack.i.l.bf16 %v8691_v39  ;;  %v8697_v47 = vunpack.i.l.bf16 %v10254_v38 }
  0x92   :  { %7505 = vmatprep.subr.msk.bf16.mxu0 %vm1306_vm6, %v1287_v36  ;;  %v1308_v46 = vsel %vm1306_vm6, %v1286_v41, 0 }
  0x93   :  { %1362 = vmatpush1.bf16.msra.mxu0 %v1308_v46  ;;  %v890_v49 = vsel %vm886_vm0, %v8692_v45, %v8693_v44  ;;  %v889_v50 = vsel %vm886_vm0, %v8663_v35, %v8692_v45  ;;  %v954_v34 = vsel %vm950_vm2, %v8697_v47, %v8698_v42 }
  0x94   :  { %v10269_v51 = vpop.permute.xlu1 %8705  ;;  %v10271_v52 = vpop.permute.xlu0 %8700  ;;  %v1241_v53 = vpack.c.bf16 %v890_v49, %v57_v8  ;;  %v1240_v54 = vpack.c.bf16 %v889_v50, %v10065_v3  ;;  %v953_v3 = vsel %vm950_vm2, %v8668_v37, %v8697_v47 }
  0x95   :  { %v8708_v56 = vunpack.i.h.bf16 %v10269_v51  ;;  %v8703_v58 = vunpack.i.h.bf16 %v10271_v52  ;;  %v8702_v60 = vunpack.i.l.bf16 %v10271_v52  ;;  %v8707_v35 = vunpack.i.l.bf16 %v10269_v51 }
  0x96   :  { %7506 = vmatmul.mubr.msk.bf16.vlgmr.msra.gmra.mrb[0].mxu0 %vm1302_vm7, %v10263_v48  ;;  %1396 = vmatprep.subr.bf16.mxu1 %v1241_v53 }
  0x97   :  { %1397 = vmatpush1.bf16.msra.mxu1 %v1240_v54  ;;  %v1018_v1 = vsel %vm1014_vm1, %v8702_v60, %v8703_v58  ;;  %v1017_v8 = vsel %vm1014_vm1, %v8673_v43, %v8702_v60  ;;  %v1082_v2 = vsel %vm1078_vm4, %v8707_v35, %v8708_v56  ;;  %1469 = vmatprep.mubr.bf16.mxu0 %v10005_v7 }
  0x98   :  { %v10292_v61 = vpop.permute.xlu1 %8715  ;;  %v10294_v62 = vpop.permute.xlu0 %8710  ;;  %v1257_v63 = vpack.c.bf16 %v1018_v1, %v954_v34  ;;  %v1256_v0 = vpack.c.bf16 %v1017_v8, %v953_v3  ;;  %v1081_v4 = vsel %vm1078_vm4, %v8678_v59, %v8707_v35 }
  0x99   :  { %v8718_v33 = vunpack.i.h.bf16 %v10292_v61  ;;  %v8717_v37 = vunpack.i.l.bf16 %v10292_v61  ;;  %v8713_v40 = vunpack.i.h.bf16 %v10294_v62  ;;  %v8712_v43 = vunpack.i.l.bf16 %v10294_v62 }
  0x9a   :  { %1398 = vmatprep.subr.bf16.mxu1 %v1257_v63 }
  0x9b   :  { %v1210_v5 = vsel %vm1206_vm5, %v8717_v37, %v8718_v33  ;;  %1399 = vmatpush1.bf16.msra.mxu1 %v1256_v0  ;;  %v1146_v9 = vsel %vm1142_vm3, %v8712_v43, %v8713_v40  ;;  %v1145_v18 = vsel %vm1142_vm3, %v8683_v57, %v8712_v43  ;;  %v1209_v19 = vsel %vm1206_vm5, %v1179_v11, %v8717_v37 }
  0x9c   :  { %v1289_v26 = vpack.c.bf16 %v1210_v5, %v1210_v5  ;;  %v1273_v27 = vpack.c.bf16 %v1146_v9, %v1082_v2  ;;  %v1272_v32 = vpack.c.bf16 %v1145_v18, %v1081_v4  ;;  %v8721_v36 = vpop.permute.xlu0 %8720  ;;  %v10315_v59 = vpop.permute.xlu1 %8725  ;;  %v1288_v47 = vpack.c.bf16 %v1209_v19, %v1209_v19 }
  0x9d   :  { %v8723_v39 = vunpack.i.h.bf16 %v8721_v36  ;;  %v8722_v41 = vunpack.i.l.bf16 %v8721_v36  ;;  %v8728_v45 = vunpack.i.h.bf16 %v10315_v59  ;;  %v8727_v46 = vunpack.i.l.bf16 %v10315_v59 }
  0x9e   :  { %1400 = vmatprep.subr.bf16.mxu1 %v1273_v27  ;;  %v1314_v3 = vsel %vm1306_vm6, %v1288_v47, 0 }
  0x9f   :  { %1401 = vmatpush1.bf16.msra.mxu1 %v1272_v32  ;;  %v891_v55 = vsel %vm886_vm0, %v8693_v44, %v8722_v41  ;;  %v893_v57 = vsel %vm886_vm0, %v8723_v39, %v8727_v46  ;;  %v892_v11 = vsel %vm886_vm0, %v8722_v41, %v8723_v39  ;;  %v894_v49 = vsel %vm886_vm0, %v8727_v46, %v8728_v45 }
  0xa0   :  { %7507 = vmatprep.subr.msk.bf16.mxu1 %vm1306_vm6, %v1289_v26  ;;  %v1242_v50 = vpack.c.bf16 %v891_v55, %v58_v10  ;;  %v8731_v52 = vpop.permute.xlu0 %8730  ;;  %v8736_v53 = vpop.permute.xlu1 %8735  ;;  %v1243_v54 = vpack.c.bf16 %v892_v11, %v59_v14  ;;  %v1245_v44 = vpack.c.bf16 %v894_v49, %v61_v16  ;;  %v1244_v8 = vpack.c.bf16 %v893_v57, %v60_v15 }
  0xa1   :  { %v8733_v60 = vunpack.i.h.bf16 %v8731_v52  ;;  %v8732_v34 = vunpack.i.l.bf16 %v8731_v52  ;;  %v8738_v35 = vunpack.i.h.bf16 %v8736_v53  ;;  %v8737_v1 = vunpack.i.l.bf16 %v8736_v53 }
  0xa2   :  { %1437 = vmatprep.subr.bf16.mxu0 %v1243_v54 }
  0xa3   :  { %1403 = vmatpush1.bf16.msra.mxu1 %v1314_v3  ;;  %v955_v10 = vsel %vm950_vm2, %v8698_v42, %v8732_v34  ;;  %v1019_v6 = vsel %vm1014_vm1, %v8703_v58, %v8737_v1  ;;  %1438 = vmatpush1.bf16.msra.mxu0 %v1242_v50  ;;  %v956_v14 = vsel %vm950_vm2, %v8732_v34, %v8733_v60 }
  0xa4   :  { %v1258_v16 = vpack.c.bf16 %v1019_v6, %v955_v10  ;;  %v10340_v63 = vpop.permute.xlu0 %8740  ;;  %v10342_v0 = vpop.permute.xlu1 %8745  ;;  %v1020_v2 = vsel %vm1014_vm1, %v8737_v1, %v8738_v35  ;;  %1478 = vmatprep.subr.bf16.mxu1 %v1245_v44 }
  0xa5   :  { %v8743_v12 = vunpack.i.h.bf16 %v10340_v63  ;;  %v8742_v15 = vunpack.i.l.bf16 %v10340_v63  ;;  %v8748_v38 = vunpack.i.h.bf16 %v10342_v0  ;;  %v8747_v42 = vunpack.i.l.bf16 %v10342_v0 }
  0xa6   :  { %v1259_v58 = vpack.c.bf16 %v1020_v2, %v956_v14  ;;  %7508 = vmatmul.mubr.msk.bf16.vlgmr.msra.gmra.mrb[0].mxu1 %vm1302_vm7, %v10263_v48 }
  0xa7   :  { %v957_v37 = vsel %vm950_vm2, %v8733_v60, %v8742_v15  ;;  %v1021_v43 = vsel %vm1014_vm1, %v8738_v35, %v8747_v42  ;;  %1479 = vmatpush1.bf16.msra.mxu1 %v1244_v8  ;;  %v958_v4 = vsel %vm950_vm2, %v8742_v15, %v8743_v12  ;;  %v1022_v5 = vsel %vm1014_vm1, %v8747_v42, %v8748_v38 }
  0xa8   :  { %v1260_v9 = vpack.c.bf16 %v1021_v43, %v957_v37  ;;  %v8751_v18 = vpop.permute.xlu0 %8750  ;;  %v8756_v19 = vpop.permute.xlu1 %8755  ;;  %1439 = vmatprep.subr.bf16.mxu0 %v1259_v58  ;;  %v1261_v26 = vpack.c.bf16 %v1022_v5, %v958_v4  ;;  %1510 = vmatprep.mubr.bf16.mxu1 %v10005_v7 }
  0xa9   :  { %v8753_v27 = vunpack.i.h.bf16 %v8751_v18  ;;  %v8752_v32 = vunpack.i.l.bf16 %v8751_v18  ;;  %v8758_v36 = vunpack.i.h.bf16 %v8756_v19  ;;  %v8757_v39 = vunpack.i.l.bf16 %v8756_v19  ;;  %1440 = vmatpush1.bf16.msra.mxu0 %v1258_v16 }
  0xaa   :  { %1480 = vmatprep.subr.bf16.mxu1 %v1261_v26 }
  0xab   :  { %v1083_v41 = vsel %vm1078_vm4, %v8708_v56, %v8752_v32  ;;  %v1147_v46 = vsel %vm1142_vm3, %v8713_v40, %v8757_v39  ;;  %v1084_v47 = vsel %vm1078_vm4, %v8752_v32, %v8753_v27  ;;  %v1148_v55 = vsel %vm1142_vm3, %v8757_v39, %v8758_v36  ;;  %1481 = vmatpush1.bf16.msra.mxu1 %v1260_v9 }
  0xac   :  { %v1274_v57 = vpack.c.bf16 %v1147_v46, %v1083_v41  ;;  %v10368_v11 = vpop.permute.xlu0 %8760  ;;  %v1275_v49 = vpack.c.bf16 %v1148_v55, %v1084_v47  ;;  %v10370_v50 = vpop.permute.xlu1 %8765 }
  0xad   :  { %v8763_v52 = vunpack.i.h.bf16 %v10368_v11  ;;  %v8762_v51 = vunpack.i.l.bf16 %v10368_v11  ;;  %v8768_v56 = vunpack.i.h.bf16 %v10370_v50  ;;  %v8767_v62 = vunpack.i.l.bf16 %v10370_v50 }
  0xae   :  { %1441 = vmatprep.subr.bf16.mxu0 %v1275_v49 }
  0xaf   :  { %v1085_v40 = vsel %vm1078_vm4, %v8753_v27, %v8762_v51  ;;  %1442 = vmatpush1.bf16.msra.mxu0 %v1274_v57  ;;  %v1149_v53 = vsel %vm1142_vm3, %v8758_v36, %v8767_v62  ;;  %v1086_v54 = vsel %vm1078_vm4, %v8762_v51, %v8763_v52  ;;  %v1150_v44 = vsel %vm1142_vm3, %v8767_v62, %v8768_v56 }
  0xb0   :  { %v8771_v60 = vpop.permute.xlu0 %8770  ;;  %v1276_v34 = vpack.c.bf16 %v1149_v53, %v1085_v40  ;;  %v10384_v35 = vpop.permute.xlu1 %8775  ;;  %v1277_v1 = vpack.c.bf16 %v1150_v44, %v1086_v54 }
  0xb1   :  { %v8773_v3 = vunpack.i.h.bf16 %v8771_v60  ;;  %v8772_v8 = vunpack.i.l.bf16 %v8771_v60  ;;  %v8778_v10 = vunpack.i.h.bf16 %v10384_v35  ;;  %v8777_v6 = vunpack.i.l.bf16 %v10384_v35 }
  0xb2   :  { %1482 = vmatprep.subr.bf16.mxu1 %v1277_v1 }
  0xb3   :  { %v1212_v14 = vsel %vm1206_vm5, %v8772_v8, %v8773_v3  ;;  %v1211_v16 = vsel %vm1206_vm5, %v8718_v33, %v8772_v8  ;;  %v1214_v2 = vsel %vm1206_vm5, %v8777_v6, %v8778_v10  ;;  %1483 = vmatpush1.bf16.msra.mxu1 %v1276_v34  ;;  %v1213_v15 = vsel %vm1206_vm5, %v8773_v3, %v8777_v6 }
  0xb4   :  { %v1291_v42 = vpack.c.bf16 %v1212_v14, %v1212_v14  ;;  %v1290_v58 = vpack.c.bf16 %v1211_v16, %v1211_v16  ;;  %v1293_v37 = vpack.c.bf16 %v1214_v2, %v1214_v2  ;;  %v10396_v43 = vpop.permute.xlu1 %8785  ;;  %v8781_v4 = vpop.permute.xlu0 %8780  ;;  %v1292_v5 = vpack.c.bf16 %v1213_v15, %v1213_v15 }
  0xb5   :  { %v8788_v9 = vunpack.i.h.bf16 %v10396_v43  ;;  %v8787_v61 = vunpack.i.l.bf16 %v10396_v43  ;;  %v8783_v18 = vunpack.i.h.bf16 %v8781_v4  ;;  %v8782_v33 = vunpack.i.l.bf16 %v8781_v4 }
  0xb6   :  { %7509 = vmatprep.subr.msk.bf16.mxu0 %vm1306_vm6, %v1291_v42  ;;  %v1320_v19 = vsel %vm1306_vm6, %v1290_v58, 0  ;;  %7511 = vmatprep.subr.msk.bf16.mxu1 %vm1306_vm6, %v1293_v37  ;;  %v1326_v26 = vsel %vm1306_vm6, %v1292_v5, 0 }
  0xb7   :  { %1444 = vmatpush1.bf16.msra.mxu0 %v1320_v19  ;;  %v897_v27 = vsel %vm886_vm0, %v8783_v18, %v8787_v61  ;;  %v895_v32 = vsel %vm886_vm0, %v8728_v45, %v8782_v33  ;;  %v896_v36 = vsel %vm886_vm0, %v8782_v33, %v8783_v18  ;;  %1485 = vmatpush1.bf16.msra.mxu1 %v1326_v26 }
  0xb8   :  { %v1248_v39 = vpack.c.bf16 %v897_v27, %v64_v25  ;;  %v1246_v41 = vpack.c.bf16 %v895_v32, %v62_v17  ;;  %v8796_v46 = vpop.permute.xlu1 %8795  ;;  %v8791_v47 = vpop.permute.xlu0 %8790  ;;  %v1247_v55 = vpack.c.bf16 %v896_v36, %v63_v24  ;;  %v898_v59 = vsel %vm886_vm0, %v8787_v61, %v8788_v9 }
  0xb9   :  { %v8798_v57 = vunpack.i.h.bf16 %v8796_v46  ;;  %v8797_v45 = vunpack.i.l.bf16 %v8796_v46  ;;  %v8793_v49 = vunpack.i.h.bf16 %v8791_v47  ;;  %v8792_v51 = vunpack.i.l.bf16 %v8791_v47 }
  0xba   :  { %1519 = vmatprep.subr.bf16.mxu0 %v1247_v55  ;;  %7510 = vmatmul.mubr.msk.bf16.vlgmr.msra.gmra.mrb[4].mxu0 %vm1302_vm7, %v10263_v48  ;;  %v1249_v17 = vpack.c.bf16 %v898_v59, %v65_v22 }
  0xbb   :  { %v1023_v13 = vsel %vm1014_vm1, %v8748_v38, %v8797_v45  ;;  %v959_v24 = vsel %vm950_vm2, %v8743_v12, %v8792_v51  ;;  %1520 = vmatpush1.bf16.msra.mxu0 %v1246_v41  ;;  %v960_v25 = vsel %vm950_vm2, %v8792_v51, %v8793_v49  ;;  %v1024_v62 = vsel %vm1014_vm1, %v8797_v45, %v8798_v57 }
  0xbc   :  { %v1262_v40 = vpack.c.bf16 %v1023_v13, %v959_v24  ;;  %v10430_v53 = vpop.permute.xlu1 %8805  ;;  %v10432_v54 = vpop.permute.xlu0 %8800  ;;  %v1263_v20 = vpack.c.bf16 %v1024_v62, %v960_v25  ;;  %1560 = vmatprep.subr.bf16.mxu1 %v1249_v17  ;;  %7512 = vmatmul.mubr.msk.bf16.vlgmr.msra.gmra.mrb[4].mxu1 %vm1302_vm7, %v10263_v48 }
  0xbd   :  { %v8808_v22 = vunpack.i.h.bf16 %v10430_v53  ;;  %v8807_v63 = vunpack.i.l.bf16 %v10430_v53  ;;  %v8803_v0 = vunpack.i.h.bf16 %v10432_v54  ;;  %v8802_v12 = vunpack.i.l.bf16 %v10432_v54  ;;  %1561 = vmatpush1.bf16.msra.mxu1 %v1248_v39  ;;  %1551 = vmatprep.mubr.bf16.mxu0 %v10005_v7 }
  0xbe   :  { %1521 = vmatprep.subr.bf16.mxu0 %v1263_v20  ;;  %1592 = vmatprep.mubr.bf16.mxu1 %v10005_v7 }
  0xbf   :  { %v1025_v38 = vsel %vm1014_vm1, %v8798_v57, %v8807_v63  ;;  %v961_v44 = vsel %vm950_vm2, %v8793_v49, %v8802_v12  ;;  %1522 = vmatpush1.bf16.msra.mxu0 %v1262_v40  ;;  %v962_v60 = vsel %vm950_vm2, %v8802_v12, %v8803_v0  ;;  %v1026_v34 = vsel %vm1014_vm1, %v8807_v63, %v8808_v22 }
  0xc0   :  { %v1264_v1 = vpack.c.bf16 %v1025_v38, %v961_v44  ;;  %v8816_v3 = vpop.permute.xlu1 %8815  ;;  %v8811_v8 = vpop.permute.xlu0 %8810  ;;  %v1265_v6 = vpack.c.bf16 %v1026_v34, %v962_v60 }
  0xc1   :  { %v8818_v14 = vunpack.i.h.bf16 %v8816_v3  ;;  %v8817_v16 = vunpack.i.l.bf16 %v8816_v3  ;;  %v8813_v2 = vunpack.i.h.bf16 %v8811_v8  ;;  %v8812_v15 = vunpack.i.l.bf16 %v8811_v8 }
  0xc2   :  { %1562 = vmatprep.subr.bf16.mxu1 %v1265_v6 }
  0xc3   :  { %v1151_v42 = vsel %vm1142_vm3, %v8768_v56, %v8817_v16  ;;  %v1087_v58 = vsel %vm1078_vm4, %v8763_v52, %v8812_v15  ;;  %v1088_v37 = vsel %vm1078_vm4, %v8812_v15, %v8813_v2  ;;  %v1152_v4 = vsel %vm1142_vm3, %v8817_v16, %v8818_v14  ;;  %1563 = vmatpush1.bf16.msra.mxu1 %v1264_v1 }
  0xc4   :  { %v1278_v5 = vpack.c.bf16 %v1151_v42, %v1087_v58  ;;  %v10458_v61 = vpop.permute.xlu1 %8825  ;;  %v10460_v18 = vpop.permute.xlu0 %8820  ;;  %v1279_v33 = vpack.c.bf16 %v1152_v4, %v1088_v37 }
  0xc5   :  { %v8828_v19 = vunpack.i.h.bf16 %v10458_v61  ;;  %v8827_v50 = vunpack.i.l.bf16 %v10458_v61  ;;  %v8823_v56 = vunpack.i.h.bf16 %v10460_v18  ;;  %v8822_v11 = vunpack.i.l.bf16 %v10460_v18 }
  0xc6   :  { %1523 = vmatprep.subr.bf16.mxu0 %v1279_v33 }
  0xc7   :  { %v1153_v52 = vsel %vm1142_vm3, %v8818_v14, %v8827_v50  ;;  %v1089_v26 = vsel %vm1078_vm4, %v8813_v2, %v8822_v11  ;;  %1524 = vmatpush1.bf16.msra.mxu0 %v1278_v5  ;;  %v1090_v27 = vsel %vm1078_vm4, %v8822_v11, %v8823_v56  ;;  %v1154_v32 = vsel %vm1142_vm3, %v8827_v50, %v8828_v19 }
  0xc8   :  { %v1280_v36 = vpack.c.bf16 %v1153_v52, %v1089_v26  ;;  %v10474_v39 = vpop.permute.xlu1 %8835  ;;  %v8831_v41 = vpop.permute.xlu0 %8830  ;;  %v1281_v46 = vpack.c.bf16 %v1154_v32, %v1090_v27 }
  0xc9   :  { %v8838_v47 = vunpack.i.h.bf16 %v10474_v39  ;;  %v8837_v55 = vunpack.i.l.bf16 %v10474_v39  ;;  %v8833_v59 = vunpack.i.h.bf16 %v8831_v41  ;;  %v8832_v57 = vunpack.i.l.bf16 %v8831_v41  ;;  %v8971_v39 = vld [vmem:[%s13074_s3] ss:$20 sps:$4 sm:$0xff]  }
  0xca   :  { %1564 = vmatprep.subr.bf16.mxu1 %v1281_v46 }
  0xcb   :  { %v1218_v45 = vsel %vm1206_vm5, %v8837_v55, %v8838_v47  ;;  %v1216_v49 = vsel %vm1206_vm5, %v8832_v57, %v8833_v59  ;;  %v1215_v51 = vsel %vm1206_vm5, %v8778_v10, %v8832_v57  ;;  %1565 = vmatpush1.bf16.msra.mxu1 %v1280_v36  ;;  %v1217_v17 = vsel %vm1206_vm5, %v8833_v59, %v8837_v55 }
  0xcc   :  { %v1297_v13 = vpack.c.bf16 %v1218_v45, %v1218_v45  ;;  %v1295_v24 = vpack.c.bf16 %v1216_v49, %v1216_v49  ;;  %v885_v25 = vpop.permute.xlu1 %884  ;;  %v8841_v62 = vpop.permute.xlu0 %8840  ;;  %v1294_v40 = vpack.c.bf16 %v1215_v51, %v1215_v51  ;;  %v1296_v20 = vpack.c.bf16 %v1217_v17, %v1217_v17  ;;  %v8973_v49 = vld [vmem:[%s13074_s3 + $0x4] ss:$20 sps:$4 sm:$0xff]   ;;  %v8976_v51 = vld [vmem:[%s13074_s3 + $0xc] ss:$20 sps:$4 sm:$0xff]  }
  0xcd   :  { %v1253_v63 = vpack.c.bf16 %v885_v25, %v10188_v31  ;;  %v8843_v12 = vunpack.i.h.bf16 %v8841_v62  ;;  %v8842_v38 = vunpack.i.l.bf16 %v8841_v62 }
  0xce   :  { %7513 = vmatprep.subr.msk.bf16.mxu0 %vm1306_vm6, %v1295_v24  ;;  %v1332_v44 = vsel %vm1306_vm6, %v1294_v40, 0  ;;  %7515 = vmatprep.subr.msk.bf16.mxu1 %vm1306_vm6, %v1297_v13  ;;  %v1338_v35 = vsel %vm1306_vm6, %v1296_v20, 0 }
  0xcf   :  { %v901_v10 = vsel %vm886_vm0, %v8843_v12, %v885_v25  ;;  %v899_v60 = vsel %vm886_vm0, %v8788_v9, %v8842_v38  ;;  %1526 = vmatpush1.bf16.msra.mxu0 %v1332_v44  ;;  %v900_v34 = vsel %vm886_vm0, %v8842_v38, %v8843_v12  ;;  %1567 = vmatpush1.bf16.msra.mxu1 %v1338_v35  ;;  %v8979_v12 = vld [vmem:[%s13074_s3 + $0x2c] ss:$20 sps:$4 sm:$0xff]   ;;  %v8982_v38 = vld [vmem:[%s13074_s3 + $0x34] ss:$20 sps:$4 sm:$0xff]  }
  0xd0   :  { %v1252_v31 = vpack.c.bf16 %v901_v10, %v68_v29  ;;  %v1250_v1 = vpack.c.bf16 %v899_v60, %v66_v23  ;;  %v8851_v3 = vpop.permute.xlu1 %8850  ;;  %v8846_v8 = vpop.permute.xlu0 %8845  ;;  %v1251_v6 = vpack.c.bf16 %v900_v34, %v67_v30  ;;  %1642 = vmatprep.subr.bf16.mxu1 %v1253_v63  ;;  %v9999_v44 = vld [vmem:[%s13073_s1] sm:$0xf]  ;;  %v8977_v35 = vld [vmem:[%s13074_s3 + $0x28] ss:$20 sps:$4 sm:$0xff]   ;;  %v8980_v10 = vld [vmem:[%s13074_s3 + $0x30] ss:$20 sps:$4 sm:$0xff]  }
  0xd1   :  { %v8853_v14 = vunpack.i.h.bf16 %v8851_v3  ;;  %v8852_v43 = vunpack.i.l.bf16 %v8851_v3  ;;  %v8848_v16 = vunpack.i.h.bf16 %v8846_v8  ;;  %v8847_v9 = vunpack.i.l.bf16 %v8846_v8  ;;  %v8985_v60 = vld [vmem:[%s13074_s3 + $0x54] ss:$20 sps:$4 sm:$0xff]   ;;  %v8988_v34 = vld [vmem:[%s13074_s3 + $0x5c] ss:$20 sps:$4 sm:$0xff]   ;;  %v8994_v8 = vld [vmem:[%s13074_s3 + $0x84] ss:$20 sps:$4 sm:$0xff]  }
  0xd2   :  { %1601 = vmatprep.subr.bf16.mxu0 %v1251_v6  ;;  %7514 = vmatmul.mubr.msk.bf16.vlgmr.msra.gmra.mrb[8].mxu0 %vm1302_vm7, %v10263_v48  ;;  %v8991_v3 = vld [vmem:[%s13074_s3 + $0x7c] ss:$20 sps:$4 sm:$0xff]   ;;  %v8989_v6 = vld [vmem:[%s13074_s3 + $0x78] ss:$20 sps:$4 sm:$0xff]  }
  0xd3   :  { %v1027_v28 = vsel %vm1014_vm1, %v8808_v22, %v8852_v43  ;;  %v963_v23 = vsel %vm950_vm2, %v8803_v0, %v8847_v9  ;;  %1602 = vmatpush1.bf16.msra.mxu0 %v1250_v1  ;;  %v964_v21 = vsel %vm950_vm2, %v8847_v9, %v8848_v16  ;;  %v1028_v29 = vsel %vm1014_vm1, %v8852_v43, %v8853_v14  ;;  %v8986_v1 = vld [vmem:[%s13074_s3 + $0x58] ss:$20 sps:$4 sm:$0xff]   ;;  %v8995_v9 = vld [vmem:[%s13074_s3 + $0xa0] ss:$20 sps:$4 sm:$0xff]  }
  0xd4   :  { %v1266_v30 = vpack.c.bf16 %v1027_v28, %v963_v23  ;;  %v1013_v2 = vpop.permute.xlu1 %1012  ;;  %v949_v15 = vpop.permute.xlu0 %948  ;;  %v1267_v42 = vpack.c.bf16 %v1028_v29, %v964_v21  ;;  %7516 = vmatmul.mubr.msk.bf16.vlgmr.msra.gmra.mrb[8].mxu1 %vm1302_vm7, %v10263_v48  ;;  %1633 = vmatprep.mubr.bf16.mxu0 %v10005_v7  ;;  %v8997_v43 = vld [vmem:[%s13074_s3 + $0xa4] ss:$20 sps:$4 sm:$0xff]   ;;  %v8998_v28 = vld [vmem:[%s13074_s3 + $0xa8] ss:$20 sps:$4 sm:$0xff]   ;;  %v9003_v23 = vld [vmem:[%s13074_s3 + $0xcc] ss:$20 sps:$4 sm:$0xff]  }
  0xd5   :  { %v1029_v53 = vsel %vm1014_vm1, %v8853_v14, %v1013_v2  ;;  %v965_v54 = vsel %vm950_vm2, %v8848_v16, %v949_v15  ;;  %v1269_v22 = vpack.c.bf16 %v1013_v2, %v949_v15  ;;  %1643 = vmatpush1.bf16.msra.mxu1 %v1252_v31  ;;  %1674 = vmatprep.mubr.bf16.mxu1 %v10005_v7  ;;  %v8983_v31 = vld [vmem:[%s13074_s3 + $0x50] ss:$20 sps:$4 sm:$0xff]   ;;  %v8992_v14 = vld [vmem:[%s13074_s3 + $0x80] ss:$20 sps:$4 sm:$0xff]   ;;  %v9001_v29 = vld [vmem:[%s13074_s3 + $0xc8] ss:$20 sps:$4 sm:$0xff]  }
  0xd6   :  { %v1268_v0 = vpack.c.bf16 %v1029_v53, %v965_v54  ;;  %1603 = vmatprep.subr.bf16.mxu0 %v1267_v42  ;;  %v9000_v16 = vld [vmem:[%s13074_s3 + $0xac] ss:$20 sps:$4 sm:$0xff]   ;;  %v9006_v21 = vld [vmem:[%s13074_s3 + $0xd4] ss:$20 sps:$4 sm:$0xff]   ;;  %v9012_v15 = vld [vmem:[%s13074_s3 + $0xfc] ss:$20 sps:$4 sm:$0xff]  }
  0xd7   :  { %1604 = vmatpush1.bf16.msra.mxu0 %v1266_v30  ;;  %1644 = vmatprep.subr.bf16.mxu1 %v1269_v22  ;;  %v9004_v30 = vld [vmem:[%s13074_s3 + $0xd0] ss:$20 sps:$4 sm:$0xff]   ;;  %v9009_v2 = vld [vmem:[%s13074_s3 + $0xf4] ss:$20 sps:$4 sm:$0xff]   ;;  %v9010_v53 = vld [vmem:[%s13074_s3 + $0xf8] ss:$20 sps:$4 sm:$0xff]  }
  0xd8   :  { %v8861_v58 = vpop.permute.xlu1 %8860  ;;  %v8856_v37 = vpop.permute.xlu0 %8855  ;;  %v9007_v42 = vld [vmem:[%s13074_s3 + $0xf0] ss:$20 sps:$4 sm:$0xff]  }
  0xd9   :  { %v8863_v4 = vunpack.i.h.bf16 %v8861_v58  ;;  %v8862_v5 = vunpack.i.l.bf16 %v8861_v58  ;;  %v8858_v33 = vunpack.i.h.bf16 %v8856_v37  ;;  %v8857_v48 = vunpack.i.l.bf16 %v8856_v37  ;;  %1645 = vmatpush1.bf16.msra.mxu1 %v1268_v0  ;;  %v9015_v54 = vld [vmem:[%s13074_s3 + $0x11c] ss:$20 sps:$4 sm:$0xff]   ;;  %v9018_v22 = vld [vmem:[%s13074_s3 + $0x124] ss:$20 sps:$4 sm:$0xff]   ;;  %v9016_v58 = vld [vmem:[%s13074_s3 + $0x120] ss:$20 sps:$4 sm:$0xff]  }
  0xda   :  { %v9013_v0 = vld [vmem:[%s13074_s3 + $0x118] ss:$20 sps:$4 sm:$0xff]  }
  0xdb   :  { %v1155_v50 = vsel %vm1142_vm3, %v8828_v19, %v8862_v5  ;;  %v1091_v11 = vsel %vm1078_vm4, %v8823_v56, %v8857_v48  ;;  %v1092_v52 = vsel %vm1078_vm4, %v8857_v48, %v8858_v33  ;;  %v1156_v26 = vsel %vm1142_vm3, %v8862_v5, %v8863_v4  ;;  %v9021_v37 = vld [vmem:[%s13074_s3 + $0x144] ss:$20 sps:$4 sm:$0xff]   ;;  %v9019_v5 = vld [vmem:[%s13074_s3 + $0x140] ss:$20 sps:$4 sm:$0xff]  }
  0xdc   :  { %v1282_v27 = vpack.c.bf16 %v1155_v50, %v1091_v11  ;;  %v1077_v32 = vpop.permute.xlu0 %1076  ;;  %v1283_v36 = vpack.c.bf16 %v1156_v26, %v1092_v52  ;;  %v1141_v41 = vpop.permute.xlu1 %1140  ;;  %v9027_v48 = vld [vmem:[%s13074_s3 + $0x16c] ss:$20 sps:$4 sm:$0xff]   ;;  %v9030_v50 = vld [vmem:[%s13074_s3 + $0x174] ss:$20 sps:$4 sm:$0xff]   ;;  %v9028_v52 = vld [vmem:[%s13074_s3 + $0x170] ss:$20 sps:$4 sm:$0xff]  }
  0xdd   :  { %v1093_v46 = vsel %vm1078_vm4, %v8858_v33, %v1077_v32  ;;  %v1157_v55 = vsel %vm1142_vm3, %v8863_v4, %v1141_v41  ;;  %v1285_v59 = vpack.c.bf16 %v1141_v41, %v1077_v32  ;;  %v9024_v4 = vld [vmem:[%s13074_s3 + $0x14c] ss:$20 sps:$4 sm:$0xff]   ;;  %v9022_v33 = vld [vmem:[%s13074_s3 + $0x148] ss:$20 sps:$4 sm:$0xff]   ;;  %v9031_v32 = vld [vmem:[%s13074_s3 + $0x190] ss:$20 sps:$4 sm:$0xff]  }
  0xde   :  { %1605 = vmatprep.subr.bf16.mxu0 %v1283_v36  ;;  %v1284_v61 = vpack.c.bf16 %v1157_v55, %v1093_v46  ;;  %v9025_v11 = vld [vmem:[%s13074_s3 + $0x168] ss:$20 sps:$4 sm:$0xff]   ;;  %v9034_v36 = vld [vmem:[%s13074_s3 + $0x198] ss:$20 sps:$4 sm:$0xff]   ;;  %vm6701_vm3 = vcmask 162816  }
  0xdf   :  { %1606 = vmatpush1.bf16.msra.mxu0 %v1282_v27  ;;  %1646 = vmatprep.subr.bf16.mxu1 %v1285_v59  ;;  %v9033_v26 = vld [vmem:[%s13074_s3 + $0x194] ss:$20 sps:$4 sm:$0xff]   ;;  %v9036_v27 = vld [vmem:[%s13074_s3 + $0x19c] ss:$20 sps:$4 sm:$0xff]   ;;  %v9042_v46 = vld [vmem:[%s13074_s3 + $0x1c4] ss:$20 sps:$4 sm:$0xff]  }
  0xe0   :  { %v8866_v18 = vpop.permute.xlu0 %8865  ;;  %1647 = vmatpush1.bf16.msra.mxu1 %v1284_v61  ;;  %v1205_v19 = vpop.permute.xlu1 %1204  ;;  %v9039_v41 = vld [vmem:[%s13074_s3 + $0x1bc] ss:$20 sps:$4 sm:$0xff]   ;;  %v9037_v55 = vld [vmem:[%s13074_s3 + $0x1b8] ss:$20 sps:$4 sm:$0xff]   ;;  %v9040_v59 = vld [vmem:[%s13074_s3 + $0x1c0] ss:$20 sps:$4 sm:$0xff]  }
  0xe1   :  { %v8868_v56 = vunpack.i.h.bf16 %v8866_v18  ;;  %v8867_v57 = vunpack.i.l.bf16 %v8866_v18  ;;  %v1301_v45 = vpack.c.bf16 %v1205_v19, %v1205_v19  ;;  %v9045_v61 = vld [vmem:[%s13074_s3 + $0x1e4] ss:$20 sps:$4 sm:$0xff]   ;;  %v9048_v18 = vld [vmem:[%s13074_s3 + $0x1ec] ss:$20 sps:$4 sm:$0xff]  }
  0xe3   :  { %v1220_v17 = vsel %vm1206_vm5, %v8867_v57, %v8868_v56  ;;  %v1219_v13 = vsel %vm1206_vm5, %v8838_v47, %v8867_v57  ;;  %v1221_v24 = vsel %vm1206_vm5, %v8868_v56, %v1205_v19  ;;  %7519 = vmatprep.subr.msk.bf16.mxu1 %vm1306_vm6, %v1301_v45  ;;  %v8974_v47 = vld [vmem:[%s13074_s3 + $0x8] ss:$20 sps:$4 sm:$0xff]   ;;  %v9043_v19 = vld [vmem:[%s13074_s3 + $0x1e0] ss:$20 sps:$4 sm:$0xff]  }
  0xe4   :  { %v1299_v25 = vpack.c.bf16 %v1220_v17, %v1220_v17  ;;  %v1298_v62 = vpack.c.bf16 %v1219_v13, %v1219_v13  ;;  %v1300_v40 = vpack.c.bf16 %v1221_v24, %v1221_v24  ;;  %v9046_v56 = vld [vmem:[%s13074_s3 + $0x1e8] ss:$20 sps:$4 sm:$0xff]   ;;  %v9051_v57 = vld [vmem:[%s13074_s3 + $0x20c] ss:$20 sps:$4 sm:$0xff]   ;;  %v9055_v24 = vld [vmem:[%s13074_s3 + $0x230] ss:$20 sps:$4 sm:$0xff]  }
  0xe5   :  { %v9054_v45 = vld [vmem:[%s13074_s3 + $0x214] ss:$20 sps:$4 sm:$0xff]   ;;  %v9060_v13 = vld [vmem:[%s13074_s3 + $0x23c] ss:$20 sps:$4 sm:$0xff]  }
  0xe6   :  { %7517 = vmatprep.subr.msk.bf16.mxu0 %vm1306_vm6, %v1299_v25  ;;  %v1344_v20 = vsel %vm1306_vm6, %v1298_v62, 0  ;;  %v1350_v63 = vsel %vm1306_vm6, %v1300_v40, 0  ;;  %v9057_v17 = vld [vmem:[%s13074_s3 + $0x234] ss:$20 sps:$4 sm:$0xff]   ;;  %v9058_v25 = vld [vmem:[%s13074_s3 + $0x238] ss:$20 sps:$4 sm:$0xff]  }
  0xe7   :  { %1608 = vmatpush1.bf16.msra.mxu0 %v1344_v20  ;;  %1649 = vmatpush1.bf16.msra.mxu1 %v1350_v63  ;;  %v9063_v62 = vld [vmem:[%s13074_s3 + $0x25c] ss:$20 sps:$4 sm:$0xff]   ;;  %v9066_v40 = vld [vmem:[%s13074_s3 + $0x264] ss:$20 sps:$4 sm:$0xff]   ;;  %v9064_v63 = vld [vmem:[%s13074_s3 + $0x260] ss:$20 sps:$4 sm:$0xff]  }
  0xe8   :  { %5046 = vmatprep.subr.bf16.mxu0 %v8973_v49  ;;  %5374 = vmatprep.subr.bf16.mxu1 %v8976_v51  ;;  %v9049_v49 = vld [vmem:[%s13074_s3 + $0x208] ss:$20 sps:$4 sm:$0xff]   ;;  %v9052_v51 = vld [vmem:[%s13074_s3 + $0x210] ss:$20 sps:$4 sm:$0xff]   ;;  %v9061_v20 = vld [vmem:[%s13074_s3 + $0x258] ss:$20 sps:$4 sm:$0xff]  }
  0xea   :  { %7518 = vmatmul.mubr.msk.bf16.vlgmr.msra.gmra.mrb[12].mxu0 %vm1302_vm7, %v9999_v44  ;;  %7520 = vmatmul.mubr.msk.bf16.vlgmr.msra.gmra.mrb[12].mxu1 %vm1302_vm7, %v9999_v44  ;;  %v9070_v44 = vld [vmem:[%s13074_s3 + $0x288] ss:$20 sps:$4 sm:$0xff]  }
  0xeb   :  { %5047 = vmatpush1.bf16.msra.mxu0 %v8971_v39  ;;  %5375 = vmatpush1.bf16.msra.mxu1 %v8974_v47  ;;  %v9069_v39 = vld [vmem:[%s13074_s3 + $0x284] ss:$20 sps:$4 sm:$0xff]   ;;  %v9072_v47 = vld [vmem:[%s13074_s3 + $0x28c] ss:$20 sps:$4 sm:$0xff]  }
  0xec   :  { %5048 = vmatprep.subr.bf16.mxu0 %v8979_v12  ;;  %5376 = vmatprep.subr.bf16.mxu1 %v8982_v38  ;;  %v9067_v38 = vld [vmem:[%s13074_s3 + $0x280] ss:$20 sps:$4 sm:$0xff]  }
  0xef   :  { %5049 = vmatpush1.bf16.msra.mxu0 %v8977_v35  ;;  %5377 = vmatpush1.bf16.msra.mxu1 %v8980_v10 }
  0xf0   :  { %5050 = vmatprep.subr.bf16.mxu0 %v8985_v60  ;;  %5378 = vmatprep.subr.bf16.mxu1 %v8988_v34 }
  0xf3   :  { %5051 = vmatpush1.bf16.msra.mxu0 %v8983_v31  ;;  %5379 = vmatpush1.bf16.msra.mxu1 %v8986_v1  ;;  %v9075_v1 = vld [vmem:[%s13074_s3 + $0x2ac] ss:$20 sps:$4 sm:$0xff]  }
  0xf4   :  { %5052 = vmatprep.subr.bf16.mxu0 %v8991_v3  ;;  %5380 = vmatprep.subr.bf16.mxu1 %v8994_v8  ;;  %v9078_v3 = vld [vmem:[%s13074_s3 + $0x2b4] ss:$20 sps:$4 sm:$0xff]  }
  0xf5   :  { %v9073_v8 = vld [vmem:[%s13074_s3 + $0x2a8] ss:$20 sps:$4 sm:$0xff]  }
  0xf7   :  { %5053 = vmatpush1.bf16.msra.mxu0 %v8989_v6  ;;  %5381 = vmatpush1.bf16.msra.mxu1 %v8992_v14  ;;  %v9076_v6 = vld [vmem:[%s13074_s3 + $0x2b0] ss:$20 sps:$4 sm:$0xff]   ;;  %v9081_v14 = vld [vmem:[%s13074_s3 + $0x2d4] ss:$20 sps:$4 sm:$0xff]  }
  0xf8   :  { %5054 = vmatprep.subr.bf16.mxu0 %v8997_v43  ;;  %5382 = vmatprep.subr.bf16.mxu1 %v9000_v16  ;;  %v9084_v43 = vld [vmem:[%s13074_s3 + $0x2dc] ss:$20 sps:$4 sm:$0xff]  }
  0xf9   :  { %v9079_v16 = vld [vmem:[%s13074_s3 + $0x2d0] ss:$20 sps:$4 sm:$0xff]  }
  0xfb   :  { %5055 = vmatpush1.bf16.msra.mxu0 %v8995_v9  ;;  %5383 = vmatpush1.bf16.msra.mxu1 %v8998_v28  ;;  %v9082_v9 = vld [vmem:[%s13074_s3 + $0x2d8] ss:$20 sps:$4 sm:$0xff]   ;;  %v9087_v28 = vld [vmem:[%s13074_s3 + $0x2fc] ss:$20 sps:$4 sm:$0xff]  }
  0xfc   :  { %5056 = vmatprep.subr.bf16.mxu0 %v9003_v23  ;;  %5384 = vmatprep.subr.bf16.mxu1 %v9006_v21  ;;  %v9090_v23 = vld [vmem:[%s13074_s3 + $0x304] ss:$20 sps:$4 sm:$0xff]  }
  0xfd   :  { %v9085_v21 = vld [vmem:[%s13074_s3 + $0x2f8] ss:$20 sps:$4 sm:$0xff]  }
  0xff   :  { %5057 = vmatpush1.bf16.msra.mxu0 %v9001_v29  ;;  %5385 = vmatpush1.bf16.msra.mxu1 %v9004_v30  ;;  %v9088_v29 = vld [vmem:[%s13074_s3 + $0x300] ss:$20 sps:$4 sm:$0xff]   ;;  %v9093_v30 = vld [vmem:[%s13074_s3 + $0x324] ss:$20 sps:$4 sm:$0xff]  }
 0x100   :  { %5058 = vmatprep.subr.bf16.mxu0 %v9009_v2  ;;  %5386 = vmatprep.subr.bf16.mxu1 %v9012_v15  ;;  %v9096_v2 = vld [vmem:[%s13074_s3 + $0x32c] ss:$20 sps:$4 sm:$0xff]  }
 0x101   :  { %v9091_v15 = vld [vmem:[%s13074_s3 + $0x320] ss:$20 sps:$4 sm:$0xff]  }
 0x103   :  { %5059 = vmatpush1.bf16.msra.mxu0 %v9007_v42  ;;  %5387 = vmatpush1.bf16.msra.mxu1 %v9010_v53  ;;  %v9094_v42 = vld [vmem:[%s13074_s3 + $0x328] ss:$20 sps:$4 sm:$0xff]  }
 0x104   :  { %5060 = vmatprep.subr.bf16.mxu0 %v9015_v54  ;;  %5388 = vmatprep.subr.bf16.mxu1 %v9018_v22 }
 0x107   :  { %5061 = vmatpush1.bf16.msra.mxu0 %v9013_v0  ;;  %5389 = vmatpush1.bf16.msra.mxu1 %v9016_v58  ;;  %v9099_v58 = vld [vmem:[%s13074_s3 + $0x34c] ss:$20 sps:$4 sm:$0xff]  }
 0x108   :  { %5062 = vmatprep.subr.bf16.mxu0 %v9021_v37  ;;  %5390 = vmatprep.subr.bf16.mxu1 %v9024_v4  ;;  %v9102_v37 = vld [vmem:[%s13074_s3 + $0x354] ss:$20 sps:$4 sm:$0xff]  }
 0x10b   :  { %5063 = vmatpush1.bf16.msra.mxu0 %v9019_v5  ;;  %5391 = vmatpush1.bf16.msra.mxu1 %v9022_v33  ;;  %v9097_v5 = vld [vmem:[%s13074_s3 + $0x348] ss:$20 sps:$4 sm:$0xff]   ;;  %v9100_v33 = vld [vmem:[%s13074_s3 + $0x350] ss:$20 sps:$4 sm:$0xff]  }
 0x10c   :  { %5064 = vmatprep.subr.bf16.mxu0 %v9027_v48  ;;  %5392 = vmatprep.subr.bf16.mxu1 %v9030_v50  ;;  %v9105_v48 = vld [vmem:[%s13074_s3 + $0x374] ss:$20 sps:$4 sm:$0xff]   ;;  %v9108_v50 = vld [vmem:[%s13074_s3 + $0x37c] ss:$20 sps:$4 sm:$0xff]  }
 0x10f   :  { %5065 = vmatpush1.bf16.msra.mxu0 %v9025_v11  ;;  %5393 = vmatpush1.bf16.msra.mxu1 %v9028_v52  ;;  %v9103_v11 = vld [vmem:[%s13074_s3 + $0x370] ss:$20 sps:$4 sm:$0xff]   ;;  %v9106_v52 = vld [vmem:[%s13074_s3 + $0x378] ss:$20 sps:$4 sm:$0xff]  }
 0x110   :  { %5066 = vmatprep.subr.bf16.mxu0 %v9033_v26  ;;  %5394 = vmatprep.subr.bf16.mxu1 %v9036_v27  ;;  %v9111_v26 = vld [vmem:[%s13074_s3 + $0x39c] ss:$20 sps:$4 sm:$0xff]   ;;  %v9114_v27 = vld [vmem:[%s13074_s3 + $0x3a4] ss:$20 sps:$4 sm:$0xff]  }
 0x113   :  { %5067 = vmatpush1.bf16.msra.mxu0 %v9031_v32  ;;  %5395 = vmatpush1.bf16.msra.mxu1 %v9034_v36  ;;  %v9109_v32 = vld [vmem:[%s13074_s3 + $0x398] ss:$20 sps:$4 sm:$0xff]   ;;  %v9112_v36 = vld [vmem:[%s13074_s3 + $0x3a0] ss:$20 sps:$4 sm:$0xff]  }
 0x114   :  { %5068 = vmatprep.subr.bf16.mxu0 %v9039_v41  ;;  %5396 = vmatprep.subr.bf16.mxu1 %v9042_v46  ;;  %v9117_v41 = vld [vmem:[%s13074_s3 + $0x3c4] ss:$20 sps:$4 sm:$0xff]   ;;  %v9120_v46 = vld [vmem:[%s13074_s3 + $0x3cc] ss:$20 sps:$4 sm:$0xff]  }
 0x117   :  { %5069 = vmatpush1.bf16.msra.mxu0 %v9037_v55  ;;  %5397 = vmatpush1.bf16.msra.mxu1 %v9040_v59  ;;  %v9115_v55 = vld [vmem:[%s13074_s3 + $0x3c0] ss:$20 sps:$4 sm:$0xff]   ;;  %v9118_v59 = vld [vmem:[%s13074_s3 + $0x3c8] ss:$20 sps:$4 sm:$0xff]  }
 0x118   :  { %5070 = vmatprep.subr.bf16.mxu0 %v9045_v61  ;;  %5398 = vmatprep.subr.bf16.mxu1 %v9048_v18  ;;  %v9123_v61 = vld [vmem:[%s13074_s3 + $0x3ec] ss:$20 sps:$4 sm:$0xff]   ;;  %v9126_v18 = vld [vmem:[%s13074_s3 + $0x3f4] ss:$20 sps:$4 sm:$0xff]  }
 0x11b   :  { %5071 = vmatpush1.bf16.msra.mxu0 %v9043_v19  ;;  %5399 = vmatpush1.bf16.msra.mxu1 %v9046_v56  ;;  %v9121_v19 = vld [vmem:[%s13074_s3 + $0x3e8] ss:$20 sps:$4 sm:$0xff]   ;;  %v9124_v56 = vld [vmem:[%s13074_s3 + $0x3f0] ss:$20 sps:$4 sm:$0xff]  }
 0x11c   :  { %5072 = vmatprep.subr.bf16.mxu0 %v9051_v57  ;;  %5400 = vmatprep.subr.bf16.mxu1 %v9054_v45 }
 0x11f   :  { %5073 = vmatpush1.bf16.msra.mxu0 %v9049_v49  ;;  %5401 = vmatpush1.bf16.msra.mxu1 %v9052_v51 }
 0x120   :  { %5074 = vmatprep.subr.bf16.mxu0 %v9057_v17  ;;  %5402 = vmatprep.subr.bf16.mxu1 %v9060_v13  ;;  %v9129_v17 = vld [vmem:[%s13074_s3 + $0x414] ss:$20 sps:$4 sm:$0xff]   ;;  %v9132_v13 = vld [vmem:[%s13074_s3 + $0x41c] ss:$20 sps:$4 sm:$0xff]  }
 0x123   :  { %5075 = vmatpush1.bf16.msra.mxu0 %v9055_v24  ;;  %5403 = vmatpush1.bf16.msra.mxu1 %v9058_v25 }
 0x124   :  { %5076 = vmatprep.subr.bf16.mxu0 %v9063_v62  ;;  %5404 = vmatprep.subr.bf16.mxu1 %v9066_v40  ;;  %v9127_v62 = vld [vmem:[%s13074_s3 + $0x410] ss:$20 sps:$4 sm:$0xff]   ;;  %v9130_v40 = vld [vmem:[%s13074_s3 + $0x418] ss:$20 sps:$4 sm:$0xff]  }
 0x127   :  { %5077 = vmatpush1.bf16.msra.mxu0 %v9061_v20  ;;  %5405 = vmatpush1.bf16.msra.mxu1 %v9064_v63 }
 0x128   :  { %5087 = vmatprep.subr.bf16.mxu0 %v9069_v39  ;;  %5415 = vmatprep.subr.bf16.mxu1 %v9072_v47  ;;  %v9135_v39 = vld [vmem:[%s13074_s3 + $0x43c] ss:$20 sps:$4 sm:$0xff]   ;;  %v9138_v47 = vld [vmem:[%s13074_s3 + $0x444] ss:$20 sps:$4 sm:$0xff]  }
 0x169   :  { %v1389_v12 = vpop.f32.mrb[0].mxu0 }
 0x16a   :  { %v1391_v35 = vpop.f32.mrb[1].mxu0  ;;  %v10748_v34 = vpack.c.bf16 %v1389_v12, %v1389_v12  ;;  %v9133_v12 = vld [vmem:[%s13074_s3 + $0x438] ss:$20 sps:$4 sm:$0xff]  }
 0x16b   :  { %v10746_v10 = vpack.c.bf16 %v1391_v35, %v1391_v35  ;;  %v1393_v60 = vpop.f32.mrb[2].mxu0  ;;  %v9144_v35 = vld [vmem:[%s13074_s3 + $0x46c] ss:$20 sps:$4 sm:$0xff]  }
 0x16c   :  { %v1394_v31 = vpop.f32.mrb[3].mxu0  ;;  %v9139_v60 = vld [vmem:[%s13074_s3 + $0x460] ss:$20 sps:$4 sm:$0xff]  }
 0x16d   :  { %5078 = vmatprep.mubr.bf16.mxu0 %v10746_v10  ;;  %5406 = vmatprep.mubr.bf16.mxu1 %v10746_v10  ;;  %v9142_v31 = vld [vmem:[%s13074_s3 + $0x468] ss:$20 sps:$4 sm:$0xff]  }
 0x16e   :  { %5079 = vmatmul.mubr.bf16.vlgmr.msra.gmra.mrb[16].mxu0 %v10748_v34  ;;  %5407 = vmatmul.mubr.bf16.vlgmr.msra.gmra.mrb[16].mxu1 %v10748_v34 }
 0x16f   :  { %5088 = vmatpush1.bf16.msra.mxu0 %v9067_v38  ;;  %5416 = vmatpush1.bf16.msra.mxu1 %v9070_v44  ;;  %v9136_v38 = vld [vmem:[%s13074_s3 + $0x440] ss:$20 sps:$4 sm:$0xff]   ;;  %v9141_v44 = vld [vmem:[%s13074_s3 + $0x464] ss:$20 sps:$4 sm:$0xff]  }
 0x170   :  { %5089 = vmatprep.subr.bf16.mxu0 %v9075_v1  ;;  %5417 = vmatprep.subr.bf16.mxu1 %v9078_v3  ;;  %v9147_v1 = vld [vmem:[%s13074_s3 + $0x48c] ss:$20 sps:$4 sm:$0xff]   ;;  %v9150_v3 = vld [vmem:[%s13074_s3 + $0x494] ss:$20 sps:$4 sm:$0xff]  }
 0x173   :  { %5090 = vmatpush1.bf16.msra.mxu0 %v9073_v8  ;;  %5418 = vmatpush1.bf16.msra.mxu1 %v9076_v6  ;;  %v9145_v8 = vld [vmem:[%s13074_s3 + $0x488] ss:$20 sps:$4 sm:$0xff]   ;;  %v9148_v6 = vld [vmem:[%s13074_s3 + $0x490] ss:$20 sps:$4 sm:$0xff]  }
 0x174   :  { %5091 = vmatprep.subr.bf16.mxu0 %v9081_v14  ;;  %5419 = vmatprep.subr.bf16.mxu1 %v9084_v43  ;;  %v9153_v14 = vld [vmem:[%s13074_s3 + $0x4b4] ss:$20 sps:$4 sm:$0xff]   ;;  %v9156_v43 = vld [vmem:[%s13074_s3 + $0x4bc] ss:$20 sps:$4 sm:$0xff]  }
 0x177   :  { %5092 = vmatpush1.bf16.msra.mxu0 %v9079_v16  ;;  %5420 = vmatpush1.bf16.msra.mxu1 %v9082_v9  ;;  %v9151_v16 = vld [vmem:[%s13074_s3 + $0x4b0] ss:$20 sps:$4 sm:$0xff]   ;;  %v9154_v9 = vld [vmem:[%s13074_s3 + $0x4b8] ss:$20 sps:$4 sm:$0xff]  }
 0x178   :  { %5093 = vmatprep.subr.bf16.mxu0 %v9087_v28  ;;  %5421 = vmatprep.subr.bf16.mxu1 %v9090_v23  ;;  %v9159_v28 = vld [vmem:[%s13074_s3 + $0x4dc] ss:$20 sps:$4 sm:$0xff]   ;;  %v9162_v23 = vld [vmem:[%s13074_s3 + $0x4e4] ss:$20 sps:$4 sm:$0xff]  }
 0x179   :  { %v10802_v53 = vpop.f32.mrb[0].mxu1 }
 0x17a   :  { %v1432_v54 = vpop.f32.mrb[1].mxu1 }
 0x17b   :  { %5094 = vmatpush1.bf16.msra.mxu0 %v9085_v21  ;;  %5422 = vmatpush1.bf16.msra.mxu1 %v9088_v29  ;;  %v10804_v22 = vpack.c.bf16 %v1432_v54, %v1432_v54  ;;  %v1434_v0 = vpop.f32.mrb[2].mxu1  ;;  %v9157_v21 = vld [vmem:[%s13074_s3 + $0x4d8] ss:$20 sps:$4 sm:$0xff]   ;;  %v9160_v29 = vld [vmem:[%s13074_s3 + $0x4e0] ss:$20 sps:$4 sm:$0xff]  }
 0x17c   :  { %5095 = vmatprep.subr.bf16.mxu0 %v9093_v30  ;;  %5423 = vmatprep.subr.bf16.mxu1 %v9096_v2  ;;  %v1435_v4 = vpop.f32.mrb[3].mxu1  ;;  %v9165_v54 = vld [vmem:[%s13074_s3 + $0x504] ss:$20 sps:$4 sm:$0xff]   ;;  %v9168_v0 = vld [vmem:[%s13074_s3 + $0x50c] ss:$20 sps:$4 sm:$0xff]  }
 0x17d   :  { %5119 = vmatprep.mubr.bf16.mxu0 %v10804_v22  ;;  %5447 = vmatprep.mubr.bf16.mxu1 %v10804_v22  ;;  %v9163_v4 = vld [vmem:[%s13074_s3 + $0x500] ss:$20 sps:$4 sm:$0xff]  }
 0x17f   :  { %5096 = vmatpush1.bf16.msra.mxu0 %v9091_v15  ;;  %5424 = vmatpush1.bf16.msra.mxu1 %v9094_v42 }
 0x180   :  { %5097 = vmatprep.subr.bf16.mxu0 %v9099_v58  ;;  %5425 = vmatprep.subr.bf16.mxu1 %v9102_v37 }
 0x183   :  { %5098 = vmatpush1.bf16.msra.mxu0 %v9097_v5  ;;  %5426 = vmatpush1.bf16.msra.mxu1 %v9100_v33  ;;  %v9166_v5 = vld [vmem:[%s13074_s3 + $0x508] ss:$20 sps:$4 sm:$0xff]  }
 0x184   :  { %5099 = vmatprep.subr.bf16.mxu0 %v9105_v48  ;;  %5427 = vmatprep.subr.bf16.mxu1 %v9108_v50  ;;  %v10970_v48 = vpack.c.bf16 %v10802_v53, %v10802_v53  ;;  %v9171_v50 = vld [vmem:[%s13074_s3 + $0x52c] ss:$20 sps:$4 sm:$0xff]   ;;  %v9172_v53 = vld [vmem:[%s13074_s3 + $0x530] ss:$20 sps:$4 sm:$0xff]  }
 0x187   :  { %5100 = vmatpush1.bf16.msra.mxu0 %v9103_v11  ;;  %5428 = vmatpush1.bf16.msra.mxu1 %v9106_v52  ;;  %v9174_v11 = vld [vmem:[%s13074_s3 + $0x534] ss:$20 sps:$4 sm:$0xff]  }
 0x188   :  { %5101 = vmatprep.subr.bf16.mxu0 %v9111_v26  ;;  %5429 = vmatprep.subr.bf16.mxu1 %v9114_v27  ;;  %v9169_v26 = vld [vmem:[%s13074_s3 + $0x528] ss:$20 sps:$4 sm:$0xff]  }
 0x18b   :  { %5102 = vmatpush1.bf16.msra.mxu0 %v9109_v32  ;;  %5430 = vmatpush1.bf16.msra.mxu1 %v9112_v36  ;;  %v9177_v32 = vld [vmem:[%s13074_s3 + $0x554] ss:$20 sps:$4 sm:$0xff]   ;;  %v9180_v36 = vld [vmem:[%s13074_s3 + $0x55c] ss:$20 sps:$4 sm:$0xff]  }
 0x18c   :  { %5103 = vmatprep.subr.bf16.mxu0 %v9117_v41  ;;  %5431 = vmatprep.subr.bf16.mxu1 %v9120_v46  ;;  %v9175_v41 = vld [vmem:[%s13074_s3 + $0x550] ss:$20 sps:$4 sm:$0xff]   ;;  %v9178_v46 = vld [vmem:[%s13074_s3 + $0x558] ss:$20 sps:$4 sm:$0xff]  }
 0x18d   :  { %v10868_v57 = vpop.f32.mrb[4].mxu0 }
 0x18e   :  { %v10870_v45 = vpop.f32.mrb[5].mxu0 }
 0x18f   :  { %5104 = vmatpush1.bf16.msra.mxu0 %v9115_v55  ;;  %5432 = vmatpush1.bf16.msra.mxu1 %v9118_v59  ;;  %v1475_v49 = vpop.f32.mrb[6].mxu0  ;;  %v10872_v51 = vpop.f32.mrb[4].mxu1  ;;  %v10986_v27 = vpack.c.bf16 %v10870_v45, %v10870_v45  ;;  %v9183_v55 = vld [vmem:[%s13074_s3 + $0x57c] ss:$20 sps:$4 sm:$0xff]   ;;  %v9186_v59 = vld [vmem:[%s13074_s3 + $0x584] ss:$20 sps:$4 sm:$0xff]  }
 0x190   :  { %5105 = vmatprep.subr.bf16.mxu0 %v9123_v61  ;;  %5433 = vmatprep.subr.bf16.mxu1 %v9126_v18  ;;  %v1476_v24 = vpop.f32.mrb[7].mxu0  ;;  %v10880_v25 = vpop.f32.mrb[5].mxu1  ;;  %v9181_v61 = vld [vmem:[%s13074_s3 + $0x578] ss:$20 sps:$4 sm:$0xff]   ;;  %v9184_v18 = vld [vmem:[%s13074_s3 + $0x580] ss:$20 sps:$4 sm:$0xff]  }
 0x191   :  { %v1516_v20 = vpop.f32.mrb[6].mxu1  ;;  %v9187_v45 = vld [vmem:[%s13074_s3 + $0x5a0] ss:$20 sps:$4 sm:$0xff]   ;;  %v9190_v49 = vld [vmem:[%s13074_s3 + $0x5a8] ss:$20 sps:$4 sm:$0xff]  }
 0x192   :  { %v1517_v63 = vpop.f32.mrb[7].mxu1  ;;  %v9193_v24 = vld [vmem:[%s13074_s3 + $0x5c8] ss:$20 sps:$4 sm:$0xff]  }
 0x193   :  { %5106 = vmatpush1.bf16.msra.mxu0 %v9121_v19  ;;  %5434 = vmatpush1.bf16.msra.mxu1 %v9124_v56  ;;  %v9189_v19 = vld [vmem:[%s13074_s3 + $0x5a4] ss:$20 sps:$4 sm:$0xff]   ;;  %v9192_v56 = vld [vmem:[%s13074_s3 + $0x5ac] ss:$20 sps:$4 sm:$0xff]  }
 0x194   :  { %5107 = vmatprep.subr.bf16.mxu0 %v9129_v17  ;;  %5435 = vmatprep.subr.bf16.mxu1 %v9132_v13  ;;  %v9195_v17 = vld [vmem:[%s13074_s3 + $0x5cc] ss:$20 sps:$4 sm:$0xff]   ;;  %v9198_v13 = vld [vmem:[%s13074_s3 + $0x5d4] ss:$20 sps:$4 sm:$0xff]  }
 0x197   :  { %5108 = vmatpush1.bf16.msra.mxu0 %v9127_v62  ;;  %5436 = vmatpush1.bf16.msra.mxu1 %v9130_v40  ;;  %v9196_v62 = vld [vmem:[%s13074_s3 + $0x5d0] ss:$20 sps:$4 sm:$0xff]  }
 0x198   :  { %5109 = vmatprep.subr.bf16.mxu0 %v9135_v39  ;;  %5437 = vmatprep.subr.bf16.mxu1 %v9138_v47 }
 0x19b   :  { %5110 = vmatpush1.bf16.msra.mxu0 %v9133_v12  ;;  %5438 = vmatpush1.bf16.msra.mxu1 %v9136_v38  ;;  %v9201_v38 = vld [vmem:[%s13074_s3 + $0x5f4] ss:$20 sps:$4 sm:$0xff]  }
 0x19c   :  { %5111 = vmatprep.subr.bf16.mxu0 %v9141_v44  ;;  %5439 = vmatprep.subr.bf16.mxu1 %v9144_v35  ;;  %v9204_v44 = vld [vmem:[%s13074_s3 + $0x5fc] ss:$20 sps:$4 sm:$0xff]  }
 0x19f   :  { %5112 = vmatpush1.bf16.msra.mxu0 %v9139_v60  ;;  %5440 = vmatpush1.bf16.msra.mxu1 %v9142_v31  ;;  %v9199_v31 = vld [vmem:[%s13074_s3 + $0x5f0] ss:$20 sps:$4 sm:$0xff]  }
 0x1a0   :  { %5113 = vmatprep.subr.bf16.mxu0 %v9147_v1  ;;  %5441 = vmatprep.subr.bf16.mxu1 %v9150_v3  ;;  %v9202_v1 = vld [vmem:[%s13074_s3 + $0x5f8] ss:$20 sps:$4 sm:$0xff]   ;;  %v9207_v3 = vld [vmem:[%s13074_s3 + $0x61c] ss:$20 sps:$4 sm:$0xff]  }
 0x1a3   :  { %5114 = vmatpush1.bf16.msra.mxu0 %v9145_v8  ;;  %5442 = vmatpush1.bf16.msra.mxu1 %v9148_v6  ;;  %v9210_v8 = vld [vmem:[%s13074_s3 + $0x624] ss:$20 sps:$4 sm:$0xff]  }
 0x1a4   :  { %5115 = vmatprep.subr.bf16.mxu0 %v9153_v14  ;;  %5443 = vmatprep.subr.bf16.mxu1 %v9156_v43  ;;  %v9205_v6 = vld [vmem:[%s13074_s3 + $0x618] ss:$20 sps:$4 sm:$0xff]   ;;  %v9208_v14 = vld [vmem:[%s13074_s3 + $0x620] ss:$20 sps:$4 sm:$0xff]  }
 0x1a5   :  { %v10948_v30 = vpop.f32.mrb[8].mxu0  ;;  %v9213_v43 = vld [vmem:[%s13074_s3 + $0x644] ss:$20 sps:$4 sm:$0xff]  }
 0x1a6   :  { %v10950_v2 = vpop.f32.mrb[9].mxu0 }
 0x1a7   :  { %5116 = vmatpush1.bf16.msra.mxu0 %v9151_v16  ;;  %5444 = vmatpush1.bf16.msra.mxu1 %v9154_v9  ;;  %v1557_v15 = vpop.f32.mrb[10].mxu0  ;;  %v10952_v42 = vpop.f32.mrb[8].mxu1  ;;  %v9216_v16 = vld [vmem:[%s13074_s3 + $0x64c] ss:$20 sps:$4 sm:$0xff]  }
 0x1a8   :  { %5117 = vmatprep.subr.bf16.mxu0 %v9159_v28  ;;  %5445 = vmatprep.subr.bf16.mxu1 %v9162_v23  ;;  %v1558_v58 = vpop.f32.mrb[11].mxu0  ;;  %v10960_v37 = vpop.f32.mrb[9].mxu1  ;;  %v9211_v9 = vld [vmem:[%s13074_s3 + $0x640] ss:$20 sps:$4 sm:$0xff]   ;;  %v9214_v28 = vld [vmem:[%s13074_s3 + $0x648] ss:$20 sps:$4 sm:$0xff]  }
 0x1a9   :  { %v1598_v33 = vpop.f32.mrb[10].mxu1  ;;  %v9219_v23 = vld [vmem:[%s13074_s3 + $0x66c] ss:$20 sps:$4 sm:$0xff]   ;;  %v9220_v15 = vld [vmem:[%s13074_s3 + $0x670] ss:$20 sps:$4 sm:$0xff]  }
 0x1aa   :  { %v1599_v52 = vpop.f32.mrb[11].mxu1  ;;  %v9223_v58 = vld [vmem:[%s13074_s3 + $0x690] ss:$20 sps:$4 sm:$0xff]  }
 0x1ab   :  { %5118 = vmatpush1.bf16.msra.mxu0 %v9157_v21  ;;  %5446 = vmatpush1.bf16.msra.mxu1 %v9160_v29  ;;  %v9222_v21 = vld [vmem:[%s13074_s3 + $0x674] ss:$20 sps:$4 sm:$0xff]   ;;  %v9234_v33 = vld [vmem:[%s13074_s3 + $0x6c4] ss:$20 sps:$4 sm:$0xff]  }
 0x1ac   :  { %5128 = vmatprep.subr.bf16.mxu0 %v9165_v54  ;;  %5456 = vmatprep.subr.bf16.mxu1 %v9168_v0  ;;  %v9217_v29 = vld [vmem:[%s13074_s3 + $0x668] ss:$20 sps:$4 sm:$0xff]   ;;  %v9237_v52 = vld [vmem:[%s13074_s3 + $0x6e4] ss:$20 sps:$4 sm:$0xff]  }
 0x1ad   :  { %v9225_v54 = vld [vmem:[%s13074_s3 + $0x694] ss:$20 sps:$4 sm:$0xff]   ;;  %v9228_v0 = vld [vmem:[%s13074_s3 + $0x69c] ss:$20 sps:$4 sm:$0xff]  }
 0x1ae   :  { %5120 = vmatmul.mubr.bf16.vlgmr.msra.gmra.mrb[16].mxu0 %v10970_v48  ;;  %5448 = vmatmul.mubr.bf16.vlgmr.msra.gmra.mrb[16].mxu1 %v10970_v48 }
 0x1af   :  { %5129 = vmatpush1.bf16.msra.mxu0 %v9163_v4  ;;  %5457 = vmatpush1.bf16.msra.mxu1 %v9166_v5  ;;  %v9226_v4 = vld [vmem:[%s13074_s3 + $0x698] ss:$20 sps:$4 sm:$0xff]   ;;  %v9231_v5 = vld [vmem:[%s13074_s3 + $0x6bc] ss:$20 sps:$4 sm:$0xff]  }
 0x1b0   :  { %5130 = vmatprep.subr.bf16.mxu0 %v9171_v50  ;;  %5458 = vmatprep.subr.bf16.mxu1 %v9174_v11  ;;  %v9229_v50 = vld [vmem:[%s13074_s3 + $0x6b8] ss:$20 sps:$4 sm:$0xff]   ;;  %v9232_v11 = vld [vmem:[%s13074_s3 + $0x6c0] ss:$20 sps:$4 sm:$0xff]  }
 0x1b1   :  { %5160 = vmatprep.mubr.bf16.mxu0 %v10986_v27  ;;  %5488 = vmatprep.mubr.bf16.mxu1 %v10986_v27 }
 0x1b3   :  { %5131 = vmatpush1.bf16.msra.mxu0 %v9169_v26  ;;  %5459 = vmatpush1.bf16.msra.mxu1 %v9172_v53  ;;  %v9240_v26 = vld [vmem:[%s13074_s3 + $0x6ec] ss:$20 sps:$4 sm:$0xff]  }
 0x1b4   :  { %5132 = vmatprep.subr.bf16.mxu0 %v9177_v32  ;;  %5460 = vmatprep.subr.bf16.mxu1 %v9180_v36  ;;  %v9235_v53 = vld [vmem:[%s13074_s3 + $0x6e0] ss:$20 sps:$4 sm:$0xff]   ;;  %v9238_v32 = vld [vmem:[%s13074_s3 + $0x6e8] ss:$20 sps:$4 sm:$0xff]  }
 0x1b5   :  { %v9243_v36 = vld [vmem:[%s13074_s3 + $0x70c] ss:$20 sps:$4 sm:$0xff]  }
 0x1b7   :  { %5133 = vmatpush1.bf16.msra.mxu0 %v9175_v41  ;;  %5461 = vmatpush1.bf16.msra.mxu1 %v9178_v46  ;;  %v9246_v41 = vld [vmem:[%s13074_s3 + $0x714] ss:$20 sps:$4 sm:$0xff]  }
 0x1b8   :  { %5134 = vmatprep.subr.bf16.mxu0 %v9183_v55  ;;  %5462 = vmatprep.subr.bf16.mxu1 %v9186_v59  ;;  %v9241_v46 = vld [vmem:[%s13074_s3 + $0x708] ss:$20 sps:$4 sm:$0xff]   ;;  %v9244_v55 = vld [vmem:[%s13074_s3 + $0x710] ss:$20 sps:$4 sm:$0xff]  }
 0x1b9   :  { %v9249_v59 = vld [vmem:[%s13074_s3 + $0x734] ss:$20 sps:$4 sm:$0xff]  }
 0x1bb   :  { %5135 = vmatpush1.bf16.msra.mxu0 %v9181_v61  ;;  %5463 = vmatpush1.bf16.msra.mxu1 %v9184_v18  ;;  %v9252_v61 = vld [vmem:[%s13074_s3 + $0x73c] ss:$20 sps:$4 sm:$0xff]  }
 0x1bc   :  { %5136 = vmatprep.subr.bf16.mxu0 %v9189_v19  ;;  %5464 = vmatprep.subr.bf16.mxu1 %v9192_v56  ;;  %v9247_v18 = vld [vmem:[%s13074_s3 + $0x730] ss:$20 sps:$4 sm:$0xff]   ;;  %v9250_v19 = vld [vmem:[%s13074_s3 + $0x738] ss:$20 sps:$4 sm:$0xff]  }
 0x1bd   :  { %v11040_v40 = vpop.f32.mrb[12].mxu0  ;;  %v11042_v20 = vpop.f32.mrb[12].mxu1  ;;  %v9255_v56 = vld [vmem:[%s13074_s3 + $0x75c] ss:$20 sps:$4 sm:$0xff]  }
 0x1be   :  { %v11044_v63 = vpop.f32.mrb[13].mxu0  ;;  %v11046_v39 = vpop.f32.mrb[13].mxu1 }
 0x1bf   :  { %5137 = vmatpush1.bf16.msra.mxu0 %v9187_v45  ;;  %5465 = vmatpush1.bf16.msra.mxu1 %v9190_v49  ;;  %v1639_v47 = vpop.f32.mrb[14].mxu0  ;;  %v1680_v12 = vpop.f32.mrb[14].mxu1  ;;  %v9258_v45 = vld [vmem:[%s13074_s3 + $0x764] ss:$20 sps:$4 sm:$0xff]  }
 0x1c0   :  { %5138 = vmatprep.subr.bf16.mxu0 %v9195_v17  ;;  %5466 = vmatprep.subr.bf16.mxu1 %v9198_v13  ;;  %v1640_v35 = vpop.f32.mrb[15].mxu0  ;;  %v1681_v60 = vpop.f32.mrb[15].mxu1  ;;  %v9253_v49 = vld [vmem:[%s13074_s3 + $0x758] ss:$20 sps:$4 sm:$0xff]   ;;  %v9256_v17 = vld [vmem:[%s13074_s3 + $0x760] ss:$20 sps:$4 sm:$0xff]   ;;  %v11179_v47 = vpack.c.bf16 %v10868_v57, %v10868_v57 }
 0x1c1   :  { %v9261_v13 = vld [vmem:[%s13074_s3 + $0x784] ss:$20 sps:$4 sm:$0xff]   ;;  %v9262_v12 = vld [vmem:[%s13074_s3 + $0x788] ss:$20 sps:$4 sm:$0xff]  }
 0x1c2   :  { %v9270_v35 = vld [vmem:[%s13074_s3 + $0x7b4] ss:$20 sps:$4 sm:$0xff]  }
 0x1c3   :  { %5139 = vmatpush1.bf16.msra.mxu0 %v9193_v24  ;;  %5467 = vmatpush1.bf16.msra.mxu1 %v9196_v62  ;;  %v9264_v24 = vld [vmem:[%s13074_s3 + $0x78c] ss:$20 sps:$4 sm:$0xff]   ;;  %v9265_v57 = vld [vmem:[%s13074_s3 + $0x7a8] ss:$20 sps:$4 sm:$0xff]  }
 0x1c4   :  { %5140 = vmatprep.subr.bf16.mxu0 %v9201_v38  ;;  %5468 = vmatprep.subr.bf16.mxu1 %v9204_v44  ;;  %v9259_v62 = vld [vmem:[%s13074_s3 + $0x780] ss:$20 sps:$4 sm:$0xff]   ;;  %v11186_v38 = vpack.c.bf16 %v10880_v25, %v10880_v25  ;;  %v9268_v25 = vld [vmem:[%s13074_s3 + $0x7b0] ss:$20 sps:$4 sm:$0xff]  }
 0x1c5   :  { %v9267_v44 = vld [vmem:[%s13074_s3 + $0x7ac] ss:$20 sps:$4 sm:$0xff]   ;;  %v9273_v60 = vld [vmem:[%s13074_s3 + $0x7d4] ss:$20 sps:$4 sm:$0xff]  }
 0x1c7   :  { %5141 = vmatpush1.bf16.msra.mxu0 %v9199_v31  ;;  %5469 = vmatpush1.bf16.msra.mxu1 %v9202_v1  ;;  %v9276_v31 = vld [vmem:[%s13074_s3 + $0x7dc] ss:$20 sps:$4 sm:$0xff]  }
 0x1c8   :  { %5142 = vmatprep.subr.bf16.mxu0 %v9207_v3  ;;  %5470 = vmatprep.subr.bf16.mxu1 %v9210_v8  ;;  %v9271_v1 = vld [vmem:[%s13074_s3 + $0x7d0] ss:$20 sps:$4 sm:$0xff]   ;;  %v9274_v3 = vld [vmem:[%s13074_s3 + $0x7d8] ss:$20 sps:$4 sm:$0xff]  }
 0x1c9   :  { %v9279_v8 = vld [vmem:[%s13074_s3 + $0x7fc] ss:$20 sps:$4 sm:$0xff]  }
 0x1cb   :  { %5143 = vmatpush1.bf16.msra.mxu0 %v9205_v6  ;;  %5471 = vmatpush1.bf16.msra.mxu1 %v9208_v14  ;;  %v9282_v6 = vld [vmem:[%s13074_s3 + $0x804] ss:$20 sps:$4 sm:$0xff]  }
 0x1cc   :  { %5144 = vmatprep.subr.bf16.mxu0 %v9213_v43  ;;  %5472 = vmatprep.subr.bf16.mxu1 %v9216_v16  ;;  %v9277_v14 = vld [vmem:[%s13074_s3 + $0x7f8] ss:$20 sps:$4 sm:$0xff]   ;;  %v9280_v43 = vld [vmem:[%s13074_s3 + $0x800] ss:$20 sps:$4 sm:$0xff]  }
 0x1cd   :  { %v9285_v16 = vld [vmem:[%s13074_s3 + $0x824] ss:$20 sps:$4 sm:$0xff]  }
 0x1cf   :  { %5145 = vmatpush1.bf16.msra.mxu0 %v9211_v9  ;;  %5473 = vmatpush1.bf16.msra.mxu1 %v9214_v28  ;;  %v9288_v9 = vld [vmem:[%s13074_s3 + $0x82c] ss:$20 sps:$4 sm:$0xff]  }
 0x1d0   :  { %5146 = vmatprep.subr.bf16.mxu0 %v9219_v23  ;;  %5474 = vmatprep.subr.bf16.mxu1 %v9222_v21  ;;  %v9283_v28 = vld [vmem:[%s13074_s3 + $0x820] ss:$20 sps:$4 sm:$0xff]   ;;  %v9286_v23 = vld [vmem:[%s13074_s3 + $0x828] ss:$20 sps:$4 sm:$0xff]  }
 0x1d1   :  { %v9291_v21 = vld [vmem:[%s13074_s3 + $0x84c] ss:$20 sps:$4 sm:$0xff]  }
 0x1d3   :  { %5147 = vmatpush1.bf16.msra.mxu0 %v9217_v29  ;;  %5475 = vmatpush1.bf16.msra.mxu1 %v9220_v15  ;;  %v9294_v29 = vld [vmem:[%s13074_s3 + $0x854] ss:$20 sps:$4 sm:$0xff]  }
 0x1d4   :  { %5148 = vmatprep.subr.bf16.mxu0 %v9225_v54  ;;  %5476 = vmatprep.subr.bf16.mxu1 %v9228_v0  ;;  %v9289_v15 = vld [vmem:[%s13074_s3 + $0x848] ss:$20 sps:$4 sm:$0xff]   ;;  %v9292_v54 = vld [vmem:[%s13074_s3 + $0x850] ss:$20 sps:$4 sm:$0xff]  }
 0x1d5   :  { %v9297_v0 = vld [vmem:[%s13074_s3 + $0x874] ss:$20 sps:$4 sm:$0xff]  }
 0x1d7   :  { %5149 = vmatpush1.bf16.msra.mxu0 %v9223_v58  ;;  %5477 = vmatpush1.bf16.msra.mxu1 %v9226_v4  ;;  %v9300_v58 = vld [vmem:[%s13074_s3 + $0x87c] ss:$20 sps:$4 sm:$0xff]  }
 0x1d8   :  { %5150 = vmatprep.subr.bf16.mxu0 %v9231_v5  ;;  %5478 = vmatprep.subr.bf16.mxu1 %v9234_v33  ;;  %v9295_v4 = vld [vmem:[%s13074_s3 + $0x870] ss:$20 sps:$4 sm:$0xff]   ;;  %v9298_v5 = vld [vmem:[%s13074_s3 + $0x878] ss:$20 sps:$4 sm:$0xff]  }
 0x1d9   :  { %v9303_v33 = vld [vmem:[%s13074_s3 + $0x89c] ss:$20 sps:$4 sm:$0xff]  }
 0x1db   :  { %5151 = vmatpush1.bf16.msra.mxu0 %v9229_v50  ;;  %5479 = vmatpush1.bf16.msra.mxu1 %v9232_v11  ;;  %v9306_v50 = vld [vmem:[%s13074_s3 + $0x8a4] ss:$20 sps:$4 sm:$0xff]  }
 0x1dc   :  { %5152 = vmatprep.subr.bf16.mxu0 %v9237_v52  ;;  %5480 = vmatprep.subr.bf16.mxu1 %v9240_v26  ;;  %v9301_v11 = vld [vmem:[%s13074_s3 + $0x898] ss:$20 sps:$4 sm:$0xff]   ;;  %v9304_v52 = vld [vmem:[%s13074_s3 + $0x8a0] ss:$20 sps:$4 sm:$0xff]  }
 0x1dd   :  { %v9309_v26 = vld [vmem:[%s13074_s3 + $0x8c4] ss:$20 sps:$4 sm:$0xff]  }
 0x1df   :  { %5153 = vmatpush1.bf16.msra.mxu0 %v9235_v53  ;;  %5481 = vmatpush1.bf16.msra.mxu1 %v9238_v32  ;;  %v9312_v53 = vld [vmem:[%s13074_s3 + $0x8cc] ss:$20 sps:$4 sm:$0xff]  }
 0x1e0   :  { %5154 = vmatprep.subr.bf16.mxu0 %v9243_v36  ;;  %5482 = vmatprep.subr.bf16.mxu1 %v9246_v41  ;;  %v9307_v32 = vld [vmem:[%s13074_s3 + $0x8c0] ss:$20 sps:$4 sm:$0xff]   ;;  %v9310_v36 = vld [vmem:[%s13074_s3 + $0x8c8] ss:$20 sps:$4 sm:$0xff]  }
 0x1e1   :  { %v9315_v41 = vld [vmem:[%s13074_s3 + $0x8ec] ss:$20 sps:$4 sm:$0xff]  }
 0x1e3   :  { %5155 = vmatpush1.bf16.msra.mxu0 %v9241_v46  ;;  %5483 = vmatpush1.bf16.msra.mxu1 %v9244_v55  ;;  %v9318_v46 = vld [vmem:[%s13074_s3 + $0x8f4] ss:$20 sps:$4 sm:$0xff]  }
 0x1e4   :  { %5156 = vmatprep.subr.bf16.mxu0 %v9249_v59  ;;  %5484 = vmatprep.subr.bf16.mxu1 %v9252_v61  ;;  %v9313_v55 = vld [vmem:[%s13074_s3 + $0x8e8] ss:$20 sps:$4 sm:$0xff]   ;;  %v9316_v59 = vld [vmem:[%s13074_s3 + $0x8f0] ss:$20 sps:$4 sm:$0xff]  }
 0x1e5   :  { %v9321_v61 = vld [vmem:[%s13074_s3 + $0x914] ss:$20 sps:$4 sm:$0xff]  }
 0x1e7   :  { %5157 = vmatpush1.bf16.msra.mxu0 %v9247_v18  ;;  %5485 = vmatpush1.bf16.msra.mxu1 %v9250_v19  ;;  %v9324_v18 = vld [vmem:[%s13074_s3 + $0x91c] ss:$20 sps:$4 sm:$0xff]  }
 0x1e8   :  { %5158 = vmatprep.subr.bf16.mxu0 %v9255_v56  ;;  %5486 = vmatprep.subr.bf16.mxu1 %v9258_v45  ;;  %v9319_v19 = vld [vmem:[%s13074_s3 + $0x910] ss:$20 sps:$4 sm:$0xff]   ;;  %v9322_v56 = vld [vmem:[%s13074_s3 + $0x918] ss:$20 sps:$4 sm:$0xff]  }
 0x1e9   :  { %v9327_v45 = vld [vmem:[%s13074_s3 + $0x93c] ss:$20 sps:$4 sm:$0xff]  }
 0x1eb   :  { %5159 = vmatpush1.bf16.msra.mxu0 %v9253_v49  ;;  %5487 = vmatpush1.bf16.msra.mxu1 %v9256_v17  ;;  %v9330_v49 = vld [vmem:[%s13074_s3 + $0x944] ss:$20 sps:$4 sm:$0xff]  }
 0x1ec   :  { %5169 = vmatprep.subr.bf16.mxu0 %v9261_v13  ;;  %5497 = vmatprep.subr.bf16.mxu1 %v9264_v24  ;;  %v9325_v17 = vld [vmem:[%s13074_s3 + $0x938] ss:$20 sps:$4 sm:$0xff]   ;;  %v9328_v13 = vld [vmem:[%s13074_s3 + $0x940] ss:$20 sps:$4 sm:$0xff]  }
 0x1ed   :  { %v9333_v24 = vld [vmem:[%s13074_s3 + $0x964] ss:$20 sps:$4 sm:$0xff]  }
 0x1ee   :  { %5161 = vmatmul.mubr.bf16.vlgmr.msra.gmra.mrb[16].mxu0 %v11179_v47  ;;  %5489 = vmatmul.mubr.bf16.vlgmr.msra.gmra.mrb[16].mxu1 %v11179_v47 }
 0x1ef   :  { %5170 = vmatpush1.bf16.msra.mxu0 %v9259_v62  ;;  %5201 = vmatprep.mubr.bf16.mxu0 %v11186_v38  ;;  %v9336_v62 = vld [vmem:[%s13074_s3 + $0x96c] ss:$20 sps:$4 sm:$0xff]  }
 0x1f0   :  { %5498 = vmatpush1.bf16.msra.mxu1 %v9262_v12  ;;  %5529 = vmatprep.mubr.bf16.mxu1 %v11186_v38  ;;  %v9331_v12 = vld [vmem:[%s13074_s3 + $0x960] ss:$20 sps:$4 sm:$0xff]  }
 0x1f1   :  { %5171 = vmatprep.subr.bf16.mxu0 %v9267_v44  ;;  %5499 = vmatprep.subr.bf16.mxu1 %v9270_v35  ;;  %v9334_v44 = vld [vmem:[%s13074_s3 + $0x968] ss:$20 sps:$4 sm:$0xff]   ;;  %v9339_v35 = vld [vmem:[%s13074_s3 + $0x98c] ss:$20 sps:$4 sm:$0xff]  }
 0x1f3   :  { %5172 = vmatpush1.bf16.msra.mxu0 %v9265_v57  ;;  %v9342_v57 = vld [vmem:[%s13074_s3 + $0x994] ss:$20 sps:$4 sm:$0xff]  }
 0x1f4   :  { %5500 = vmatpush1.bf16.msra.mxu1 %v9268_v25  ;;  %5173 = vmatprep.subr.bf16.mxu0 %v9273_v60  ;;  %v9337_v25 = vld [vmem:[%s13074_s3 + $0x988] ss:$20 sps:$4 sm:$0xff]   ;;  %v9340_v60 = vld [vmem:[%s13074_s3 + $0x990] ss:$20 sps:$4 sm:$0xff]  }
 0x1f5   :  { %5501 = vmatprep.subr.bf16.mxu1 %v9276_v31  ;;  %v9345_v31 = vld [vmem:[%s13074_s3 + $0x9b4] ss:$20 sps:$4 sm:$0xff]  }
 0x1f7   :  { %5174 = vmatpush1.bf16.msra.mxu0 %v9271_v1  ;;  %v9348_v1 = vld [vmem:[%s13074_s3 + $0x9bc] ss:$20 sps:$4 sm:$0xff]  }
 0x1f8   :  { %5502 = vmatpush1.bf16.msra.mxu1 %v9274_v3  ;;  %5175 = vmatprep.subr.bf16.mxu0 %v9279_v8  ;;  %v9343_v3 = vld [vmem:[%s13074_s3 + $0x9b0] ss:$20 sps:$4 sm:$0xff]   ;;  %v9346_v8 = vld [vmem:[%s13074_s3 + $0x9b8] ss:$20 sps:$4 sm:$0xff]  }
 0x1f9   :  { %5503 = vmatprep.subr.bf16.mxu1 %v9282_v6  ;;  %v9351_v6 = vld [vmem:[%s13074_s3 + $0x9dc] ss:$20 sps:$4 sm:$0xff]  }
 0x1fb   :  { %5176 = vmatpush1.bf16.msra.mxu0 %v9277_v14  ;;  %v9354_v14 = vld [vmem:[%s13074_s3 + $0x9e4] ss:$20 sps:$4 sm:$0xff]  }
 0x1fc   :  { %5504 = vmatpush1.bf16.msra.mxu1 %v9280_v43  ;;  %5177 = vmatprep.subr.bf16.mxu0 %v9285_v16  ;;  %v9349_v43 = vld [vmem:[%s13074_s3 + $0x9d8] ss:$20 sps:$4 sm:$0xff]   ;;  %v9352_v16 = vld [vmem:[%s13074_s3 + $0x9e0] ss:$20 sps:$4 sm:$0xff]  }
 0x1fd   :  { %5505 = vmatprep.subr.bf16.mxu1 %v9288_v9  ;;  %v9357_v9 = vld [vmem:[%s13074_s3 + $0xa04] ss:$20 sps:$4 sm:$0xff]  }
 0x1ff   :  { %5178 = vmatpush1.bf16.msra.mxu0 %v9283_v28  ;;  %v9360_v28 = vld [vmem:[%s13074_s3 + $0xa0c] ss:$20 sps:$4 sm:$0xff]  }
 0x200   :  { %5506 = vmatpush1.bf16.msra.mxu1 %v9286_v23  ;;  %5179 = vmatprep.subr.bf16.mxu0 %v9291_v21  ;;  %v9355_v23 = vld [vmem:[%s13074_s3 + $0xa00] ss:$20 sps:$4 sm:$0xff]   ;;  %v11383_v21 = vpack.c.bf16 %v10872_v51, %v10872_v51 }
 0x201   :  { %5507 = vmatprep.subr.bf16.mxu1 %v9294_v29  ;;  %v9358_v29 = vld [vmem:[%s13074_s3 + $0xa08] ss:$20 sps:$4 sm:$0xff]  }
 0x202   :  { %v9366_v51 = vld [vmem:[%s13074_s3 + $0xa34] ss:$20 sps:$4 sm:$0xff]  }
 0x203   :  { %5180 = vmatpush1.bf16.msra.mxu0 %v9289_v15  ;;  %v9363_v15 = vld [vmem:[%s13074_s3 + $0xa2c] ss:$20 sps:$4 sm:$0xff]  }
 0x204   :  { %5508 = vmatpush1.bf16.msra.mxu1 %v9292_v54  ;;  %5181 = vmatprep.subr.bf16.mxu0 %v9297_v0  ;;  %v11393_v54 = vpack.c.bf16 %v10950_v2, %v10950_v2  ;;  %v9361_v0 = vld [vmem:[%s13074_s3 + $0xa28] ss:$20 sps:$4 sm:$0xff]   ;;  %v9364_v2 = vld [vmem:[%s13074_s3 + $0xa30] ss:$20 sps:$4 sm:$0xff]  }
 0x205   :  { %5509 = vmatprep.subr.bf16.mxu1 %v9300_v58  ;;  %v9369_v58 = vld [vmem:[%s13074_s3 + $0xa54] ss:$20 sps:$4 sm:$0xff]  }
 0x207   :  { %5182 = vmatpush1.bf16.msra.mxu0 %v9295_v4  ;;  %v9372_v4 = vld [vmem:[%s13074_s3 + $0xa5c] ss:$20 sps:$4 sm:$0xff]  }
 0x208   :  { %5510 = vmatpush1.bf16.msra.mxu1 %v9298_v5  ;;  %5183 = vmatprep.subr.bf16.mxu0 %v9303_v33  ;;  %v9367_v5 = vld [vmem:[%s13074_s3 + $0xa50] ss:$20 sps:$4 sm:$0xff]   ;;  %v9370_v33 = vld [vmem:[%s13074_s3 + $0xa58] ss:$20 sps:$4 sm:$0xff]  }
 0x209   :  { %5511 = vmatprep.subr.bf16.mxu1 %v9306_v50  ;;  %v9375_v50 = vld [vmem:[%s13074_s3 + $0xa7c] ss:$20 sps:$4 sm:$0xff]  }
 0x20b   :  { %5184 = vmatpush1.bf16.msra.mxu0 %v9301_v11  ;;  %v9378_v11 = vld [vmem:[%s13074_s3 + $0xa84] ss:$20 sps:$4 sm:$0xff]  }
 0x20c   :  { %5512 = vmatpush1.bf16.msra.mxu1 %v9304_v52  ;;  %5185 = vmatprep.subr.bf16.mxu0 %v9309_v26  ;;  %v9373_v52 = vld [vmem:[%s13074_s3 + $0xa78] ss:$20 sps:$4 sm:$0xff]   ;;  %v9376_v26 = vld [vmem:[%s13074_s3 + $0xa80] ss:$20 sps:$4 sm:$0xff]  }
 0x20d   :  { %5513 = vmatprep.subr.bf16.mxu1 %v9312_v53  ;;  %v9381_v53 = vld [vmem:[%s13074_s3 + $0xaa4] ss:$20 sps:$4 sm:$0xff]  }
 0x20f   :  { %5186 = vmatpush1.bf16.msra.mxu0 %v9307_v32  ;;  %v9384_v32 = vld [vmem:[%s13074_s3 + $0xaac] ss:$20 sps:$4 sm:$0xff]  }
 0x210   :  { %5514 = vmatpush1.bf16.msra.mxu1 %v9310_v36  ;;  %5187 = vmatprep.subr.bf16.mxu0 %v9315_v41  ;;  %v9379_v36 = vld [vmem:[%s13074_s3 + $0xaa0] ss:$20 sps:$4 sm:$0xff]   ;;  %v9382_v41 = vld [vmem:[%s13074_s3 + $0xaa8] ss:$20 sps:$4 sm:$0xff]  }
 0x211   :  { %5515 = vmatprep.subr.bf16.mxu1 %v9318_v46  ;;  %v9387_v46 = vld [vmem:[%s13074_s3 + $0xacc] ss:$20 sps:$4 sm:$0xff]  }
 0x213   :  { %5188 = vmatpush1.bf16.msra.mxu0 %v9313_v55  ;;  %v9390_v55 = vld [vmem:[%s13074_s3 + $0xad4] ss:$20 sps:$4 sm:$0xff]  }
 0x214   :  { %5516 = vmatpush1.bf16.msra.mxu1 %v9316_v59  ;;  %5189 = vmatprep.subr.bf16.mxu0 %v9321_v61  ;;  %v9385_v59 = vld [vmem:[%s13074_s3 + $0xac8] ss:$20 sps:$4 sm:$0xff]   ;;  %v9388_v61 = vld [vmem:[%s13074_s3 + $0xad0] ss:$20 sps:$4 sm:$0xff]  }
 0x215   :  { %5517 = vmatprep.subr.bf16.mxu1 %v9324_v18  ;;  %v9393_v18 = vld [vmem:[%s13074_s3 + $0xaf4] ss:$20 sps:$4 sm:$0xff]  }
 0x217   :  { %5190 = vmatpush1.bf16.msra.mxu0 %v9319_v19  ;;  %v9396_v19 = vld [vmem:[%s13074_s3 + $0xafc] ss:$20 sps:$4 sm:$0xff]  }
 0x218   :  { %5518 = vmatpush1.bf16.msra.mxu1 %v9322_v56  ;;  %5191 = vmatprep.subr.bf16.mxu0 %v9327_v45  ;;  %v9391_v56 = vld [vmem:[%s13074_s3 + $0xaf0] ss:$20 sps:$4 sm:$0xff]   ;;  %v9394_v45 = vld [vmem:[%s13074_s3 + $0xaf8] ss:$20 sps:$4 sm:$0xff]  }
 0x219   :  { %5519 = vmatprep.subr.bf16.mxu1 %v9330_v49  ;;  %v9399_v49 = vld [vmem:[%s13074_s3 + $0xb1c] ss:$20 sps:$4 sm:$0xff]  }
 0x21b   :  { %5192 = vmatpush1.bf16.msra.mxu0 %v9325_v17  ;;  %v9402_v17 = vld [vmem:[%s13074_s3 + $0xb24] ss:$20 sps:$4 sm:$0xff]  }
 0x21c   :  { %5520 = vmatpush1.bf16.msra.mxu1 %v9328_v13  ;;  %5193 = vmatprep.subr.bf16.mxu0 %v9333_v24  ;;  %v9397_v13 = vld [vmem:[%s13074_s3 + $0xb18] ss:$20 sps:$4 sm:$0xff]   ;;  %v9400_v24 = vld [vmem:[%s13074_s3 + $0xb20] ss:$20 sps:$4 sm:$0xff]  }
 0x21d   :  { %5521 = vmatprep.subr.bf16.mxu1 %v9336_v62  ;;  %v9405_v62 = vld [vmem:[%s13074_s3 + $0xb44] ss:$20 sps:$4 sm:$0xff]  }
 0x21f   :  { %5194 = vmatpush1.bf16.msra.mxu0 %v9331_v12  ;;  %v9408_v12 = vld [vmem:[%s13074_s3 + $0xb4c] ss:$20 sps:$4 sm:$0xff]  }
 0x220   :  { %5522 = vmatpush1.bf16.msra.mxu1 %v9334_v44  ;;  %5195 = vmatprep.subr.bf16.mxu0 %v9339_v35  ;;  %v9403_v44 = vld [vmem:[%s13074_s3 + $0xb40] ss:$20 sps:$4 sm:$0xff]   ;;  %v9406_v35 = vld [vmem:[%s13074_s3 + $0xb48] ss:$20 sps:$4 sm:$0xff]  }
 0x221   :  { %5523 = vmatprep.subr.bf16.mxu1 %v9342_v57  ;;  %v9411_v57 = vld [vmem:[%s13074_s3 + $0xb6c] ss:$20 sps:$4 sm:$0xff]  }
 0x223   :  { %5196 = vmatpush1.bf16.msra.mxu0 %v9337_v25  ;;  %v9414_v25 = vld [vmem:[%s13074_s3 + $0xb74] ss:$20 sps:$4 sm:$0xff]  }
 0x224   :  { %5524 = vmatpush1.bf16.msra.mxu1 %v9340_v60  ;;  %5197 = vmatprep.subr.bf16.mxu0 %v9345_v31  ;;  %v9409_v60 = vld [vmem:[%s13074_s3 + $0xb68] ss:$20 sps:$4 sm:$0xff]   ;;  %v9412_v31 = vld [vmem:[%s13074_s3 + $0xb70] ss:$20 sps:$4 sm:$0xff]  }
 0x225   :  { %5525 = vmatprep.subr.bf16.mxu1 %v9348_v1  ;;  %v9417_v1 = vld [vmem:[%s13074_s3 + $0xb94] ss:$20 sps:$4 sm:$0xff]  }
 0x227   :  { %5198 = vmatpush1.bf16.msra.mxu0 %v9343_v3  ;;  %v9420_v3 = vld [vmem:[%s13074_s3 + $0xb9c] ss:$20 sps:$4 sm:$0xff]  }
 0x228   :  { %5526 = vmatpush1.bf16.msra.mxu1 %v9346_v8  ;;  %5199 = vmatprep.subr.bf16.mxu0 %v9351_v6  ;;  %v9415_v8 = vld [vmem:[%s13074_s3 + $0xb90] ss:$20 sps:$4 sm:$0xff]   ;;  %v9418_v6 = vld [vmem:[%s13074_s3 + $0xb98] ss:$20 sps:$4 sm:$0xff]  }
 0x229   :  { %5527 = vmatprep.subr.bf16.mxu1 %v9354_v14  ;;  %v9423_v14 = vld [vmem:[%s13074_s3 + $0xbbc] ss:$20 sps:$4 sm:$0xff]  }
 0x22b   :  { %5200 = vmatpush1.bf16.msra.mxu0 %v9349_v43  ;;  %v9426_v43 = vld [vmem:[%s13074_s3 + $0xbc4] ss:$20 sps:$4 sm:$0xff]  }
 0x22c   :  { %5528 = vmatpush1.bf16.msra.mxu1 %v9352_v16  ;;  %5210 = vmatprep.subr.bf16.mxu0 %v9357_v9  ;;  %v9421_v16 = vld [vmem:[%s13074_s3 + $0xbb8] ss:$20 sps:$4 sm:$0xff]   ;;  %v9424_v9 = vld [vmem:[%s13074_s3 + $0xbc0] ss:$20 sps:$4 sm:$0xff]  }
 0x22d   :  { %5538 = vmatprep.subr.bf16.mxu1 %v9360_v28  ;;  %v9429_v28 = vld [vmem:[%s13074_s3 + $0xbe4] ss:$20 sps:$4 sm:$0xff]  }
 0x22e   :  { %5202 = vmatmul.mubr.bf16.vlgmr.msra.gmra.mrb[16].mxu0 %v11383_v21 }
 0x22f   :  { %5530 = vmatmul.mubr.bf16.vlgmr.msra.gmra.mrb[16].mxu1 %v11383_v21  ;;  %5211 = vmatpush1.bf16.msra.mxu0 %v9355_v23  ;;  %v9432_v23 = vld [vmem:[%s13074_s3 + $0xbec] ss:$20 sps:$4 sm:$0xff]  }
 0x230   :  { %5242 = vmatprep.mubr.bf16.mxu0 %v11393_v54  ;;  %5539 = vmatpush1.bf16.msra.mxu1 %v9358_v29  ;;  %v9427_v29 = vld [vmem:[%s13074_s3 + $0xbe0] ss:$20 sps:$4 sm:$0xff]  }
 0x231   :  { %5570 = vmatprep.mubr.bf16.mxu1 %v11393_v54  ;;  %5212 = vmatprep.subr.bf16.mxu0 %v9363_v15  ;;  %v9430_v15 = vld [vmem:[%s13074_s3 + $0xbe8] ss:$20 sps:$4 sm:$0xff]  }
 0x232   :  { %5540 = vmatprep.subr.bf16.mxu1 %v9366_v51  ;;  %v9435_v51 = vld [vmem:[%s13074_s3 + $0xc0c] ss:$20 sps:$4 sm:$0xff]  }
 0x233   :  { %5213 = vmatpush1.bf16.msra.mxu0 %v9361_v0  ;;  %v9438_v0 = vld [vmem:[%s13074_s3 + $0xc14] ss:$20 sps:$4 sm:$0xff]  }
 0x234   :  { %5541 = vmatpush1.bf16.msra.mxu1 %v9364_v2  ;;  %5214 = vmatprep.subr.bf16.mxu0 %v9369_v58  ;;  %v9433_v2 = vld [vmem:[%s13074_s3 + $0xc08] ss:$20 sps:$4 sm:$0xff]   ;;  %v9436_v58 = vld [vmem:[%s13074_s3 + $0xc10] ss:$20 sps:$4 sm:$0xff]  }
 0x235   :  { %5542 = vmatprep.subr.bf16.mxu1 %v9372_v4  ;;  %v9441_v4 = vld [vmem:[%s13074_s3 + $0xc34] ss:$20 sps:$4 sm:$0xff]  }
 0x237   :  { %5215 = vmatpush1.bf16.msra.mxu0 %v9367_v5  ;;  %v9444_v5 = vld [vmem:[%s13074_s3 + $0xc3c] ss:$20 sps:$4 sm:$0xff]  }
 0x238   :  { %5543 = vmatpush1.bf16.msra.mxu1 %v9370_v33  ;;  %5216 = vmatprep.subr.bf16.mxu0 %v9375_v50  ;;  %v9439_v33 = vld [vmem:[%s13074_s3 + $0xc30] ss:$20 sps:$4 sm:$0xff]   ;;  %v9442_v50 = vld [vmem:[%s13074_s3 + $0xc38] ss:$20 sps:$4 sm:$0xff]  }
 0x239   :  { %5544 = vmatprep.subr.bf16.mxu1 %v9378_v11  ;;  %v9447_v11 = vld [vmem:[%s13074_s3 + $0xc5c] ss:$20 sps:$4 sm:$0xff]  }
 0x23b   :  { %5217 = vmatpush1.bf16.msra.mxu0 %v9373_v52  ;;  %v9450_v52 = vld [vmem:[%s13074_s3 + $0xc64] ss:$20 sps:$4 sm:$0xff]  }
 0x23c   :  { %5545 = vmatpush1.bf16.msra.mxu1 %v9376_v26  ;;  %5218 = vmatprep.subr.bf16.mxu0 %v9381_v53  ;;  %v9445_v26 = vld [vmem:[%s13074_s3 + $0xc58] ss:$20 sps:$4 sm:$0xff]   ;;  %v9448_v53 = vld [vmem:[%s13074_s3 + $0xc60] ss:$20 sps:$4 sm:$0xff]  }
 0x23d   :  { %5546 = vmatprep.subr.bf16.mxu1 %v9384_v32  ;;  %v9453_v32 = vld [vmem:[%s13074_s3 + $0xc84] ss:$20 sps:$4 sm:$0xff]  }
 0x23f   :  { %5219 = vmatpush1.bf16.msra.mxu0 %v9379_v36  ;;  %v9456_v36 = vld [vmem:[%s13074_s3 + $0xc8c] ss:$20 sps:$4 sm:$0xff]  }
 0x240   :  { %5547 = vmatpush1.bf16.msra.mxu1 %v9382_v41  ;;  %5220 = vmatprep.subr.bf16.mxu0 %v9387_v46  ;;  %v9451_v41 = vld [vmem:[%s13074_s3 + $0xc80] ss:$20 sps:$4 sm:$0xff]   ;;  %v11587_v46 = vpack.c.bf16 %v10948_v30, %v10948_v30 }
 0x241   :  { %5548 = vmatprep.subr.bf16.mxu1 %v9390_v55  ;;  %v9454_v55 = vld [vmem:[%s13074_s3 + $0xc88] ss:$20 sps:$4 sm:$0xff]  }
 0x242   :  { %v9462_v30 = vld [vmem:[%s13074_s3 + $0xcb4] ss:$20 sps:$4 sm:$0xff]  }
 0x243   :  { %5221 = vmatpush1.bf16.msra.mxu0 %v9385_v59  ;;  %v9459_v59 = vld [vmem:[%s13074_s3 + $0xcac] ss:$20 sps:$4 sm:$0xff]  }
 0x244   :  { %5549 = vmatpush1.bf16.msra.mxu1 %v9388_v61  ;;  %5222 = vmatprep.subr.bf16.mxu0 %v9393_v18  ;;  %v11597_v61 = vpack.c.bf16 %v10960_v37, %v10960_v37  ;;  %v9457_v18 = vld [vmem:[%s13074_s3 + $0xca8] ss:$20 sps:$4 sm:$0xff]   ;;  %v9460_v37 = vld [vmem:[%s13074_s3 + $0xcb0] ss:$20 sps:$4 sm:$0xff]  }
 0x245   :  { %5550 = vmatprep.subr.bf16.mxu1 %v9396_v19  ;;  %v9465_v19 = vld [vmem:[%s13074_s3 + $0xcd4] ss:$20 sps:$4 sm:$0xff]  }
 0x247   :  { %5223 = vmatpush1.bf16.msra.mxu0 %v9391_v56  ;;  %v9468_v56 = vld [vmem:[%s13074_s3 + $0xcdc] ss:$20 sps:$4 sm:$0xff]  }
 0x248   :  { %5551 = vmatpush1.bf16.msra.mxu1 %v9394_v45  ;;  %5224 = vmatprep.subr.bf16.mxu0 %v9399_v49  ;;  %v9463_v45 = vld [vmem:[%s13074_s3 + $0xcd0] ss:$20 sps:$4 sm:$0xff]   ;;  %v9466_v49 = vld [vmem:[%s13074_s3 + $0xcd8] ss:$20 sps:$4 sm:$0xff]  }
 0x249   :  { %5552 = vmatprep.subr.bf16.mxu1 %v9402_v17  ;;  %v9471_v17 = vld [vmem:[%s13074_s3 + $0xcfc] ss:$20 sps:$4 sm:$0xff]  }
 0x24b   :  { %5225 = vmatpush1.bf16.msra.mxu0 %v9397_v13  ;;  %v9474_v13 = vld [vmem:[%s13074_s3 + $0xd04] ss:$20 sps:$4 sm:$0xff]  }
 0x24c   :  { %5553 = vmatpush1.bf16.msra.mxu1 %v9400_v24  ;;  %5226 = vmatprep.subr.bf16.mxu0 %v9405_v62  ;;  %v9469_v24 = vld [vmem:[%s13074_s3 + $0xcf8] ss:$20 sps:$4 sm:$0xff]   ;;  %v9472_v62 = vld [vmem:[%s13074_s3 + $0xd00] ss:$20 sps:$4 sm:$0xff]  }
 0x24d   :  { %5554 = vmatprep.subr.bf16.mxu1 %v9408_v12  ;;  %v9477_v12 = vld [vmem:[%s13074_s3 + $0xd24] ss:$20 sps:$4 sm:$0xff]  }
 0x24f   :  { %5227 = vmatpush1.bf16.msra.mxu0 %v9403_v44  ;;  %v9480_v44 = vld [vmem:[%s13074_s3 + $0xd2c] ss:$20 sps:$4 sm:$0xff]  }
 0x250   :  { %5555 = vmatpush1.bf16.msra.mxu1 %v9406_v35  ;;  %5228 = vmatprep.subr.bf16.mxu0 %v9411_v57  ;;  %v9475_v35 = vld [vmem:[%s13074_s3 + $0xd20] ss:$20 sps:$4 sm:$0xff]   ;;  %v9478_v57 = vld [vmem:[%s13074_s3 + $0xd28] ss:$20 sps:$4 sm:$0xff]  }
 0x251   :  { %5556 = vmatprep.subr.bf16.mxu1 %v9414_v25  ;;  %v9483_v25 = vld [vmem:[%s13074_s3 + $0xd4c] ss:$20 sps:$4 sm:$0xff]  }
 0x253   :  { %5229 = vmatpush1.bf16.msra.mxu0 %v9409_v60  ;;  %v9486_v60 = vld [vmem:[%s13074_s3 + $0xd54] ss:$20 sps:$4 sm:$0xff]  }
 0x254   :  { %5557 = vmatpush1.bf16.msra.mxu1 %v9412_v31  ;;  %5230 = vmatprep.subr.bf16.mxu0 %v9417_v1  ;;  %v9481_v31 = vld [vmem:[%s13074_s3 + $0xd48] ss:$20 sps:$4 sm:$0xff]   ;;  %v9484_v1 = vld [vmem:[%s13074_s3 + $0xd50] ss:$20 sps:$4 sm:$0xff]  }
 0x255   :  { %5558 = vmatprep.subr.bf16.mxu1 %v9420_v3  ;;  %v9489_v3 = vld [vmem:[%s13074_s3 + $0xd74] ss:$20 sps:$4 sm:$0xff]  }
 0x257   :  { %5231 = vmatpush1.bf16.msra.mxu0 %v9415_v8  ;;  %v9492_v8 = vld [vmem:[%s13074_s3 + $0xd7c] ss:$20 sps:$4 sm:$0xff]  }
 0x258   :  { %5559 = vmatpush1.bf16.msra.mxu1 %v9418_v6  ;;  %5232 = vmatprep.subr.bf16.mxu0 %v9423_v14  ;;  %v9487_v6 = vld [vmem:[%s13074_s3 + $0xd70] ss:$20 sps:$4 sm:$0xff]   ;;  %v9490_v14 = vld [vmem:[%s13074_s3 + $0xd78] ss:$20 sps:$4 sm:$0xff]  }
 0x259   :  { %5560 = vmatprep.subr.bf16.mxu1 %v9426_v43  ;;  %v9495_v43 = vld [vmem:[%s13074_s3 + $0xd9c] ss:$20 sps:$4 sm:$0xff]  }
 0x25b   :  { %5233 = vmatpush1.bf16.msra.mxu0 %v9421_v16  ;;  %v9498_v16 = vld [vmem:[%s13074_s3 + $0xda4] ss:$20 sps:$4 sm:$0xff]  }
 0x25c   :  { %5561 = vmatpush1.bf16.msra.mxu1 %v9424_v9  ;;  %5234 = vmatprep.subr.bf16.mxu0 %v9429_v28  ;;  %v9493_v9 = vld [vmem:[%s13074_s3 + $0xd98] ss:$20 sps:$4 sm:$0xff]   ;;  %v9496_v28 = vld [vmem:[%s13074_s3 + $0xda0] ss:$20 sps:$4 sm:$0xff]  }
 0x25d   :  { %5562 = vmatprep.subr.bf16.mxu1 %v9432_v23  ;;  %v9501_v23 = vld [vmem:[%s13074_s3 + $0xdc4] ss:$20 sps:$4 sm:$0xff]  }
 0x25f   :  { %5235 = vmatpush1.bf16.msra.mxu0 %v9427_v29  ;;  %v9504_v29 = vld [vmem:[%s13074_s3 + $0xdcc] ss:$20 sps:$4 sm:$0xff]  }
 0x260   :  { %5563 = vmatpush1.bf16.msra.mxu1 %v9430_v15  ;;  %5236 = vmatprep.subr.bf16.mxu0 %v9435_v51  ;;  %v9499_v15 = vld [vmem:[%s13074_s3 + $0xdc0] ss:$20 sps:$4 sm:$0xff]   ;;  %v9502_v51 = vld [vmem:[%s13074_s3 + $0xdc8] ss:$20 sps:$4 sm:$0xff]  }
 0x261   :  { %5564 = vmatprep.subr.bf16.mxu1 %v9438_v0  ;;  %v9507_v0 = vld [vmem:[%s13074_s3 + $0xdec] ss:$20 sps:$4 sm:$0xff]  }
 0x263   :  { %5237 = vmatpush1.bf16.msra.mxu0 %v9433_v2  ;;  %v9510_v2 = vld [vmem:[%s13074_s3 + $0xdf4] ss:$20 sps:$4 sm:$0xff]  }
 0x264   :  { %5565 = vmatpush1.bf16.msra.mxu1 %v9436_v58  ;;  %5238 = vmatprep.subr.bf16.mxu0 %v9441_v4  ;;  %v9505_v58 = vld [vmem:[%s13074_s3 + $0xde8] ss:$20 sps:$4 sm:$0xff]   ;;  %v9508_v4 = vld [vmem:[%s13074_s3 + $0xdf0] ss:$20 sps:$4 sm:$0xff]  }
 0x265   :  { %5566 = vmatprep.subr.bf16.mxu1 %v9444_v5  ;;  %v9513_v5 = vld [vmem:[%s13074_s3 + $0xe14] ss:$20 sps:$4 sm:$0xff]  }
 0x267   :  { %5239 = vmatpush1.bf16.msra.mxu0 %v9439_v33  ;;  %v9516_v33 = vld [vmem:[%s13074_s3 + $0xe1c] ss:$20 sps:$4 sm:$0xff]  }
 0x268   :  { %5567 = vmatpush1.bf16.msra.mxu1 %v9442_v50  ;;  %5240 = vmatprep.subr.bf16.mxu0 %v9447_v11  ;;  %v9511_v50 = vld [vmem:[%s13074_s3 + $0xe10] ss:$20 sps:$4 sm:$0xff]   ;;  %v9514_v11 = vld [vmem:[%s13074_s3 + $0xe18] ss:$20 sps:$4 sm:$0xff]  }
 0x269   :  { %5568 = vmatprep.subr.bf16.mxu1 %v9450_v52  ;;  %v9519_v52 = vld [vmem:[%s13074_s3 + $0xe3c] ss:$20 sps:$4 sm:$0xff]  }
 0x26b   :  { %5241 = vmatpush1.bf16.msra.mxu0 %v9445_v26  ;;  %v9522_v26 = vld [vmem:[%s13074_s3 + $0xe44] ss:$20 sps:$4 sm:$0xff]  }
 0x26c   :  { %5569 = vmatpush1.bf16.msra.mxu1 %v9448_v53  ;;  %5251 = vmatprep.subr.bf16.mxu0 %v9453_v32  ;;  %v9517_v53 = vld [vmem:[%s13074_s3 + $0xe38] ss:$20 sps:$4 sm:$0xff]   ;;  %v9520_v32 = vld [vmem:[%s13074_s3 + $0xe40] ss:$20 sps:$4 sm:$0xff]  }
 0x26d   :  { %5579 = vmatprep.subr.bf16.mxu1 %v9456_v36  ;;  %v9525_v36 = vld [vmem:[%s13074_s3 + $0xe64] ss:$20 sps:$4 sm:$0xff]  }
 0x26e   :  { %5243 = vmatmul.mubr.bf16.vlgmr.msra.gmra.mrb[16].mxu0 %v11587_v46 }
 0x26f   :  { %5571 = vmatmul.mubr.bf16.vlgmr.msra.gmra.mrb[16].mxu1 %v11587_v46  ;;  %5252 = vmatpush1.bf16.msra.mxu0 %v9451_v41  ;;  %v9528_v41 = vld [vmem:[%s13074_s3 + $0xe6c] ss:$20 sps:$4 sm:$0xff]  }
 0x270   :  { %5283 = vmatprep.mubr.bf16.mxu0 %v11597_v61  ;;  %5580 = vmatpush1.bf16.msra.mxu1 %v9454_v55  ;;  %v9523_v55 = vld [vmem:[%s13074_s3 + $0xe60] ss:$20 sps:$4 sm:$0xff]  }
 0x271   :  { %5611 = vmatprep.mubr.bf16.mxu1 %v11597_v61  ;;  %5253 = vmatprep.subr.bf16.mxu0 %v9459_v59  ;;  %v9526_v59 = vld [vmem:[%s13074_s3 + $0xe68] ss:$20 sps:$4 sm:$0xff]  }
 0x272   :  { %5581 = vmatprep.subr.bf16.mxu1 %v9462_v30  ;;  %v9531_v30 = vld [vmem:[%s13074_s3 + $0xe8c] ss:$20 sps:$4 sm:$0xff]  }
 0x273   :  { %5254 = vmatpush1.bf16.msra.mxu0 %v9457_v18  ;;  %v9534_v18 = vld [vmem:[%s13074_s3 + $0xe94] ss:$20 sps:$4 sm:$0xff]  }
 0x274   :  { %5582 = vmatpush1.bf16.msra.mxu1 %v9460_v37  ;;  %5255 = vmatprep.subr.bf16.mxu0 %v9465_v19  ;;  %v9529_v37 = vld [vmem:[%s13074_s3 + $0xe88] ss:$20 sps:$4 sm:$0xff]   ;;  %v9532_v19 = vld [vmem:[%s13074_s3 + $0xe90] ss:$20 sps:$4 sm:$0xff]  }
 0x275   :  { %5583 = vmatprep.subr.bf16.mxu1 %v9468_v56  ;;  %v9537_v56 = vld [vmem:[%s13074_s3 + $0xeb4] ss:$20 sps:$4 sm:$0xff]  }
 0x277   :  { %5256 = vmatpush1.bf16.msra.mxu0 %v9463_v45  ;;  %v9540_v45 = vld [vmem:[%s13074_s3 + $0xebc] ss:$20 sps:$4 sm:$0xff]  }
 0x278   :  { %5584 = vmatpush1.bf16.msra.mxu1 %v9466_v49  ;;  %5257 = vmatprep.subr.bf16.mxu0 %v9471_v17  ;;  %v9535_v49 = vld [vmem:[%s13074_s3 + $0xeb0] ss:$20 sps:$4 sm:$0xff]   ;;  %v9538_v17 = vld [vmem:[%s13074_s3 + $0xeb8] ss:$20 sps:$4 sm:$0xff]  }
 0x279   :  { %5585 = vmatprep.subr.bf16.mxu1 %v9474_v13  ;;  %v9543_v13 = vld [vmem:[%s13074_s3 + $0xedc] ss:$20 sps:$4 sm:$0xff]  }
 0x27b   :  { %5258 = vmatpush1.bf16.msra.mxu0 %v9469_v24  ;;  %v9546_v24 = vld [vmem:[%s13074_s3 + $0xee4] ss:$20 sps:$4 sm:$0xff]  }
 0x27c   :  { %5586 = vmatpush1.bf16.msra.mxu1 %v9472_v62  ;;  %5259 = vmatprep.subr.bf16.mxu0 %v9477_v12  ;;  %v9541_v62 = vld [vmem:[%s13074_s3 + $0xed8] ss:$20 sps:$4 sm:$0xff]   ;;  %v9544_v12 = vld [vmem:[%s13074_s3 + $0xee0] ss:$20 sps:$4 sm:$0xff]  }
 0x27d   :  { %5587 = vmatprep.subr.bf16.mxu1 %v9480_v44  ;;  %v9549_v44 = vld [vmem:[%s13074_s3 + $0xf04] ss:$20 sps:$4 sm:$0xff]  }
 0x27f   :  { %5260 = vmatpush1.bf16.msra.mxu0 %v9475_v35  ;;  %v9552_v35 = vld [vmem:[%s13074_s3 + $0xf0c] ss:$20 sps:$4 sm:$0xff]  }
 0x280   :  { %5588 = vmatpush1.bf16.msra.mxu1 %v9478_v57  ;;  %5261 = vmatprep.subr.bf16.mxu0 %v9483_v25  ;;  %v9547_v57 = vld [vmem:[%s13074_s3 + $0xf00] ss:$20 sps:$4 sm:$0xff]   ;;  %v11791_v25 = vpack.c.bf16 %v10952_v42, %v10952_v42 }
 0x281   :  { %5589 = vmatprep.subr.bf16.mxu1 %v9486_v60  ;;  %v9550_v60 = vld [vmem:[%s13074_s3 + $0xf08] ss:$20 sps:$4 sm:$0xff]  }
 0x282   :  { %v9558_v42 = vld [vmem:[%s13074_s3 + $0xf34] ss:$20 sps:$4 sm:$0xff]  }
 0x283   :  { %5262 = vmatpush1.bf16.msra.mxu0 %v9481_v31  ;;  %v9555_v31 = vld [vmem:[%s13074_s3 + $0xf2c] ss:$20 sps:$4 sm:$0xff]  }
 0x284   :  { %5590 = vmatpush1.bf16.msra.mxu1 %v9484_v1  ;;  %5263 = vmatprep.subr.bf16.mxu0 %v9489_v3  ;;  %v11801_v1 = vpack.c.bf16 %v11044_v63, %v11044_v63  ;;  %v9553_v3 = vld [vmem:[%s13074_s3 + $0xf28] ss:$20 sps:$4 sm:$0xff]   ;;  %v9556_v63 = vld [vmem:[%s13074_s3 + $0xf30] ss:$20 sps:$4 sm:$0xff]  }
 0x285   :  { %5591 = vmatprep.subr.bf16.mxu1 %v9492_v8  ;;  %v9561_v8 = vld [vmem:[%s13074_s3 + $0xf54] ss:$20 sps:$4 sm:$0xff]  }
 0x287   :  { %5264 = vmatpush1.bf16.msra.mxu0 %v9487_v6  ;;  %v9564_v6 = vld [vmem:[%s13074_s3 + $0xf5c] ss:$20 sps:$4 sm:$0xff]  }
 0x288   :  { %5592 = vmatpush1.bf16.msra.mxu1 %v9490_v14  ;;  %5265 = vmatprep.subr.bf16.mxu0 %v9495_v43  ;;  %v9559_v14 = vld [vmem:[%s13074_s3 + $0xf50] ss:$20 sps:$4 sm:$0xff]   ;;  %v9562_v43 = vld [vmem:[%s13074_s3 + $0xf58] ss:$20 sps:$4 sm:$0xff]  }
 0x289   :  { %5593 = vmatprep.subr.bf16.mxu1 %v9498_v16  ;;  %v9567_v16 = vld [vmem:[%s13074_s3 + $0xf7c] ss:$20 sps:$4 sm:$0xff]  }
 0x28b   :  { %5266 = vmatpush1.bf16.msra.mxu0 %v9493_v9  ;;  %v9570_v9 = vld [vmem:[%s13074_s3 + $0xf84] ss:$20 sps:$4 sm:$0xff]  }
 0x28c   :  { %5594 = vmatpush1.bf16.msra.mxu1 %v9496_v28  ;;  %5267 = vmatprep.subr.bf16.mxu0 %v9501_v23  ;;  %v9565_v28 = vld [vmem:[%s13074_s3 + $0xf78] ss:$20 sps:$4 sm:$0xff]   ;;  %v9568_v23 = vld [vmem:[%s13074_s3 + $0xf80] ss:$20 sps:$4 sm:$0xff]  }
 0x28d   :  { %5595 = vmatprep.subr.bf16.mxu1 %v9504_v29  ;;  %v9573_v29 = vld [vmem:[%s13074_s3 + $0xfa4] ss:$20 sps:$4 sm:$0xff]  }
 0x28f   :  { %5268 = vmatpush1.bf16.msra.mxu0 %v9499_v15  ;;  %v9576_v15 = vld [vmem:[%s13074_s3 + $0xfac] ss:$20 sps:$4 sm:$0xff]  }
 0x290   :  { %5596 = vmatpush1.bf16.msra.mxu1 %v9502_v51  ;;  %5269 = vmatprep.subr.bf16.mxu0 %v9507_v0  ;;  %v9571_v51 = vld [vmem:[%s13074_s3 + $0xfa0] ss:$20 sps:$4 sm:$0xff]   ;;  %v9574_v0 = vld [vmem:[%s13074_s3 + $0xfa8] ss:$20 sps:$4 sm:$0xff]  }
 0x291   :  { %5597 = vmatprep.subr.bf16.mxu1 %v9510_v2  ;;  %v9579_v2 = vld [vmem:[%s13074_s3 + $0xfcc] ss:$20 sps:$4 sm:$0xff]  }
 0x293   :  { %5270 = vmatpush1.bf16.msra.mxu0 %v9505_v58  ;;  %v9582_v58 = vld [vmem:[%s13074_s3 + $0xfd4] ss:$20 sps:$4 sm:$0xff]  }
 0x294   :  { %5598 = vmatpush1.bf16.msra.mxu1 %v9508_v4  ;;  %5271 = vmatprep.subr.bf16.mxu0 %v9513_v5  ;;  %v9577_v4 = vld [vmem:[%s13074_s3 + $0xfc8] ss:$20 sps:$4 sm:$0xff]   ;;  %v9580_v5 = vld [vmem:[%s13074_s3 + $0xfd0] ss:$20 sps:$4 sm:$0xff]  }
 0x295   :  { %5599 = vmatprep.subr.bf16.mxu1 %v9516_v33  ;;  %v9585_v33 = vld [vmem:[%s13074_s3 + $0xff4] ss:$20 sps:$4 sm:$0xff]  }
 0x297   :  { %5272 = vmatpush1.bf16.msra.mxu0 %v9511_v50  ;;  %v9588_v50 = vld [vmem:[%s13074_s3 + $0xffc] ss:$20 sps:$4 sm:$0xff]  }
 0x298   :  { %5600 = vmatpush1.bf16.msra.mxu1 %v9514_v11  ;;  %5273 = vmatprep.subr.bf16.mxu0 %v9519_v52  ;;  %v9583_v11 = vld [vmem:[%s13074_s3 + $0xff0] ss:$20 sps:$4 sm:$0xff]   ;;  %v9586_v52 = vld [vmem:[%s13074_s3 + $0xff8] ss:$20 sps:$4 sm:$0xff]  }
 0x299   :  { %5601 = vmatprep.subr.bf16.mxu1 %v9522_v26  ;;  %v9591_v26 = vld [vmem:[%s13074_s3 + $0x101c] ss:$20 sps:$4 sm:$0xff]  }
 0x29b   :  { %5274 = vmatpush1.bf16.msra.mxu0 %v9517_v53  ;;  %v9594_v53 = vld [vmem:[%s13074_s3 + $0x1024] ss:$20 sps:$4 sm:$0xff]  }
 0x29c   :  { %5602 = vmatpush1.bf16.msra.mxu1 %v9520_v32  ;;  %5275 = vmatprep.subr.bf16.mxu0 %v9525_v36  ;;  %v9589_v32 = vld [vmem:[%s13074_s3 + $0x1018] ss:$20 sps:$4 sm:$0xff]   ;;  %v9592_v36 = vld [vmem:[%s13074_s3 + $0x1020] ss:$20 sps:$4 sm:$0xff]  }
 0x29d   :  { %5603 = vmatprep.subr.bf16.mxu1 %v9528_v41  ;;  %v9597_v41 = vld [vmem:[%s13074_s3 + $0x1044] ss:$20 sps:$4 sm:$0xff]  }
 0x29f   :  { %5276 = vmatpush1.bf16.msra.mxu0 %v9523_v55  ;;  %v9600_v55 = vld [vmem:[%s13074_s3 + $0x104c] ss:$20 sps:$4 sm:$0xff]  }
 0x2a0   :  { %5604 = vmatpush1.bf16.msra.mxu1 %v9526_v59  ;;  %5277 = vmatprep.subr.bf16.mxu0 %v9531_v30  ;;  %v9595_v59 = vld [vmem:[%s13074_s3 + $0x1040] ss:$20 sps:$4 sm:$0xff]   ;;  %v9598_v30 = vld [vmem:[%s13074_s3 + $0x1048] ss:$20 sps:$4 sm:$0xff]  }
 0x2a1   :  { %5605 = vmatprep.subr.bf16.mxu1 %v9534_v18  ;;  %v9603_v18 = vld [vmem:[%s13074_s3 + $0x106c] ss:$20 sps:$4 sm:$0xff]  }
 0x2a3   :  { %5278 = vmatpush1.bf16.msra.mxu0 %v9529_v37  ;;  %v9606_v37 = vld [vmem:[%s13074_s3 + $0x1074] ss:$20 sps:$4 sm:$0xff]  }
 0x2a4   :  { %5606 = vmatpush1.bf16.msra.mxu1 %v9532_v19  ;;  %5279 = vmatprep.subr.bf16.mxu0 %v9537_v56  ;;  %v9601_v19 = vld [vmem:[%s13074_s3 + $0x1068] ss:$20 sps:$4 sm:$0xff]   ;;  %v9604_v56 = vld [vmem:[%s13074_s3 + $0x1070] ss:$20 sps:$4 sm:$0xff]  }
 0x2a5   :  { %5607 = vmatprep.subr.bf16.mxu1 %v9540_v45  ;;  %v9609_v45 = vld [vmem:[%s13074_s3 + $0x1094] ss:$20 sps:$4 sm:$0xff]  }
 0x2a7   :  { %5280 = vmatpush1.bf16.msra.mxu0 %v9535_v49  ;;  %v9612_v49 = vld [vmem:[%s13074_s3 + $0x109c] ss:$20 sps:$4 sm:$0xff]  }
 0x2a8   :  { %5608 = vmatpush1.bf16.msra.mxu1 %v9538_v17  ;;  %5281 = vmatprep.subr.bf16.mxu0 %v9543_v13  ;;  %v9607_v17 = vld [vmem:[%s13074_s3 + $0x1090] ss:$20 sps:$4 sm:$0xff]   ;;  %v9610_v13 = vld [vmem:[%s13074_s3 + $0x1098] ss:$20 sps:$4 sm:$0xff]  }
 0x2a9   :  { %5609 = vmatprep.subr.bf16.mxu1 %v9546_v24  ;;  %v9615_v24 = vld [vmem:[%s13074_s3 + $0x10bc] ss:$20 sps:$4 sm:$0xff]  }
 0x2ab   :  { %5282 = vmatpush1.bf16.msra.mxu0 %v9541_v62  ;;  %v9618_v62 = vld [vmem:[%s13074_s3 + $0x10c4] ss:$20 sps:$4 sm:$0xff]  }
 0x2ac   :  { %5610 = vmatpush1.bf16.msra.mxu1 %v9544_v12  ;;  %5292 = vmatprep.subr.bf16.mxu0 %v9549_v44  ;;  %v9613_v12 = vld [vmem:[%s13074_s3 + $0x10b8] ss:$20 sps:$4 sm:$0xff]   ;;  %v9616_v44 = vld [vmem:[%s13074_s3 + $0x10c0] ss:$20 sps:$4 sm:$0xff]  }
 0x2ad   :  { %5620 = vmatprep.subr.bf16.mxu1 %v9552_v35  ;;  %v9621_v35 = vld [vmem:[%s13074_s3 + $0x10e4] ss:$20 sps:$4 sm:$0xff]  }
 0x2ae   :  { %5284 = vmatmul.mubr.bf16.vlgmr.msra.gmra.mrb[16].mxu0 %v11791_v25 }
 0x2af   :  { %5612 = vmatmul.mubr.bf16.vlgmr.msra.gmra.mrb[16].mxu1 %v11791_v25  ;;  %5293 = vmatpush1.bf16.msra.mxu0 %v9547_v57  ;;  %v9624_v57 = vld [vmem:[%s13074_s3 + $0x10ec] ss:$20 sps:$4 sm:$0xff]  }
 0x2b0   :  { %5324 = vmatprep.mubr.bf16.mxu0 %v11801_v1  ;;  %5621 = vmatpush1.bf16.msra.mxu1 %v9550_v60  ;;  %v9619_v60 = vld [vmem:[%s13074_s3 + $0x10e0] ss:$20 sps:$4 sm:$0xff]  }
 0x2b1   :  { %5652 = vmatprep.mubr.bf16.mxu1 %v11801_v1  ;;  %5294 = vmatprep.subr.bf16.mxu0 %v9555_v31  ;;  %v9622_v31 = vld [vmem:[%s13074_s3 + $0x10e8] ss:$20 sps:$4 sm:$0xff]  }
 0x2b2   :  { %5622 = vmatprep.subr.bf16.mxu1 %v9558_v42  ;;  %v9627_v42 = vld [vmem:[%s13074_s3 + $0x110c] ss:$20 sps:$4 sm:$0xff]  }
 0x2b3   :  { %5295 = vmatpush1.bf16.msra.mxu0 %v9553_v3  ;;  %v9630_v3 = vld [vmem:[%s13074_s3 + $0x1114] ss:$20 sps:$4 sm:$0xff]  }
 0x2b4   :  { %5623 = vmatpush1.bf16.msra.mxu1 %v9556_v63  ;;  %5296 = vmatprep.subr.bf16.mxu0 %v9561_v8  ;;  %v9625_v63 = vld [vmem:[%s13074_s3 + $0x1108] ss:$20 sps:$4 sm:$0xff]   ;;  %v9628_v8 = vld [vmem:[%s13074_s3 + $0x1110] ss:$20 sps:$4 sm:$0xff]  }
 0x2b5   :  { %5624 = vmatprep.subr.bf16.mxu1 %v9564_v6  ;;  %v9633_v6 = vld [vmem:[%s13074_s3 + $0x1134] ss:$20 sps:$4 sm:$0xff]  }
 0x2b7   :  { %5297 = vmatpush1.bf16.msra.mxu0 %v9559_v14  ;;  %v9636_v14 = vld [vmem:[%s13074_s3 + $0x113c] ss:$20 sps:$4 sm:$0xff]  }
 0x2b8   :  { %5625 = vmatpush1.bf16.msra.mxu1 %v9562_v43  ;;  %5298 = vmatprep.subr.bf16.mxu0 %v9567_v16  ;;  %v9631_v43 = vld [vmem:[%s13074_s3 + $0x1130] ss:$20 sps:$4 sm:$0xff]   ;;  %v9634_v16 = vld [vmem:[%s13074_s3 + $0x1138] ss:$20 sps:$4 sm:$0xff]  }
 0x2b9   :  { %5626 = vmatprep.subr.bf16.mxu1 %v9570_v9  ;;  %v9639_v9 = vld [vmem:[%s13074_s3 + $0x115c] ss:$20 sps:$4 sm:$0xff]  }
 0x2bb   :  { %5299 = vmatpush1.bf16.msra.mxu0 %v9565_v28  ;;  %v9642_v28 = vld [vmem:[%s13074_s3 + $0x1164] ss:$20 sps:$4 sm:$0xff]  }
 0x2bc   :  { %5627 = vmatpush1.bf16.msra.mxu1 %v9568_v23  ;;  %5300 = vmatprep.subr.bf16.mxu0 %v9573_v29  ;;  %v9637_v23 = vld [vmem:[%s13074_s3 + $0x1158] ss:$20 sps:$4 sm:$0xff]   ;;  %v9640_v29 = vld [vmem:[%s13074_s3 + $0x1160] ss:$20 sps:$4 sm:$0xff]  }
 0x2bd   :  { %5628 = vmatprep.subr.bf16.mxu1 %v9576_v15  ;;  %v9645_v15 = vld [vmem:[%s13074_s3 + $0x1184] ss:$20 sps:$4 sm:$0xff]  }
 0x2bf   :  { %5301 = vmatpush1.bf16.msra.mxu0 %v9571_v51  ;;  %v9648_v51 = vld [vmem:[%s13074_s3 + $0x118c] ss:$20 sps:$4 sm:$0xff]  }
 0x2c0   :  { %5629 = vmatpush1.bf16.msra.mxu1 %v9574_v0  ;;  %5302 = vmatprep.subr.bf16.mxu0 %v9579_v2  ;;  %v9643_v0 = vld [vmem:[%s13074_s3 + $0x1180] ss:$20 sps:$4 sm:$0xff]   ;;  %v11995_v2 = vpack.c.bf16 %v11040_v40, %v11040_v40 }
 0x2c1   :  { %5630 = vmatprep.subr.bf16.mxu1 %v9582_v58  ;;  %v9646_v58 = vld [vmem:[%s13074_s3 + $0x1188] ss:$20 sps:$4 sm:$0xff]  }
 0x2c2   :  { %v9654_v40 = vld [vmem:[%s13074_s3 + $0x11b4] ss:$20 sps:$4 sm:$0xff]  }
 0x2c3   :  { %5303 = vmatpush1.bf16.msra.mxu0 %v9577_v4  ;;  %v9651_v4 = vld [vmem:[%s13074_s3 + $0x11ac] ss:$20 sps:$4 sm:$0xff]  }
 0x2c4   :  { %5631 = vmatpush1.bf16.msra.mxu1 %v9580_v5  ;;  %5304 = vmatprep.subr.bf16.mxu0 %v9585_v33  ;;  %v12005_v5 = vpack.c.bf16 %v11046_v39, %v11046_v39  ;;  %v9649_v33 = vld [vmem:[%s13074_s3 + $0x11a8] ss:$20 sps:$4 sm:$0xff]   ;;  %v9652_v39 = vld [vmem:[%s13074_s3 + $0x11b0] ss:$20 sps:$4 sm:$0xff]  }
 0x2c5   :  { %5632 = vmatprep.subr.bf16.mxu1 %v9588_v50  ;;  %v9657_v50 = vld [vmem:[%s13074_s3 + $0x11d4] ss:$20 sps:$4 sm:$0xff]  }
 0x2c7   :  { %5305 = vmatpush1.bf16.msra.mxu0 %v9583_v11  ;;  %v9660_v11 = vld [vmem:[%s13074_s3 + $0x11dc] ss:$20 sps:$4 sm:$0xff]  }
 0x2c8   :  { %5633 = vmatpush1.bf16.msra.mxu1 %v9586_v52  ;;  %5306 = vmatprep.subr.bf16.mxu0 %v9591_v26  ;;  %v9655_v52 = vld [vmem:[%s13074_s3 + $0x11d0] ss:$20 sps:$4 sm:$0xff]   ;;  %v9658_v26 = vld [vmem:[%s13074_s3 + $0x11d8] ss:$20 sps:$4 sm:$0xff]  }
 0x2c9   :  { %5634 = vmatprep.subr.bf16.mxu1 %v9594_v53  ;;  %v9663_v53 = vld [vmem:[%s13074_s3 + $0x11fc] ss:$20 sps:$4 sm:$0xff]  }
 0x2cb   :  { %5307 = vmatpush1.bf16.msra.mxu0 %v9589_v32  ;;  %v9666_v32 = vld [vmem:[%s13074_s3 + $0x1204] ss:$20 sps:$4 sm:$0xff]  }
 0x2cc   :  { %5635 = vmatpush1.bf16.msra.mxu1 %v9592_v36  ;;  %5308 = vmatprep.subr.bf16.mxu0 %v9597_v41  ;;  %v9661_v36 = vld [vmem:[%s13074_s3 + $0x11f8] ss:$20 sps:$4 sm:$0xff]   ;;  %v9664_v41 = vld [vmem:[%s13074_s3 + $0x1200] ss:$20 sps:$4 sm:$0xff]  }
 0x2cd   :  { %5636 = vmatprep.subr.bf16.mxu1 %v9600_v55  ;;  %v9669_v55 = vld [vmem:[%s13074_s3 + $0x1224] ss:$20 sps:$4 sm:$0xff]  }
 0x2cf   :  { %5309 = vmatpush1.bf16.msra.mxu0 %v9595_v59  ;;  %v9672_v59 = vld [vmem:[%s13074_s3 + $0x122c] ss:$20 sps:$4 sm:$0xff]  }
 0x2d0   :  { %5637 = vmatpush1.bf16.msra.mxu1 %v9598_v30  ;;  %5310 = vmatprep.subr.bf16.mxu0 %v9603_v18  ;;  %v9667_v30 = vld [vmem:[%s13074_s3 + $0x1220] ss:$20 sps:$4 sm:$0xff]   ;;  %v9670_v18 = vld [vmem:[%s13074_s3 + $0x1228] ss:$20 sps:$4 sm:$0xff]  }
 0x2d1   :  { %5638 = vmatprep.subr.bf16.mxu1 %v9606_v37  ;;  %v9675_v37 = vld [vmem:[%s13074_s3 + $0x124c] ss:$20 sps:$4 sm:$0xff]  }
 0x2d3   :  { %5311 = vmatpush1.bf16.msra.mxu0 %v9601_v19  ;;  %v9678_v19 = vld [vmem:[%s13074_s3 + $0x1254] ss:$20 sps:$4 sm:$0xff]  }
 0x2d4   :  { %5639 = vmatpush1.bf16.msra.mxu1 %v9604_v56  ;;  %5312 = vmatprep.subr.bf16.mxu0 %v9609_v45  ;;  %v9673_v56 = vld [vmem:[%s13074_s3 + $0x1248] ss:$20 sps:$4 sm:$0xff]   ;;  %v9676_v45 = vld [vmem:[%s13074_s3 + $0x1250] ss:$20 sps:$4 sm:$0xff]  }
 0x2d5   :  { %5640 = vmatprep.subr.bf16.mxu1 %v9612_v49  ;;  %v9681_v49 = vld [vmem:[%s13074_s3 + $0x1274] ss:$20 sps:$4 sm:$0xff]  }
 0x2d7   :  { %5313 = vmatpush1.bf16.msra.mxu0 %v9607_v17  ;;  %v9684_v17 = vld [vmem:[%s13074_s3 + $0x127c] ss:$20 sps:$4 sm:$0xff]  }
 0x2d8   :  { %5641 = vmatpush1.bf16.msra.mxu1 %v9610_v13  ;;  %5314 = vmatprep.subr.bf16.mxu0 %v9615_v24  ;;  %v38_v13 = vld [vmem:[%s13075_s2] sm:$0xff] }
 0x2d9   :  { %5642 = vmatprep.subr.bf16.mxu1 %v9618_v62  ;;  %1701 = vperm.xlu0 %8869, %v38_v13   ;;  %v9679_v24 = vld [vmem:[%s13074_s3 + $0x1270] ss:$20 sps:$4 sm:$0xff]   ;;  %v9682_v62 = vld [vmem:[%s13074_s3 + $0x1278] ss:$20 sps:$4 sm:$0xff]  }
 0x2da   :  { %v9744_v13 = vld [vmem:[%s13074_s3 + $0x3f8] ss:$20 sps:$4 sm:$0xff]  }
 0x2db   :  { %5315 = vmatpush1.bf16.msra.mxu0 %v9613_v12  ;;  %v9687_v12 = vld [vmem:[%s13074_s3 + $0x129c] ss:$20 sps:$4 sm:$0xff]  }
 0x2dc   :  { %5643 = vmatpush1.bf16.msra.mxu1 %v9616_v44  ;;  %5316 = vmatprep.subr.bf16.mxu0 %v9621_v35  ;;  %v9690_v44 = vld [vmem:[%s13074_s3 + $0x12a4] ss:$20 sps:$4 sm:$0xff]  }
 0x2dd   :  { %5644 = vmatprep.subr.bf16.mxu1 %v9624_v57  ;;  %v9685_v35 = vld [vmem:[%s13074_s3 + $0x1298] ss:$20 sps:$4 sm:$0xff]   ;;  %v9688_v57 = vld [vmem:[%s13074_s3 + $0x12a0] ss:$20 sps:$4 sm:$0xff]  }
 0x2df   :  { %5317 = vmatpush1.bf16.msra.mxu0 %v9619_v60  ;;  %v9693_v60 = vld [vmem:[%s13074_s3 + $0x12c4] ss:$20 sps:$4 sm:$0xff]  }
 0x2e0   :  { %5645 = vmatpush1.bf16.msra.mxu1 %v9622_v31  ;;  %5318 = vmatprep.subr.bf16.mxu0 %v9627_v42  ;;  %v9696_v31 = vld [vmem:[%s13074_s3 + $0x12cc] ss:$20 sps:$4 sm:$0xff]  }
 0x2e1   :  { %5646 = vmatprep.subr.bf16.mxu1 %v9630_v3  ;;  %v9691_v42 = vld [vmem:[%s13074_s3 + $0x12c0] ss:$20 sps:$4 sm:$0xff]   ;;  %v9694_v3 = vld [vmem:[%s13074_s3 + $0x12c8] ss:$20 sps:$4 sm:$0xff]  }
 0x2e3   :  { %5319 = vmatpush1.bf16.msra.mxu0 %v9625_v63  ;;  %v9699_v63 = vld [vmem:[%s13074_s3 + $0x12ec] ss:$20 sps:$4 sm:$0xff]  }
 0x2e4   :  { %5647 = vmatpush1.bf16.msra.mxu1 %v9628_v8  ;;  %5320 = vmatprep.subr.bf16.mxu0 %v9633_v6  ;;  %v9702_v8 = vld [vmem:[%s13074_s3 + $0x12f4] ss:$20 sps:$4 sm:$0xff]  }
 0x2e5   :  { %5648 = vmatprep.subr.bf16.mxu1 %v9636_v14  ;;  %v9697_v6 = vld [vmem:[%s13074_s3 + $0x12e8] ss:$20 sps:$4 sm:$0xff]   ;;  %v9700_v14 = vld [vmem:[%s13074_s3 + $0x12f0] ss:$20 sps:$4 sm:$0xff]  }
 0x2e7   :  { %5321 = vmatpush1.bf16.msra.mxu0 %v9631_v43  ;;  %v9705_v43 = vld [vmem:[%s13074_s3 + $0x1314] ss:$20 sps:$4 sm:$0xff]  }
 0x2e8   :  { %5649 = vmatpush1.bf16.msra.mxu1 %v9634_v16  ;;  %5322 = vmatprep.subr.bf16.mxu0 %v9639_v9  ;;  %v9708_v16 = vld [vmem:[%s13074_s3 + $0x131c] ss:$20 sps:$4 sm:$0xff]  }
 0x2e9   :  { %5650 = vmatprep.subr.bf16.mxu1 %v9642_v28  ;;  %v9703_v9 = vld [vmem:[%s13074_s3 + $0x1310] ss:$20 sps:$4 sm:$0xff]   ;;  %v9706_v28 = vld [vmem:[%s13074_s3 + $0x1318] ss:$20 sps:$4 sm:$0xff]  }
 0x2eb   :  { %5323 = vmatpush1.bf16.msra.mxu0 %v9637_v23  ;;  %v9711_v23 = vld [vmem:[%s13074_s3 + $0x133c] ss:$20 sps:$4 sm:$0xff]  }
 0x2ec   :  { %5651 = vmatpush1.bf16.msra.mxu1 %v9640_v29  ;;  %5333 = vmatprep.subr.bf16.mxu0 %v9645_v15  ;;  %v9714_v29 = vld [vmem:[%s13074_s3 + $0x1344] ss:$20 sps:$4 sm:$0xff]  }
 0x2ed   :  { %5661 = vmatprep.subr.bf16.mxu1 %v9648_v51  ;;  %v9709_v15 = vld [vmem:[%s13074_s3 + $0x1338] ss:$20 sps:$4 sm:$0xff]   ;;  %v9712_v51 = vld [vmem:[%s13074_s3 + $0x1340] ss:$20 sps:$4 sm:$0xff]  }
 0x2ee   :  { %5325 = vmatmul.mubr.bf16.vlgmr.msra.gmra.mrb[16].mxu0 %v11995_v2 }
 0x2ef   :  { %5653 = vmatmul.mubr.bf16.vlgmr.msra.gmra.mrb[16].mxu1 %v11995_v2  ;;  %5334 = vmatpush1.bf16.msra.mxu0 %v9643_v0  ;;  %v9717_v0 = vld [vmem:[%s13074_s3 + $0x1364] ss:$20 sps:$4 sm:$0xff]  }
 0x2f0   :  { %8162 = vmatprep.mubr.msk.bf16.mxu0 %vm1206_vm5, %v12005_v5  ;;  %5662 = vmatpush1.bf16.msra.mxu1 %v9646_v58  ;;  %v9720_v58 = vld [vmem:[%s13074_s3 + $0x136c] ss:$20 sps:$4 sm:$0xff]  }
 0x2f1   :  { %8164 = vmatprep.mubr.msk.bf16.mxu1 %vm1206_vm5, %v12005_v5  ;;  %5335 = vmatprep.subr.bf16.mxu0 %v9651_v4  ;;  %v9715_v4 = vld [vmem:[%s13074_s3 + $0x1360] ss:$20 sps:$4 sm:$0xff]  }
 0x2f2   :  { %5663 = vmatprep.subr.bf16.mxu1 %v9654_v40  ;;  %v9718_v40 = vld [vmem:[%s13074_s3 + $0x1368] ss:$20 sps:$4 sm:$0xff]  }
 0x2f3   :  { %5336 = vmatpush1.bf16.msra.mxu0 %v9649_v33  ;;  %v9723_v33 = vld [vmem:[%s13074_s3 + $0x138c] ss:$20 sps:$4 sm:$0xff]  }
 0x2f4   :  { %5664 = vmatpush1.bf16.msra.mxu1 %v9652_v39  ;;  %5337 = vmatprep.subr.bf16.mxu0 %v9657_v50  ;;  %v9726_v39 = vld [vmem:[%s13074_s3 + $0x1394] ss:$20 sps:$4 sm:$0xff]  }
 0x2f5   :  { %5665 = vmatprep.subr.bf16.mxu1 %v9660_v11  ;;  %v9721_v50 = vld [vmem:[%s13074_s3 + $0x1388] ss:$20 sps:$4 sm:$0xff]   ;;  %v9724_v11 = vld [vmem:[%s13074_s3 + $0x1390] ss:$20 sps:$4 sm:$0xff]  }
 0x2f7   :  { %5338 = vmatpush1.bf16.msra.mxu0 %v9655_v52  ;;  %v9729_v52 = vld [vmem:[%s13074_s3 + $0x13b4] ss:$20 sps:$4 sm:$0xff]  }
 0x2f8   :  { %5666 = vmatpush1.bf16.msra.mxu1 %v9658_v26  ;;  %5339 = vmatprep.subr.bf16.mxu0 %v9663_v53  ;;  %v9732_v26 = vld [vmem:[%s13074_s3 + $0x13bc] ss:$20 sps:$4 sm:$0xff]  }
 0x2f9   :  { %5667 = vmatprep.subr.bf16.mxu1 %v9666_v32  ;;  %v9727_v53 = vld [vmem:[%s13074_s3 + $0x13b0] ss:$20 sps:$4 sm:$0xff]  }
 0x2fa   :  { %v9733_v32 = vld [vmem:[%s13074_s3 + $0x13dc] ss:$20 sps:$4 sm:$0x1f]  }
 0x2fb   :  { %5340 = vmatpush1.bf16.msra.mxu0 %v9661_v36  ;;  %v9730_v36 = vld [vmem:[%s13074_s3 + $0x13b8] ss:$20 sps:$4 sm:$0xff]  }
 0x2fc   :  { %5668 = vmatpush1.bf16.msra.mxu1 %v9664_v41  ;;  %5341 = vmatprep.subr.bf16.mxu0 %v9669_v55  ;;  %v9737_v41 = vld [vmem:[%s13074_s3 + $0x13d8] ss:$20 sps:$4 sm:$0x1f]  }
 0x2fd   :  { %5669 = vmatprep.subr.bf16.mxu1 %v9672_v59  ;;  %v9735_v55 = vld [vmem:[%s13074_s3 + $0x13e4] ss:$20 sps:$4 sm:$0x1f]   ;;  %v9738_v59 = vld [vmem:[%s13074_s3 + $0x13e0] ss:$20 sps:$4 sm:$0x1f]  }
 0x2ff   :  { %5342 = vmatpush1.bf16.msra.mxu0 %v9667_v30  ;;  %v5032_v30 = vsel %vm5030_vm8, %v9737_v41, 0  ;;  %v9787_v41 = vld [vmem:[%s13074_s3 + $0x6f0] ss:$20 sps:$4 sm:$0xff]  }
 0x300   :  { %5670 = vmatpush1.bf16.msra.mxu1 %v9670_v18  ;;  %5343 = vmatprep.subr.bf16.mxu0 %v9675_v37  ;;  %v9739_v18 = vld [vmem:[%s13074_s3 + $0x150] ss:$20 sps:$4 sm:$0xff]   ;;  %v5038_v37 = vsel %vm5030_vm8, %v9738_v59, 0 }
 0x301   :  { %5671 = vmatprep.subr.bf16.mxu1 %v9678_v19  ;;  %v9740_v19 = vld [vmem:[%s13074_s3 + $0x3d0] ss:$20 sps:$4 sm:$0xff]  }
 0x302   :  { %v9789_v59 = vld [vmem:[%s13074_s3 + $0x5b0] ss:$20 sps:$4 sm:$0xff]  }
 0x303   :  { %5344 = vmatpush1.bf16.msra.mxu0 %v9673_v56  ;;  %v9741_v56 = vld [vmem:[%s13074_s3 + $0x10] ss:$20 sps:$4 sm:$0xff]  }
 0x304   :  { %5672 = vmatpush1.bf16.msra.mxu1 %v9676_v45  ;;  %5345 = vmatprep.subr.bf16.mxu0 %v9681_v49  ;;  %v12208_v45 = vpack.c.bf16 %v11042_v20, %v11042_v20  ;;  %v9742_v49 = vld [vmem:[%s13074_s3 + $0x290] ss:$20 sps:$4 sm:$0xff]   ;;  %v9745_v20 = vld [vmem:[%s13074_s3 + $0x38] ss:$20 sps:$4 sm:$0xff]  }
 0x305   :  { %5673 = vmatprep.subr.bf16.mxu1 %v9684_v17  ;;  %v9743_v17 = vld [vmem:[%s13074_s3 + $0x178] ss:$20 sps:$4 sm:$0xff]  }
 0x307   :  { %5346 = vmatpush1.bf16.msra.mxu0 %v9679_v24  ;;  %v9746_v24 = vld [vmem:[%s13074_s3 + $0x2b8] ss:$20 sps:$4 sm:$0xff]  }
 0x308   :  { %5674 = vmatpush1.bf16.msra.mxu1 %v9682_v62  ;;  %5347 = vmatprep.subr.bf16.mxu0 %v9687_v12  ;;  %v9747_v62 = vld [vmem:[%s13074_s3 + $0x1a0] ss:$20 sps:$4 sm:$0xff]  }
 0x309   :  { %5675 = vmatprep.subr.bf16.mxu1 %v9690_v44  ;;  %v9748_v12 = vld [vmem:[%s13074_s3 + $0x420] ss:$20 sps:$4 sm:$0xff]  }
 0x30a   :  { %v9750_v44 = vld [vmem:[%s13074_s3 + $0x2e0] ss:$20 sps:$4 sm:$0xff]  }
 0x30b   :  { %5348 = vmatpush1.bf16.msra.mxu0 %v9685_v35  ;;  %v9752_v35 = vld [vmem:[%s13074_s3 + $0x448] ss:$20 sps:$4 sm:$0xff]  }
 0x30c   :  { %5676 = vmatpush1.bf16.msra.mxu1 %v9688_v57  ;;  %5349 = vmatprep.subr.bf16.mxu0 %v9693_v60  ;;  %v9753_v57 = vld [vmem:[%s13074_s3 + $0x88] ss:$20 sps:$4 sm:$0xff]  }
 0x30d   :  { %5677 = vmatprep.subr.bf16.mxu1 %v9696_v31  ;;  %v9754_v60 = vld [vmem:[%s13074_s3 + $0x308] ss:$20 sps:$4 sm:$0xff]   ;;  %v9755_v31 = vld [vmem:[%s13074_s3 + $0x1f0] ss:$20 sps:$4 sm:$0xff]  }
 0x30f   :  { %5350 = vmatpush1.bf16.msra.mxu0 %v9691_v42  ;;  %v9756_v42 = vld [vmem:[%s13074_s3 + $0x470] ss:$20 sps:$4 sm:$0xff]  }
 0x310   :  { %5678 = vmatpush1.bf16.msra.mxu1 %v9694_v3  ;;  %5351 = vmatprep.subr.bf16.mxu0 %v9699_v63  ;;  %v9757_v3 = vld [vmem:[%s13074_s3 + $0xb0] ss:$20 sps:$4 sm:$0xff]  }
 0x311   :  { %5679 = vmatprep.subr.bf16.mxu1 %v9702_v8  ;;  %v9758_v63 = vld [vmem:[%s13074_s3 + $0x330] ss:$20 sps:$4 sm:$0xff]   ;;  %v9759_v8 = vld [vmem:[%s13074_s3 + $0x218] ss:$20 sps:$4 sm:$0xff]  }
 0x313   :  { %5352 = vmatpush1.bf16.msra.mxu0 %v9697_v6  ;;  %v9760_v6 = vld [vmem:[%s13074_s3 + $0x498] ss:$20 sps:$4 sm:$0xff]  }
 0x314   :  { %5680 = vmatpush1.bf16.msra.mxu1 %v9700_v14  ;;  %5353 = vmatprep.subr.bf16.mxu0 %v9705_v43  ;;  %v9761_v14 = vld [vmem:[%s13074_s3 + $0xd8] ss:$20 sps:$4 sm:$0xff]  }
 0x315   :  { %5681 = vmatprep.subr.bf16.mxu1 %v9708_v16  ;;  %v9762_v43 = vld [vmem:[%s13074_s3 + $0x358] ss:$20 sps:$4 sm:$0xff]   ;;  %v9763_v16 = vld [vmem:[%s13074_s3 + $0x240] ss:$20 sps:$4 sm:$0xff]  }
 0x317   :  { %5354 = vmatpush1.bf16.msra.mxu0 %v9703_v9  ;;  %v9764_v9 = vld [vmem:[%s13074_s3 + $0x4c0] ss:$20 sps:$4 sm:$0xff]  }
 0x318   :  { %5682 = vmatpush1.bf16.msra.mxu1 %v9706_v28  ;;  %5355 = vmatprep.subr.bf16.mxu0 %v9711_v23  ;;  %v9765_v28 = vld [vmem:[%s13074_s3 + $0x100] ss:$20 sps:$4 sm:$0xff]  }
 0x319   :  { %5683 = vmatprep.subr.bf16.mxu1 %v9714_v29  ;;  %v9766_v23 = vld [vmem:[%s13074_s3 + $0x380] ss:$20 sps:$4 sm:$0xff]   ;;  %v9767_v29 = vld [vmem:[%s13074_s3 + $0x268] ss:$20 sps:$4 sm:$0xff]  }
 0x31b   :  { %5356 = vmatpush1.bf16.msra.mxu0 %v9709_v15  ;;  %v9768_v15 = vld [vmem:[%s13074_s3 + $0x4e8] ss:$20 sps:$4 sm:$0xff]  }
 0x31c   :  { %5684 = vmatpush1.bf16.msra.mxu1 %v9712_v51  ;;  %5357 = vmatprep.subr.bf16.mxu0 %v9717_v0  ;;  %v9769_v51 = vld [vmem:[%s13074_s3 + $0x128] ss:$20 sps:$4 sm:$0xff]  }
 0x31d   :  { %5685 = vmatprep.subr.bf16.mxu1 %v9720_v58  ;;  %v9770_v0 = vld [vmem:[%s13074_s3 + $0x3a8] ss:$20 sps:$4 sm:$0xff]   ;;  %v9771_v58 = vld [vmem:[%s13074_s3 + $0x650] ss:$20 sps:$4 sm:$0xff]  }
 0x31f   :  { %5358 = vmatpush1.bf16.msra.mxu0 %v9715_v4  ;;  %v9772_v4 = vld [vmem:[%s13074_s3 + $0x8d0] ss:$20 sps:$4 sm:$0xff]  }
 0x320   :  { %5686 = vmatpush1.bf16.msra.mxu1 %v9718_v40  ;;  %5359 = vmatprep.subr.bf16.mxu0 %v9723_v33  ;;  %v9773_v40 = vld [vmem:[%s13074_s3 + $0x510] ss:$20 sps:$4 sm:$0xff]  }
 0x321   :  { %5687 = vmatprep.subr.bf16.mxu1 %v9726_v39  ;;  %v9774_v33 = vld [vmem:[%s13074_s3 + $0x790] ss:$20 sps:$4 sm:$0xff]   ;;  %v9775_v39 = vld [vmem:[%s13074_s3 + $0x678] ss:$20 sps:$4 sm:$0xff]  }
 0x323   :  { %5360 = vmatpush1.bf16.msra.mxu0 %v9721_v50  ;;  %v9776_v50 = vld [vmem:[%s13074_s3 + $0x8f8] ss:$20 sps:$4 sm:$0xff]  }
 0x324   :  { %5688 = vmatpush1.bf16.msra.mxu1 %v9724_v11  ;;  %5361 = vmatprep.subr.bf16.mxu0 %v9729_v52  ;;  %v9777_v11 = vld [vmem:[%s13074_s3 + $0x538] ss:$20 sps:$4 sm:$0xff]  }
 0x325   :  { %5689 = vmatprep.subr.bf16.mxu1 %v9732_v26  ;;  %v9778_v52 = vld [vmem:[%s13074_s3 + $0x7b8] ss:$20 sps:$4 sm:$0xff]   ;;  %v9782_v26 = vld [vmem:[%s13074_s3 + $0x7e0] ss:$20 sps:$4 sm:$0xff]  }
 0x327   :  { %5362 = vmatpush1.bf16.msra.mxu0 %v9727_v53  ;;  %v9784_v53 = vld [vmem:[%s13074_s3 + $0x948] ss:$20 sps:$4 sm:$0xff]  }
 0x328   :  { %5690 = vmatpush1.bf16.msra.mxu1 %v9730_v36  ;;  %8161 = vmatprep.subr.msk.bf16.mxu0 %vm5030_vm8, %v9733_v32  ;;  %v9785_v32 = vld [vmem:[%s13074_s3 + $0x588] ss:$20 sps:$4 sm:$0xff]  }
 0x329   :  { %8163 = vmatprep.subr.msk.bf16.mxu1 %vm5030_vm8, %v9735_v55  ;;  %v9786_v36 = vld [vmem:[%s13074_s3 + $0x808] ss:$20 sps:$4 sm:$0xff]   ;;  %v9788_v55 = vld [vmem:[%s13074_s3 + $0x970] ss:$20 sps:$4 sm:$0xff]  }
 0x32b   :  { %5364 = vmatpush1.bf16.msra.mxu0 %v5032_v30  ;;  %v9790_v30 = vld [vmem:[%s13074_s3 + $0x830] ss:$20 sps:$4 sm:$0xff]  }
 0x32c   :  { %5692 = vmatpush1.bf16.msra.mxu1 %v5038_v37  ;;  %8278 = vmatprep.subr.bf16.mxu0 %v9739_v18  ;;  %v9791_v18 = vld [vmem:[%s13074_s3 + $0x718] ss:$20 sps:$4 sm:$0xff]  }
 0x32d   :  { %8300 = vmatprep.subr.bf16.mxu1 %v9740_v19  ;;  %v9792_v37 = vld [vmem:[%s13074_s3 + $0x998] ss:$20 sps:$4 sm:$0xff]  }
 0x32e   :  { %5366 = vmatmul.mubr.bf16.vlgmr.msra.gmra.mrb[16].mxu0 %v12208_v45  ;;  %v9793_v19 = vld [vmem:[%s13074_s3 + $0x5d8] ss:$20 sps:$4 sm:$0xff]  }
 0x32f   :  { %5694 = vmatmul.mubr.bf16.vlgmr.msra.gmra.mrb[16].mxu1 %v12208_v45  ;;  %8279 = vmatpush3.bf16.msra.mxu0 %v9741_v56  ;;  %v9794_v56 = vld [vmem:[%s13074_s3 + $0x858] ss:$20 sps:$4 sm:$0xff]  }
 0x330   :  { %5734 = vmatprep.mubr.bf16.mxu0 %v10746_v10  ;;  %8301 = vmatpush3.bf16.msra.mxu1 %v9742_v49  ;;  %v9749_v10 = vld [vmem:[%s13074_s3 + $0x60] ss:$20 sps:$4 sm:$0xff]  }
 0x331   :  { %5774 = vmatprep.mubr.bf16.mxu1 %v10804_v22  ;;  %8280 = vmatprep.subr.bf16.mxu0 %v9743_v17  ;;  %v9751_v22 = vld [vmem:[%s13074_s3 + $0x1c8] ss:$20 sps:$4 sm:$0xff]   ;;  %v9795_v49 = vld [vmem:[%s13074_s3 + $0x740] ss:$20 sps:$4 sm:$0xff]  }
 0x332   :  { %8302 = vmatprep.subr.bf16.mxu1 %v9744_v13  ;;  %v9796_v17 = vld [vmem:[%s13074_s3 + $0x9c0] ss:$20 sps:$4 sm:$0xff]  }
 0x333   :  { %8281 = vmatpush3.bf16.msra.mxu0 %v9745_v20  ;;  %v9797_v13 = vld [vmem:[%s13074_s3 + $0x600] ss:$20 sps:$4 sm:$0xff]  }
 0x334   :  { %8303 = vmatpush3.bf16.msra.mxu1 %v9746_v24  ;;  %8282 = vmatprep.subr.bf16.mxu0 %v9747_v62  ;;  %v9798_v20 = vld [vmem:[%s13074_s3 + $0x880] ss:$20 sps:$4 sm:$0xff]   ;;  %v9799_v24 = vld [vmem:[%s13074_s3 + $0x768] ss:$20 sps:$4 sm:$0xff]  }
 0x335   :  { %8304 = vmatprep.subr.bf16.mxu1 %v9748_v12  ;;  %v9800_v62 = vld [vmem:[%s13074_s3 + $0x9e8] ss:$20 sps:$4 sm:$0xff]  }
 0x336   :  { %v9801_v12 = vld [vmem:[%s13074_s3 + $0x628] ss:$20 sps:$4 sm:$0xff]  }
 0x337   :  { %8283 = vmatpush3.bf16.msra.mxu0 %v9749_v10  ;;  %v9802_v10 = vld [vmem:[%s13074_s3 + $0x8a8] ss:$20 sps:$4 sm:$0xff]  }
 0x338   :  { %8305 = vmatpush3.bf16.msra.mxu1 %v9750_v44  ;;  %8284 = vmatprep.subr.bf16.mxu0 %v9751_v22  ;;  %v9803_v44 = vld [vmem:[%s13074_s3 + $0xb50] ss:$20 sps:$4 sm:$0xff]  }
 0x339   :  { %8306 = vmatprep.subr.bf16.mxu1 %v9752_v35  ;;  %v9804_v22 = vld [vmem:[%s13074_s3 + $0xdd0] ss:$20 sps:$4 sm:$0xff]  }
 0x33a   :  { %v9805_v35 = vld [vmem:[%s13074_s3 + $0xa10] ss:$20 sps:$4 sm:$0xff]  }
 0x33b   :  { %8285 = vmatpush3.bf16.msra.mxu0 %v9753_v57  ;;  %v9806_v57 = vld [vmem:[%s13074_s3 + $0xc90] ss:$20 sps:$4 sm:$0xff]  }
 0x33c   :  { %8307 = vmatpush3.bf16.msra.mxu1 %v9754_v60  ;;  %8286 = vmatprep.subr.bf16.mxu0 %v9755_v31  ;;  %v9807_v60 = vld [vmem:[%s13074_s3 + $0xb78] ss:$20 sps:$4 sm:$0xff]  }
 0x33d   :  { %8308 = vmatprep.subr.bf16.mxu1 %v9756_v42  ;;  %v9808_v31 = vld [vmem:[%s13074_s3 + $0xdf8] ss:$20 sps:$4 sm:$0xff]  }
 0x33e   :  { %v9809_v42 = vld [vmem:[%s13074_s3 + $0xa38] ss:$20 sps:$4 sm:$0xff]  }
 0x33f   :  { %8287 = vmatpush3.bf16.msra.mxu0 %v9757_v3  ;;  %v9810_v3 = vld [vmem:[%s13074_s3 + $0xcb8] ss:$20 sps:$4 sm:$0xff]  }
 0x340   :  { %8309 = vmatpush3.bf16.msra.mxu1 %v9758_v63  ;;  %8288 = vmatprep.subr.bf16.mxu0 %v9759_v8  ;;  %v9814_v63 = vld [vmem:[%s13074_s3 + $0xce0] ss:$20 sps:$4 sm:$0xff]   ;;  %v9816_v8 = vld [vmem:[%s13074_s3 + $0xe48] ss:$20 sps:$4 sm:$0xff]  }
 0x341   :  { %8310 = vmatprep.subr.bf16.mxu1 %v9760_v6  ;;  %v9817_v6 = vld [vmem:[%s13074_s3 + $0xa88] ss:$20 sps:$4 sm:$0xff]  }
 0x343   :  { %8289 = vmatpush3.bf16.msra.mxu0 %v9761_v14  ;;  %v9818_v14 = vld [vmem:[%s13074_s3 + $0xd08] ss:$20 sps:$4 sm:$0xff]  }
 0x344   :  { %8311 = vmatpush3.bf16.msra.mxu1 %v9762_v43  ;;  %8290 = vmatprep.subr.bf16.mxu0 %v9763_v16  ;;  %v9819_v43 = vld [vmem:[%s13074_s3 + $0xbf0] ss:$20 sps:$4 sm:$0xff]  }
 0x345   :  { %8312 = vmatprep.subr.bf16.mxu1 %v9764_v9  ;;  %v9820_v16 = vld [vmem:[%s13074_s3 + $0xe70] ss:$20 sps:$4 sm:$0xff]  }
 0x346   :  { %v9821_v9 = vld [vmem:[%s13074_s3 + $0xab0] ss:$20 sps:$4 sm:$0xff]  }
 0x347   :  { %8291 = vmatpush3.bf16.msra.mxu0 %v9765_v28  ;;  %v9822_v28 = vld [vmem:[%s13074_s3 + $0xd30] ss:$20 sps:$4 sm:$0xff]  }
 0x348   :  { %8313 = vmatpush3.bf16.msra.mxu1 %v9766_v23  ;;  %8292 = vmatprep.subr.bf16.mxu0 %v9767_v29  ;;  %v9823_v23 = vld [vmem:[%s13074_s3 + $0xc18] ss:$20 sps:$4 sm:$0xff]  }
 0x349   :  { %8314 = vmatprep.subr.bf16.mxu1 %v9768_v15  ;;  %v9824_v29 = vld [vmem:[%s13074_s3 + $0xe98] ss:$20 sps:$4 sm:$0xff]  }
 0x34a   :  { %v9825_v15 = vld [vmem:[%s13074_s3 + $0xad8] ss:$20 sps:$4 sm:$0xff]  }
 0x34b   :  { %8293 = vmatpush3.bf16.msra.mxu0 %v9769_v51  ;;  %v9826_v51 = vld [vmem:[%s13074_s3 + $0xd58] ss:$20 sps:$4 sm:$0xff]  }
 0x34c   :  { %8315 = vmatpush3.bf16.msra.mxu1 %v9770_v0  ;;  %8322 = vmatprep.subr.bf16.mxu0 %v9771_v58  ;;  %v9827_v0 = vld [vmem:[%s13074_s3 + $0xc40] ss:$20 sps:$4 sm:$0xff]  }
 0x34d   :  { %8344 = vmatprep.subr.bf16.mxu1 %v9772_v4  ;;  %v9828_v58 = vld [vmem:[%s13074_s3 + $0xec0] ss:$20 sps:$4 sm:$0xff]  }
 0x34e   :  { %5735 = vmatmul.mubr.bf16.vlgmr.msra.gmra.mrb[20].mxu0 %v10748_v34  ;;  %v9779_v34 = vld [vmem:[%s13074_s3 + $0x6a0] ss:$20 sps:$4 sm:$0xff]  }
 0x34f   :  { %5775 = vmatmul.mubr.bf16.vlgmr.msra.gmra.mrb[20].mxu1 %v10970_v48  ;;  %8323 = vmatpush3.bf16.msra.mxu0 %v9773_v40  ;;  %v9780_v48 = vld [vmem:[%s13074_s3 + $0x920] ss:$20 sps:$4 sm:$0xff]  }
 0x350   :  { %5814 = vmatprep.mubr.bf16.mxu0 %v10986_v27  ;;  %8345 = vmatpush3.bf16.msra.mxu1 %v9774_v33  ;;  %v9781_v27 = vld [vmem:[%s13074_s3 + $0x560] ss:$20 sps:$4 sm:$0xff]   ;;  %v9831_v33 = vld [vmem:[%s13074_s3 + $0xc68] ss:$20 sps:$4 sm:$0xff]  }
 0x351   :  { %5854 = vmatprep.mubr.bf16.mxu1 %v11186_v38  ;;  %8324 = vmatprep.subr.bf16.mxu0 %v9775_v39  ;;  %v9783_v38 = vld [vmem:[%s13074_s3 + $0x6c8] ss:$20 sps:$4 sm:$0xff]   ;;  %v9829_v4 = vld [vmem:[%s13074_s3 + $0xb00] ss:$20 sps:$4 sm:$0xff]  }
 0x352   :  { %8346 = vmatprep.subr.bf16.mxu1 %v9776_v50  ;;  %v9830_v40 = vld [vmem:[%s13074_s3 + $0xd80] ss:$20 sps:$4 sm:$0xff]   ;;  %v9832_v39 = vld [vmem:[%s13074_s3 + $0xee8] ss:$20 sps:$4 sm:$0xff]  }
 0x353   :  { %8325 = vmatpush3.bf16.msra.mxu0 %v9777_v11  ;;  %v9833_v50 = vld [vmem:[%s13074_s3 + $0xb28] ss:$20 sps:$4 sm:$0xff]  }
 0x354   :  { %8347 = vmatpush3.bf16.msra.mxu1 %v9778_v52  ;;  %8326 = vmatprep.subr.bf16.mxu0 %v9779_v34  ;;  %v9834_v11 = vld [vmem:[%s13074_s3 + $0xda8] ss:$20 sps:$4 sm:$0xff]   ;;  %v9835_v52 = vld [vmem:[%s13074_s3 + $0x1050] ss:$20 sps:$4 sm:$0xff]  }
 0x355   :  { %8348 = vmatprep.subr.bf16.mxu1 %v9780_v48  ;;  %v9836_v34 = vld [vmem:[%s13074_s3 + $0x12d0] ss:$20 sps:$4 sm:$0xff]  }
 0x356   :  { %v9837_v48 = vld [vmem:[%s13074_s3 + $0xf10] ss:$20 sps:$4 sm:$0xff]  }
 0x357   :  { %8327 = vmatpush3.bf16.msra.mxu0 %v9781_v27  ;;  %v9838_v27 = vld [vmem:[%s13074_s3 + $0x1190] ss:$20 sps:$4 sm:$0xff]  }
 0x358   :  { %8349 = vmatpush3.bf16.msra.mxu1 %v9782_v26  ;;  %8328 = vmatprep.subr.bf16.mxu0 %v9783_v38  ;;  %v9839_v26 = vld [vmem:[%s13074_s3 + $0x1078] ss:$20 sps:$4 sm:$0xff]  }
 0x359   :  { %8350 = vmatprep.subr.bf16.mxu1 %v9784_v53  ;;  %v9840_v38 = vld [vmem:[%s13074_s3 + $0x12f8] ss:$20 sps:$4 sm:$0xff]  }
 0x35a   :  { %v9841_v53 = vld [vmem:[%s13074_s3 + $0xf38] ss:$20 sps:$4 sm:$0xff]  }
 0x35b   :  { %8329 = vmatpush3.bf16.msra.mxu0 %v9785_v32  ;;  %v9842_v32 = vld [vmem:[%s13074_s3 + $0x11b8] ss:$20 sps:$4 sm:$0xff]  }
 0x35c   :  { %8351 = vmatpush3.bf16.msra.mxu1 %v9786_v36  ;;  %8330 = vmatprep.subr.bf16.mxu0 %v9787_v41  ;;  %v9846_v36 = vld [vmem:[%s13074_s3 + $0x11e0] ss:$20 sps:$4 sm:$0xff]   ;;  %v9848_v41 = vld [vmem:[%s13074_s3 + $0x1348] ss:$20 sps:$4 sm:$0xff]  }
 0x35d   :  { %8352 = vmatprep.subr.bf16.mxu1 %v9788_v55  ;;  %v9849_v55 = vld [vmem:[%s13074_s3 + $0xf88] ss:$20 sps:$4 sm:$0xff]  }
 0x35f   :  { %8331 = vmatpush3.bf16.msra.mxu0 %v9789_v59  ;;  %v9850_v59 = vld [vmem:[%s13074_s3 + $0x1208] ss:$20 sps:$4 sm:$0xff]  }
 0x360   :  { %8353 = vmatpush3.bf16.msra.mxu1 %v9790_v30  ;;  %8332 = vmatprep.subr.bf16.mxu0 %v9791_v18  ;;  %v9851_v30 = vld [vmem:[%s13074_s3 + $0x10f0] ss:$20 sps:$4 sm:$0xff]  }
 0x361   :  { %8354 = vmatprep.subr.bf16.mxu1 %v9792_v37  ;;  %v9852_v18 = vld [vmem:[%s13074_s3 + $0x1370] ss:$20 sps:$4 sm:$0xff]  }
 0x362   :  { %v9853_v37 = vld [vmem:[%s13074_s3 + $0xfb0] ss:$20 sps:$4 sm:$0xff]  }
 0x363   :  { %8333 = vmatpush3.bf16.msra.mxu0 %v9793_v19  ;;  %v9854_v19 = vld [vmem:[%s13074_s3 + $0x1230] ss:$20 sps:$4 sm:$0xff]  }
 0x364   :  { %8355 = vmatpush3.bf16.msra.mxu1 %v9794_v56  ;;  %8334 = vmatprep.subr.bf16.mxu0 %v9795_v49  ;;  %v9855_v56 = vld [vmem:[%s13074_s3 + $0x1118] ss:$20 sps:$4 sm:$0xff]  }
 0x365   :  { %8356 = vmatprep.subr.bf16.mxu1 %v9796_v17  ;;  %v9856_v49 = vld [vmem:[%s13074_s3 + $0x1398] ss:$20 sps:$4 sm:$0xff]  }
 0x366   :  { %v9857_v17 = vld [vmem:[%s13074_s3 + $0xfd8] ss:$20 sps:$4 sm:$0xff]  }
 0x367   :  { %8335 = vmatpush3.bf16.msra.mxu0 %v9797_v13  ;;  %v9858_v13 = vld [vmem:[%s13074_s3 + $0x1258] ss:$20 sps:$4 sm:$0xff]  }
 0x368   :  { %8357 = vmatpush3.bf16.msra.mxu1 %v9798_v20  ;;  %8336 = vmatprep.subr.bf16.mxu0 %v9799_v24  ;;  %v9859_v20 = vld [vmem:[%s13074_s3 + $0x1140] ss:$20 sps:$4 sm:$0xff]  }
 0x369   :  { %8358 = vmatprep.subr.bf16.mxu1 %v9800_v62  ;;  %v9860_v24 = vld [vmem:[%s13074_s3 + $0x13c0] ss:$20 sps:$4 sm:$0xff]  }
 0x36a   :  { %v9861_v62 = vld [vmem:[%s13074_s3 + $0x1000] ss:$20 sps:$4 sm:$0xff]  }
 0x36b   :  { %8337 = vmatpush3.bf16.msra.mxu0 %v9801_v12  ;;  %v9862_v12 = vld [vmem:[%s13074_s3 + $0x1280] ss:$20 sps:$4 sm:$0xff]  }
 0x36c   :  { %8359 = vmatpush3.bf16.msra.mxu1 %v9802_v10  ;;  %8366 = vmatprep.subr.bf16.mxu0 %v9803_v44  ;;  %v9863_v10 = vld [vmem:[%s13074_s3 + $0x1168] ss:$20 sps:$4 sm:$0xff]  }
 0x36d   :  { %8388 = vmatprep.subr.bf16.mxu1 %v9804_v22  ;;  %v9864_v44 = vld [vmem:[%s13074_s3 + $0x13e8] ss:$20 sps:$4 sm:$0x1f]  }
 0x36e   :  { %5815 = vmatmul.mubr.bf16.vlgmr.msra.gmra.mrb[24].mxu0 %v11179_v47  ;;  %v9811_v47 = vld [vmem:[%s13074_s3 + $0xba0] ss:$20 sps:$4 sm:$0xff]   ;;  %v9865_v22 = vld [vmem:[%s13074_s3 + $0x1028] ss:$20 sps:$4 sm:$0xff]  }
 0x36f   :  { %5855 = vmatmul.mubr.bf16.vlgmr.msra.gmra.mrb[24].mxu1 %v11383_v21  ;;  %8367 = vmatpush3.bf16.msra.mxu0 %v9805_v35  ;;  %v9812_v21 = vld [vmem:[%s13074_s3 + $0xe20] ss:$20 sps:$4 sm:$0xff]   ;;  %v9866_v35 = vld [vmem:[%s13074_s3 + $0x12a8] ss:$20 sps:$4 sm:$0xff]  }
 0x370   :  { %5894 = vmatprep.mubr.bf16.mxu0 %v11393_v54  ;;  %8389 = vmatpush3.bf16.msra.mxu1 %v9806_v57  ;;  %v9813_v54 = vld [vmem:[%s13074_s3 + $0xa60] ss:$20 sps:$4 sm:$0xff]   ;;  %v12607_v57 = vpop.permute.xlu0 %1701 }
 0x371   :  { %5934 = vmatprep.mubr.bf16.mxu1 %v11597_v61  ;;  %8368 = vmatprep.subr.bf16.mxu0 %v9807_v60  ;;  %v9815_v61 = vld [vmem:[%s13074_s3 + $0xbc8] ss:$20 sps:$4 sm:$0xff]  }
 0x372   :  { %8390 = vmatprep.subr.bf16.mxu1 %v9808_v31 }
 0x373   :  { %8369 = vmatpush3.bf16.msra.mxu0 %v9809_v42 }
 0x374   :  { %8391 = vmatpush3.bf16.msra.mxu1 %v9810_v3  ;;  %8370 = vmatprep.subr.bf16.mxu0 %v9811_v47 }
 0x375   :  { %8392 = vmatprep.subr.bf16.mxu1 %v9812_v21 }
 0x377   :  { %8371 = vmatpush3.bf16.msra.mxu0 %v9813_v54 }
 0x378   :  { %8393 = vmatpush3.bf16.msra.mxu1 %v9814_v63  ;;  %8372 = vmatprep.subr.bf16.mxu0 %v9815_v61 }
 0x379   :  { %8394 = vmatprep.subr.bf16.mxu1 %v9816_v8 }
 0x37b   :  { %8373 = vmatpush3.bf16.msra.mxu0 %v9817_v6 }
 0x37c   :  { %8395 = vmatpush3.bf16.msra.mxu1 %v9818_v14  ;;  %8374 = vmatprep.subr.bf16.mxu0 %v9819_v43 }
 0x37d   :  { %8396 = vmatprep.subr.bf16.mxu1 %v9820_v16 }
 0x37f   :  { %8375 = vmatpush3.bf16.msra.mxu0 %v9821_v9 }
 0x380   :  { %8397 = vmatpush3.bf16.msra.mxu1 %v9822_v28  ;;  %8376 = vmatprep.subr.bf16.mxu0 %v9823_v23 }
 0x381   :  { %8398 = vmatprep.subr.bf16.mxu1 %v9824_v29 }
 0x383   :  { %8377 = vmatpush3.bf16.msra.mxu0 %v9825_v15 }
 0x384   :  { %8399 = vmatpush3.bf16.msra.mxu1 %v9826_v51  ;;  %8378 = vmatprep.subr.bf16.mxu0 %v9827_v0 }
 0x385   :  { %8400 = vmatprep.subr.bf16.mxu1 %v9828_v58 }
 0x387   :  { %8379 = vmatpush3.bf16.msra.mxu0 %v9829_v4 }
 0x388   :  { %8401 = vmatpush3.bf16.msra.mxu1 %v9830_v40  ;;  %8380 = vmatprep.subr.bf16.mxu0 %v9831_v33 }
 0x389   :  { %8402 = vmatprep.subr.bf16.mxu1 %v9832_v39 }
 0x38b   :  { %8381 = vmatpush3.bf16.msra.mxu0 %v9833_v50 }
 0x38c   :  { %8403 = vmatpush3.bf16.msra.mxu1 %v9834_v11  ;;  %8410 = vmatprep.subr.bf16.mxu0 %v9835_v52 }
 0x38d   :  { %8432 = vmatprep.subr.bf16.mxu1 %v9836_v34 }
 0x38e   :  { %5895 = vmatmul.mubr.bf16.vlgmr.msra.gmra.mrb[28].mxu0 %v11587_v46  ;;  %v9843_v46 = vld [vmem:[%s13074_s3 + $0x10a0] ss:$20 sps:$4 sm:$0xff]  }
 0x38f   :  { %5935 = vmatmul.mubr.bf16.vlgmr.msra.gmra.mrb[28].mxu1 %v11791_v25  ;;  %8411 = vmatpush3.bf16.msra.mxu0 %v9837_v48  ;;  %v9844_v25 = vld [vmem:[%s13074_s3 + $0x1320] ss:$20 sps:$4 sm:$0xff]  }
 0x390   :  { %5974 = vmatprep.mubr.bf16.mxu0 %v11801_v1  ;;  %8433 = vmatpush3.bf16.msra.mxu1 %v9838_v27  ;;  %v9845_v1 = vld [vmem:[%s13074_s3 + $0xf60] ss:$20 sps:$4 sm:$0xff]  }
 0x391   :  { %8165 = vmatprep.mubr.msk.bf16.mxu1 %vm1206_vm5, %v12005_v5  ;;  %8412 = vmatprep.subr.bf16.mxu0 %v9839_v26  ;;  %v9847_v5 = vld [vmem:[%s13074_s3 + $0x10c8] ss:$20 sps:$4 sm:$0xff]  }
 0x392   :  { %8434 = vmatprep.subr.bf16.mxu1 %v9840_v38 }
 0x393   :  { %8413 = vmatpush3.bf16.msra.mxu0 %v9841_v53 }
 0x394   :  { %8435 = vmatpush3.bf16.msra.mxu1 %v9842_v32  ;;  %8414 = vmatprep.subr.bf16.mxu0 %v9843_v46 }
 0x395   :  { %8436 = vmatprep.subr.bf16.mxu1 %v9844_v25 }
 0x397   :  { %8415 = vmatpush3.bf16.msra.mxu0 %v9845_v1 }
 0x398   :  { %8437 = vmatpush3.bf16.msra.mxu1 %v9846_v36  ;;  %8416 = vmatprep.subr.bf16.mxu0 %v9847_v5 }
 0x399   :  { %8438 = vmatprep.subr.bf16.mxu1 %v9848_v41 }
 0x39b   :  { %8417 = vmatpush3.bf16.msra.mxu0 %v9849_v55 }
 0x39c   :  { %8439 = vmatpush3.bf16.msra.mxu1 %v9850_v59  ;;  %8418 = vmatprep.subr.bf16.mxu0 %v9851_v30 }
 0x39d   :  { %8440 = vmatprep.subr.bf16.mxu1 %v9852_v18 }
 0x39f   :  { %8419 = vmatpush3.bf16.msra.mxu0 %v9853_v37 }
 0x3a0   :  { %8441 = vmatpush3.bf16.msra.mxu1 %v9854_v19  ;;  %8420 = vmatprep.subr.bf16.mxu0 %v9855_v56 }
 0x3a1   :  { %8442 = vmatprep.subr.bf16.mxu1 %v9856_v49 }
 0x3a3   :  { %8421 = vmatpush3.bf16.msra.mxu0 %v9857_v17 }
 0x3a4   :  { %8443 = vmatpush3.bf16.msra.mxu1 %v9858_v13  ;;  %8422 = vmatprep.subr.bf16.mxu0 %v9859_v20 }
 0x3a5   :  { %8444 = vmatprep.subr.bf16.mxu1 %v9860_v24 }
 0x3a7   :  { %8423 = vmatpush3.bf16.msra.mxu0 %v9861_v62 }
 0x3a8   :  { %8445 = vmatpush3.bf16.msra.mxu1 %v9862_v12  ;;  %8424 = vmatprep.subr.bf16.mxu0 %v9863_v10 }
 0x3a9   :  { %8648 = vmatprep.subr.msk.bf16.mxu1 %vm5030_vm8, %v9864_v44  ;;  %vm7085_vm8 = vcmask 1046528  }
 0x3ab   :  { %8425 = vmatpush3.bf16.msra.mxu0 %v9865_v22 }
 0x3ac   :  { %8447 = vmatpush3.bf16.msra.mxu1 %v9866_v35 }
 0x3ae   :  { %5975 = vmatmul.mubr.bf16.vlgmr.msra.gmra.mrb[32].mxu0 %v11995_v2 }
 0x3af   :  { %6015 = vmatmul.mubr.bf16.vlgmr.msra.gmra.mrb[32].mxu1 %v12208_v45  ;;  %6256 = vmatprep.mubr.bf16.mxu0 %v10005_v7 }
 0x3b0   :  { %6299 = vmatprep.mubr.bf16.mxu1 %v10005_v7 }
 0x401   :  { %v5367_v60 = vpop.f32.mrb[16].mxu0 }
 0x402   :  { %v8576_v31 = vadd.f32 %v5367_v60, %v12607_v57  ;;  %v5695_v42 = vpop.f32.mrb[16].mxu1  ;;  %v5369_v3 = vpop.f32.mrb[17].mxu0 }
 0x403   :  { %v8578_v47 = vadd.f32 %v5695_v42, %v12607_v57  ;;  %v8577_v21 = vadd.f32 %v5369_v3, %v12607_v57  ;;  %v12612_v54 = vpop.f32.mrb[17].mxu1  ;;  %v5371_v2 = vpop.f32.mrb[18].mxu0 }
 0x404   :  { %vm6022_vm9 = vcmp.gt.f32.partialorder %v8576_v31, 0.0  ;;  %v6027_v45 = vmul.f32 0.01, %v8576_v31  ;;  %v5699_v63 = vpop.f32.mrb[18].mxu1  ;;  %v5372_v61 = vpop.f32.mrb[19].mxu0 }
 0x405   :  { %vm6024_vm10 = vcmp.gt.f32.partialorder %v8578_v47, 0.0  ;;  %v6029_v8 = vmul.f32 0.01, %v8578_v47  ;;  %vm6023_vm11 = vcmp.gt.f32.partialorder %v8577_v21, 0.0  ;;  %v6028_v6 = vmul.f32 0.01, %v8577_v21 }
 0x406   :  { %v12614_v14 = vsel %vm6022_vm9, %v8576_v31, %v6027_v45  ;;  %v5700_v43 = vpop.f32.mrb[19].mxu1  ;;  %v8579_v31 = vadd.f32 %v12612_v54, %v12607_v57 }
 0x407   :  { %v12616_v16 = vsel %vm6024_vm10, %v8578_v47, %v6029_v8  ;;  %v12618_v9 = vsel %vm6023_vm11, %v8577_v21, %v6028_v6  ;;  %6128 = vrot.lane.b32.xlu0 %v12614_v14, %s10000_s9  ;;  %6109 = vrot.lane.b32.xlu1 %v12614_v14, %s10001_s10  ;;  %vm7273_vm11 = vcmask 965632  }
 0x408   :  { %v8875_v28 = vpack.i.bf16 %v12616_v16, %v12618_v9  ;;  %v8885_v23 = vpack.i.bf16 %v12618_v9, %v12614_v14  ;;  %vm6025_vm12 = vcmp.gt.f32.partialorder %v8579_v31, 0.0 }
 0x40b   :  { %8876 = vrot.lane.b32.xlu0 %v8875_v28, %s10000_s9  ;;  %6147 = vrot.lane.b32.xlu1 %v12614_v14, %s10002_s11 }
 0x40f   :  { %8886 = vrot.lane.b32.xlu0 %v8885_v23, %s10004_s13  ;;  %8871 = vrot.lane.b32.xlu1 %v8875_v28, %s10001_s10 }
 0x413   :  { %8881 = vrot.lane.b32.xlu1 %v8875_v28, %s10002_s11 }
 0x417   :  { %6170 = vrot.lane.b32.xlu1 %v12616_v16, %s10004_s13 }
 0x421   :  { %v8294_v29 = vpop.f32.mrb[20].mxu0 }
 0x422   :  { %v8316_v15 = vpop.f32.mrb[20].mxu1  ;;  %v8295_v51 = vpop.f32.mrb[21].mxu0 }
 0x423   :  { %v8296_v0 = vadd.f32 %v8295_v51, %v8294_v29  ;;  %v8317_v58 = vpop.f32.mrb[21].mxu1  ;;  %v8297_v4 = vpop.f32.mrb[22].mxu0 }
 0x424   :  { %v8318_v40 = vadd.f32 %v8317_v58, %v8316_v15  ;;  %v8319_v33 = vpop.f32.mrb[22].mxu1  ;;  %v8298_v39 = vpop.f32.mrb[23].mxu0 }
 0x425   :  { %v5737_v50 = vadd.f32 %v8296_v0, %v12607_v57  ;;  %v8320_v11 = vpop.f32.mrb[23].mxu1  ;;  %v6030_v33 = vmul.f32 0.01, %v8579_v31 }
 0x427   :  { %v5777_v52 = vadd.f32 %v8318_v40, %v5737_v50 }
 0x441   :  { %v8338_v34 = vpop.f32.mrb[24].mxu0 }
 0x442   :  { %v8360_v48 = vpop.f32.mrb[24].mxu1  ;;  %v8339_v27 = vpop.f32.mrb[25].mxu0 }
 0x443   :  { %v8340_v26 = vadd.f32 %v8339_v27, %v8338_v34  ;;  %v8361_v38 = vpop.f32.mrb[25].mxu1  ;;  %v8341_v53 = vpop.f32.mrb[26].mxu0 }
 0x444   :  { %v8362_v32 = vadd.f32 %v8361_v38, %v8360_v48  ;;  %v8363_v46 = vpop.f32.mrb[26].mxu1  ;;  %v8342_v25 = vpop.f32.mrb[27].mxu0  ;;  %v6035_v53 = vsel %vm6025_vm12, %v8579_v31, %v6030_v33  ;;  %v9883_v33 = vld [vmem:[%s13076_s4 + $0x50] ss:$8 sps:$4 sm:$0xff]  }
 0x445   :  { %v5817_v1 = vadd.f32 %v8340_v26, %v5777_v52  ;;  %v8364_v36 = vpop.f32.mrb[27].mxu1 }
 0x447   :  { %v5857_v5 = vadd.f32 %v8362_v32, %v5817_v1 }
 0x461   :  { %v8382_v41 = vpop.f32.mrb[28].mxu0 }
 0x462   :  { %v8404_v55 = vpop.f32.mrb[28].mxu1  ;;  %v8383_v59 = vpop.f32.mrb[29].mxu0 }
 0x463   :  { %v8384_v30 = vadd.f32 %v8383_v59, %v8382_v41  ;;  %v8405_v18 = vpop.f32.mrb[29].mxu1  ;;  %v8385_v37 = vpop.f32.mrb[30].mxu0  ;;  %v10007_v41 = vmov 0.0  }
 0x464   :  { %v8406_v19 = vadd.f32 %v8405_v18, %v8404_v55  ;;  %v8407_v56 = vpop.f32.mrb[30].mxu1  ;;  %v8386_v49 = vpop.f32.mrb[31].mxu0  ;;  %v39_v55 = vld [vmem:[%s13075_s2 + $0x10] sm:$0xff] }
 0x465   :  { %v5897_v17 = vadd.f32 %v8384_v30, %v5857_v5  ;;  %v8408_v13 = vpop.f32.mrb[31].mxu1  ;;  %v9867_v5 = vld [vmem:[%s13073_s1 + $0x8] sm:$0xff]  }
 0x467   :  { %v5937_v20 = vadd.f32 %v8406_v19, %v5897_v17 }
 0x479   :  { %v6129_v24 = vpop.permute.xlu0 %6128  ;;  %v6110_v62 = vpop.permute.xlu1 %6109 }
 0x47d   :  { %v12637_v12 = vpop.permute.xlu0 %8876  ;;  %v6148_v10 = vpop.permute.xlu1 %6147 }
 0x47e   :  { %v8879_v2 = vunpack.i.h.bf16 %v12637_v12  ;;  %v8878_v45 = vunpack.i.l.bf16 %v12637_v12 }
 0x480   :  { %v6138_v39 = vsel %vm950_vm2, %v6129_v24, %v8878_v45 }
 0x481   :  { %v8426_v44 = vpop.f32.mrb[32].mxu0  ;;  %v8887_v22 = vpop.permute.xlu0 %8886 }
 0x482   :  { %v8448_v35 = vpop.f32.mrb[32].mxu1  ;;  %v12639_v60 = vpop.permute.xlu1 %8871  ;;  %v8889_v43 = vunpack.i.h.bf16 %v8887_v22  ;;  %v8888_v28 = vunpack.i.l.bf16 %v8887_v22 }
 0x483   :  { %v8874_v42 = vunpack.i.h.bf16 %v12639_v60  ;;  %v8873_v3 = vunpack.i.l.bf16 %v12639_v60  ;;  %v8427_v47 = vpop.f32.mrb[33].mxu0  ;;  %v8449_v21 = vpop.f32.mrb[33].mxu1 }
 0x484   :  { %v8428_v63 = vadd.f32 %v8427_v47, %v8426_v44  ;;  %v8450_v61 = vadd.f32 %v8449_v21, %v8448_v35  ;;  %v8429_v8 = vpop.f32.mrb[34].mxu0  ;;  %v8451_v6 = vpop.f32.mrb[34].mxu1  ;;  %v6176_v52 = vsel %vm1078_vm4, %v8888_v28, %v8889_v43 }
 0x485   :  { %v6119_v23 = vsel %vm886_vm0, %v6110_v62, %v8873_v3  ;;  %v8430_v29 = vpop.f32.mrb[35].mxu0  ;;  %v8452_v57 = vpop.f32.mrb[35].mxu1  ;;  %v6120_v54 = vsel %vm886_vm0, %v8873_v3, %v8874_v42  ;;  %v6195_v25 = vpack.c.bf16 %v6176_v52, %v6176_v52  ;;  %v9892_v52 = vld [vmem:[%s13076_s4 + $0x80] ss:$8 sps:$4 sm:$0xff]  }
 0x486   :  { %v6185_v15 = vpack.c.bf16 %v6119_v23, %v12614_v14  ;;  %v5977_v51 = vadd.f32 %v8428_v63, %v5937_v20  ;;  %v12652_v0 = vpop.permute.xlu1 %8881  ;;  %v6186_v58 = vpack.c.bf16 %v6120_v54, %v12618_v9  ;;  %v6139_v14 = vsel %vm950_vm2, %v8878_v45, %v8879_v2  ;;  %v9868_v23 = vld [vmem:[%s13076_s4] ss:$8 sps:$4 sm:$0xff]   ;;  %v9873_v29 = vld [vmem:[%s13076_s4 + $0x14] ss:$8 sps:$4 sm:$0xff]   ;;  %v9871_v57 = vld [vmem:[%s13076_s4 + $0x10] ss:$8 sps:$4 sm:$0xff]  }
 0x487   :  { %v8884_v4 = vunpack.i.h.bf16 %v12652_v0  ;;  %v8883_v40 = vunpack.i.l.bf16 %v12652_v0  ;;  %v6210_v36 = vsel %vm1306_vm6, %v6195_v25, 0  ;;  %v9876_v54 = vld [vmem:[%s13076_s4 + $0x24] ss:$8 sps:$4 sm:$0xff]   ;;  %v9877_v0 = vld [vmem:[%s13076_s4 + $0x30] ss:$8 sps:$4 sm:$0xff]  }
 0x488   :  { %v6017_v50 = vadd.f32 %v8450_v61, %v5977_v51  ;;  %6224 = vmatprep.subr.bf16.mxu0 %v6186_v58  ;;  %v9879_v51 = vld [vmem:[%s13076_s4 + $0x34] ss:$8 sps:$4 sm:$0xff]   ;;  %v9882_v58 = vld [vmem:[%s13076_s4 + $0x44] ss:$8 sps:$4 sm:$0xff]  }
 0x489   :  { %v6157_v11 = vsel %vm1014_vm1, %v6148_v10, %v8883_v40  ;;  %6225 = vmatpush1.bf16.msra.mxu0 %v6185_v15  ;;  %v6158_v9 = vsel %vm1014_vm1, %v8883_v40, %v8884_v4  ;;  %v9874_v15 = vld [vmem:[%s13076_s4 + $0x20] ss:$8 sps:$4 sm:$0xff]   ;;  %v9885_v40 = vld [vmem:[%s13076_s4 + $0x54] ss:$8 sps:$4 sm:$0xff]  }
 0x48a   :  { %vm6026_vm13 = vcmp.gt.f32.partialorder %v6017_v50, 0.0  ;;  %v6031_v34 = vmul.f32 0.01, %v6017_v50  ;;  %v6190_v48 = vpack.c.bf16 %v6157_v11, %v6138_v39  ;;  %v6171_v27 = vpop.permute.xlu1 %6170  ;;  %v6191_v26 = vpack.c.bf16 %v6158_v9, %v6139_v14  ;;  %v9888_v39 = vld [vmem:[%s13076_s4 + $0x64] ss:$8 sps:$4 sm:$0xff]  }
 0x48b   :  { %v6177_v38 = vsel %vm1078_vm4, %v8889_v43, %v6171_v27  ;;  %v9870_v43 = vld [vmem:[%s13076_s4 + $0x4] ss:$8 sps:$4 sm:$0xff]   ;;  %v9891_v11 = vld [vmem:[%s13076_s4 + $0x74] ss:$8 sps:$4 sm:$0xff]   ;;  %v9889_v14 = vld [vmem:[%s13076_s4 + $0x70] ss:$8 sps:$4 sm:$0xff]  }
 0x48c   :  { %v6036_v32 = vsel %vm6026_vm13, %v6017_v50, %v6031_v34  ;;  %v6196_v46 = vpack.c.bf16 %v6177_v38, %v6177_v38  ;;  %6226 = vmatprep.subr.bf16.mxu0 %v6191_v26  ;;  %v9886_v50 = vld [vmem:[%s13076_s4 + $0x60] ss:$8 sps:$4 sm:$0xff]   ;;  %v9894_v9 = vld [vmem:[%s13076_s4 + $0x84] ss:$8 sps:$4 sm:$0xff]   ;;  %v9897_v34 = vld [vmem:[%s13076_s4 + $0x94] ss:$8 sps:$4 sm:$0xff]  }
 0x48d   :  { %6227 = vmatpush1.bf16.msra.mxu0 %v6190_v48  ;;  %v8890_v1 = vpack.i.bf16 %v6036_v32, %v6035_v53  ;;  %v9895_v48 = vld [vmem:[%s13076_s4 + $0x90] ss:$8 sps:$4 sm:$0xff]   ;;  %v9898_v26 = vld [vmem:[%s13076_s4 + $0xa0] ss:$8 sps:$4 sm:$0xff]   ;;  %v9903_v38 = vld [vmem:[%s13076_s4 + $0xb4] ss:$8 sps:$4 sm:$0xff]  }
 0x48e   :  { %8167 = vmatprep.subr.msk.bf16.mxu0 %vm1306_vm6, %v6196_v46  ;;  %v9904_v46 = vld [vmem:[%s13076_s4 + $0xc0] ss:$8 sps:$4 sm:$0xff]   ;;  %v9909_v25 = vld [vmem:[%s13076_s4 + $0xd4] ss:$8 sps:$4 sm:$0xff]  }
 0x48f   :  { %8891 = vrot.lane.b32.xlu0 %v8890_v1, %s10001_s10  ;;  %8896 = vrot.lane.b32.xlu1 %v8890_v1, %s10000_s9 }
 0x491   :  { %6229 = vmatpush1.bf16.msra.mxu0 %v6210_v36  ;;  %v9912_v36 = vld [vmem:[%s13076_s4 + $0xe4] ss:$8 sps:$4 sm:$0xff]  }
 0x492   :  { %8506 = vmatprep.subr.bf16.mxu0 %v10007_v41 }
 0x493   :  { %8901 = vrot.lane.b32.xlu0 %v8890_v1, %s10002_s11  ;;  %8906 = vrot.lane.b32.xlu1 %v8890_v1, %s10004_s13  ;;  %v9907_v1 = vld [vmem:[%s13076_s4 + $0xd0] ss:$8 sps:$4 sm:$0xff]  }
 0x494   :  { %8168 = vmatmul.mubr.msk.bf16.vlgmr.msra.gmra.mrb[36].mxu0 %vm6205_vm14, %v9867_v5 }
 0x495   :  { %8512 = vmatprep.mubr.msk.bf16.mxu0 %vm10008_vm15, %v10007_v41 }
 0x497   :  { %6358 = vperm.xlu0 %8869, %v39_v55   ;;  %v9915_v55 = vld [vmem:[%s13076_s4 + $0xf4] ss:$8 sps:$4 sm:$0xff]  }
 0x501   :  { %v8892_v59 = vpop.permute.xlu0 %8891  ;;  %v8897_v30 = vpop.permute.xlu1 %8896 }
 0x502   :  { %v8894_v18 = vunpack.i.h.bf16 %v8892_v59  ;;  %v8893_v37 = vunpack.i.l.bf16 %v8892_v59  ;;  %v8898_v19 = vunpack.i.l.bf16 %v8897_v30  ;;  %v8899_v17 = vunpack.i.h.bf16 %v8897_v30  ;;  %v9913_v59 = vld [vmem:[%s13076_s4 + $0xf0] ss:$8 sps:$4 sm:$0xff]   ;;  %v9918_v30 = vld [vmem:[%s13076_s4 + $0x104] ss:$8 sps:$4 sm:$0xff]  }
 0x504   :  { %v6189_v56 = vpack.c.bf16 %v8894_v18, %v6036_v32  ;;  %v6121_v49 = vsel %vm886_vm0, %v8874_v42, %v8893_v37  ;;  %v6122_v13 = vsel %vm886_vm0, %v8893_v37, %v8894_v18  ;;  %v6140_v3 = vsel %vm950_vm2, %v8879_v2, %v8898_v19  ;;  %v9906_v32 = vld [vmem:[%s13076_s4 + $0xc4] ss:$8 sps:$4 sm:$0xff]  }
 0x505   :  { %v6187_v20 = vpack.c.bf16 %v6121_v49, %v12616_v16  ;;  %v8902_v24 = vpop.permute.xlu0 %8901  ;;  %v8907_v62 = vpop.permute.xlu1 %8906  ;;  %v6188_v10 = vpack.c.bf16 %v6122_v13, %v6035_v53  ;;  %v6141_v47 = vsel %vm950_vm2, %v8898_v19, %v8899_v17  ;;  %v9901_v53 = vld [vmem:[%s13076_s4 + $0xb0] ss:$8 sps:$4 sm:$0xff]   ;;  %v9916_v13 = vld [vmem:[%s13076_s4 + $0x100] ss:$8 sps:$4 sm:$0xff]  }
 0x506   :  { %v8904_v44 = vunpack.i.h.bf16 %v8902_v24  ;;  %v8903_v22 = vunpack.i.l.bf16 %v8902_v24  ;;  %v8909_v35 = vunpack.i.h.bf16 %v8907_v62  ;;  %v8908_v31 = vunpack.i.l.bf16 %v8907_v62  ;;  %8507 = vmatpush3.bf16.msra.mxu0 %v6189_v56  ;;  %v9919_v24 = vld [vmem:[%s13076_s4 + $0x110] ss:$8 sps:$4 sm:$0xff]   ;;  %v9924_v62 = vld [vmem:[%s13076_s4 + $0x124] ss:$8 sps:$4 sm:$0xff]  }
 0x507   :  { %6267 = vmatprep.subr.bf16.mxu1 %v6188_v10  ;;  %8508 = vmatprep.subr.bf16.mxu0 %v10007_v41  ;;  %v9922_v10 = vld [vmem:[%s13076_s4 + $0x120] ss:$8 sps:$4 sm:$0xff]  }
 0x508   :  { %v6159_v60 = vsel %vm1014_vm1, %v8884_v4, %v8903_v22  ;;  %v6194_v16 = vpack.c.bf16 %v8904_v44, %v8899_v17  ;;  %v6199_v42 = vpack.c.bf16 %v8909_v35, %v8909_v35  ;;  %6268 = vmatpush1.bf16.msra.mxu1 %v6187_v20  ;;  %v6179_v45 = vsel %vm1078_vm4, %v8908_v31, %v8909_v35  ;;  %v9880_v4 = vld [vmem:[%s13076_s4 + $0x40] ss:$8 sps:$4 sm:$0xff]   ;;  %v9921_v20 = vld [vmem:[%s13076_s4 + $0x114] ss:$8 sps:$4 sm:$0xff]   ;;  %v9930_v35 = vld [vmem:[%s13076_s4 + $0x144] ss:$8 sps:$4 sm:$0xff]  }
 0x509   :  { %v6192_v21 = vpack.c.bf16 %v6159_v60, %v6140_v3  ;;  %v6160_v63 = vsel %vm1014_vm1, %v8903_v22, %v8904_v44  ;;  %v6178_v12 = vsel %vm1078_vm4, %v6171_v27, %v8908_v31  ;;  %v6198_v61 = vpack.c.bf16 %v6179_v45, %v6179_v45  ;;  %v9900_v27 = vld [vmem:[%s13076_s4 + $0xa4] ss:$8 sps:$4 sm:$0xff]   ;;  %v9927_v44 = vld [vmem:[%s13076_s4 + $0x134] ss:$8 sps:$4 sm:$0xff]   ;;  %v9925_v22 = vld [vmem:[%s13076_s4 + $0x130] ss:$8 sps:$4 sm:$0xff]  }
 0x50a   :  { %8509 = vmatpush3.bf16.msra.mxu0 %v6194_v16  ;;  %v6193_v2 = vpack.c.bf16 %v6160_v63, %v6141_v47  ;;  %v6197_v8 = vpack.c.bf16 %v6178_v12, %v6178_v12  ;;  %v6222_v6 = vsel %vm1306_vm6, %v6199_v42, 0  ;;  %v40_v31 = vld [vmem:[%s13075_s2 + $0x18] sm:$0xff]  ;;  %v9928_v3 = vld [vmem:[%s13076_s4 + $0x140] ss:$8 sps:$4 sm:$0xff]   ;;  %v9936_v42 = vld [vmem:[%s13076_s4 + $0x164] ss:$8 sps:$4 sm:$0xff]  }
 0x50b   :  { %8510 = vmatprep.subr.bf16.mxu0 %v10007_v41  ;;  %6363 = vperm.xlu1 %8910, %v40_v31   ;;  %v9933_v60 = vld [vmem:[%s13076_s4 + $0x154] ss:$8 sps:$4 sm:$0xff]   ;;  %v9931_v16 = vld [vmem:[%s13076_s4 + $0x150] ss:$8 sps:$4 sm:$0xff]   ;;  %v9934_v47 = vld [vmem:[%s13076_s4 + $0x160] ss:$8 sps:$4 sm:$0xff]  }
 0x50c   :  { %6269 = vmatprep.subr.bf16.mxu1 %v6193_v2  ;;  %v6216_v28 = vsel %vm1306_vm6, %v6197_v8, 0  ;;  %v9937_v45 = vld [vmem:[%s13076_s4 + $0x170] ss:$8 sps:$4 sm:$0xff]   ;;  %v9942_v63 = vld [vmem:[%s13076_s4 + $0x184] ss:$8 sps:$4 sm:$0xff]   ;;  %vm6705_vm1 = vcmask 1041408  }
 0x50d   :  { %6270 = vmatpush1.bf16.msra.mxu1 %v6192_v21  ;;  %v9939_v21 = vld [vmem:[%s13076_s4 + $0x174] ss:$8 sps:$4 sm:$0xff]   ;;  %v9940_v12 = vld [vmem:[%s13076_s4 + $0x180] ss:$8 sps:$4 sm:$0xff]   ;;  %v9948_v8 = vld [vmem:[%s13076_s4 + $0x1a4] ss:$8 sps:$4 sm:$0xff]  }
 0x50e   :  { %8169 = vmatprep.subr.msk.bf16.mxu1 %vm1306_vm6, %v6198_v61  ;;  %8511 = vmatpush3.bf16.msra.mxu0 %v6222_v6  ;;  %v9945_v2 = vld [vmem:[%s13076_s4 + $0x194] ss:$8 sps:$4 sm:$0xff]   ;;  %v9943_v61 = vld [vmem:[%s13076_s4 + $0x190] ss:$8 sps:$4 sm:$0xff]   ;;  %v9946_v6 = vld [vmem:[%s13076_s4 + $0x1a0] ss:$8 sps:$4 sm:$0xff]  }
 0x50f   :  { %v41_v31 = vld [vmem:[%s13075_s2 + $0x20] sm:$0xff] }
 0x511   :  { %6272 = vmatpush1.bf16.msra.mxu1 %v6216_v28  ;;  %8513 = vmatmul.mubr.msk.bf16.vlgmr.msra.gmra.mrb[40].mxu0 %vm6205_vm14, %v9867_v5  ;;  %v9949_v28 = vld [vmem:[%s13076_s4 + $0x1b0] ss:$8 sps:$4 sm:$0xff]  }
 0x512   :  { %6712 = vmatprep.subr.bf16.mxu1 %v9870_v43  ;;  %6964 = vmatprep.mubr.bf16.mxu0 %v10005_v7  ;;  %v9951_v43 = vld [vmem:[%s13076_s4 + $0x1b4] ss:$8 sps:$4 sm:$0xff]  }
 0x514   :  { %8170 = vmatmul.mubr.msk.bf16.vlgmr.msra.gmra.mrb[36].mxu1 %vm6205_vm14, %v9867_v5  ;;  %v9910_v5 = vld [vmem:[%s13076_s4 + $0xe0] ss:$8 sps:$4 sm:$0xff]   ;;  %vm7380_vm14 = vcmask 916480  }
 0x515   :  { %6713 = vmatpush1.bf16.msra.mxu1 %v9868_v23  ;;  %v9954_v23 = vld [vmem:[%s13076_s4 + $0x1c4] ss:$8 sps:$4 sm:$0xff]  }
 0x516   :  { %6714 = vmatprep.subr.bf16.mxu1 %v9873_v29  ;;  %v9952_v29 = vld [vmem:[%s13076_s4 + $0x1c0] ss:$8 sps:$4 sm:$0xff]  }
 0x519   :  { %6715 = vmatpush1.bf16.msra.mxu1 %v9871_v57  ;;  %v9957_v57 = vld [vmem:[%s13076_s4 + $0x1d4] ss:$8 sps:$4 sm:$0xff]  }
 0x51a   :  { %6716 = vmatprep.subr.bf16.mxu1 %v9876_v54  ;;  %v9955_v54 = vld [vmem:[%s13076_s4 + $0x1d0] ss:$8 sps:$4 sm:$0xff]  }
 0x51d   :  { %6717 = vmatpush1.bf16.msra.mxu1 %v9874_v15  ;;  %v9960_v15 = vld [vmem:[%s13076_s4 + $0x1e4] ss:$8 sps:$4 sm:$0xff]  }
 0x51e   :  { %6718 = vmatprep.subr.bf16.mxu1 %v9879_v51  ;;  %v9958_v51 = vld [vmem:[%s13076_s4 + $0x1e0] ss:$8 sps:$4 sm:$0xff]  }
 0x521   :  { %6719 = vmatpush1.bf16.msra.mxu1 %v9877_v0  ;;  %v9963_v0 = vld [vmem:[%s13076_s4 + $0x1f4] ss:$8 sps:$4 sm:$0xff]  }
 0x522   :  { %6720 = vmatprep.subr.bf16.mxu1 %v9882_v58  ;;  %v9961_v58 = vld [vmem:[%s13076_s4 + $0x1f0] ss:$8 sps:$4 sm:$0xff]  }
 0x525   :  { %6721 = vmatpush1.bf16.msra.mxu1 %v9880_v4  ;;  %v9966_v4 = vld [vmem:[%s13076_s4 + $0x204] ss:$8 sps:$4 sm:$0xff]  }
 0x526   :  { %6722 = vmatprep.subr.bf16.mxu1 %v9885_v40 }
 0x529   :  { %6723 = vmatpush1.bf16.msra.mxu1 %v9883_v33 }
 0x52a   :  { %6724 = vmatprep.subr.bf16.mxu1 %v9888_v39 }
 0x52d   :  { %6725 = vmatpush1.bf16.msra.mxu1 %v9886_v50 }
 0x52e   :  { %6726 = vmatprep.subr.bf16.mxu1 %v9891_v11 }
 0x531   :  { %6727 = vmatpush1.bf16.msra.mxu1 %v9889_v14 }
 0x532   :  { %6728 = vmatprep.subr.bf16.mxu1 %v9894_v9 }
 0x535   :  { %6729 = vmatpush1.bf16.msra.mxu1 %v9892_v52 }
 0x536   :  { %6730 = vmatprep.subr.bf16.mxu1 %v9897_v34  ;;  %v6103_v34 = vld [vmem:[%s13076_s4 + $0x210] sm:$0x33] }
 0x539   :  { %6731 = vmatpush1.bf16.msra.mxu1 %v9895_v48 }
 0x53a   :  { %6732 = vmatprep.subr.bf16.mxu1 %v9900_v27 }
 0x53d   :  { %6733 = vmatpush1.bf16.msra.mxu1 %v9898_v26 }
 0x53e   :  { %6734 = vmatprep.subr.bf16.mxu1 %v9903_v38  ;;  %v9964_v38 = vld [vmem:[%s13076_s4 + $0x200] ss:$8 sps:$4 sm:$0xff]  }
 0x541   :  { %6735 = vmatpush1.bf16.msra.mxu1 %v9901_v53  ;;  %v8239_v53 = vcombine.high %v6103_v34, %v6103_v34 }
 0x542   :  { %6736 = vmatprep.subr.bf16.mxu1 %v9906_v32  ;;  %v8238_v32 = vcombine.low %v6103_v34, %v6103_v34  ;;  %v9980_v34 = vld [vmem:[%s13077_s5 + $0x68] sm:$0xff]  }
 0x545   :  { %6737 = vmatpush1.bf16.msra.mxu1 %v9904_v46  ;;  %v6707_v46 = vsel %vm6705_vm1, %v8238_v32, 0 }
 0x546   :  { %6738 = vmatprep.subr.bf16.mxu1 %v9909_v25  ;;  %v6359_v25 = vpop.permute.xlu0 %6358 }
 0x549   :  { %6739 = vmatpush1.bf16.msra.mxu1 %v9907_v1 }
 0x54a   :  { %6740 = vmatprep.subr.bf16.mxu1 %v9912_v36 }
 0x54d   :  { %6741 = vmatpush1.bf16.msra.mxu1 %v9910_v5 }
 0x54e   :  { %6742 = vmatprep.subr.bf16.mxu1 %v9915_v55 }
 0x551   :  { %6743 = vmatpush1.bf16.msra.mxu1 %v9913_v59 }
 0x552   :  { %6755 = vmatprep.subr.bf16.mxu1 %v9918_v30 }
 0x567   :  { %v6258_v18 = vpop.f32.mrb[36].mxu0 }
 0x568   :  { %v6260_v37 = vpop.f32.mrb[37].mxu0 }
 0x569   :  { %v6262_v19 = vpop.f32.mrb[38].mxu0 }
 0x56a   :  { %v6351_v56 = vpack.c.bf16 %v6262_v19, %v6258_v18  ;;  %v6264_v49 = vpop.f32.mrb[39].mxu0 }
 0x56b   :  { %v6352_v17 = vpack.c.bf16 %v6264_v49, %v6260_v37 }
 0x56d   :  { %6744 = vmatprep.mubr.bf16.mxu1 %v6352_v17 }
 0x56e   :  { %6745 = vmatmul.mubr.bf16.vlgmr.msra.gmra.mrb[40].mxu1 %v6351_v56 }
 0x56f   :  { %6756 = vmatpush1.bf16.msra.mxu1 %v9916_v13 }
 0x570   :  { %6757 = vmatprep.subr.bf16.mxu1 %v9921_v20 }
 0x573   :  { %6758 = vmatpush1.bf16.msra.mxu1 %v9919_v24 }
 0x574   :  { %6759 = vmatprep.subr.bf16.mxu1 %v9924_v62 }
 0x577   :  { %6760 = vmatpush1.bf16.msra.mxu1 %v9922_v10 }
 0x578   :  { %6761 = vmatprep.subr.bf16.mxu1 %v9927_v44 }
 0x57b   :  { %6762 = vmatpush1.bf16.msra.mxu1 %v9925_v22 }
 0x57c   :  { %6763 = vmatprep.subr.bf16.mxu1 %v9930_v35 }
 0x57f   :  { %6764 = vmatpush1.bf16.msra.mxu1 %v9928_v3  ;;  %v42_v3 = vld [vmem:[%s13075_s2 + $0x28] sm:$0xff] }
 0x580   :  { %6765 = vmatprep.subr.bf16.mxu1 %v9933_v60 }
 0x583   :  { %6766 = vmatpush1.bf16.msra.mxu1 %v9931_v16 }
 0x584   :  { %6767 = vmatprep.subr.bf16.mxu1 %v9936_v42 }
 0x587   :  { %6768 = vmatpush1.bf16.msra.mxu1 %v9934_v47 }
 0x588   :  { %6769 = vmatprep.subr.bf16.mxu1 %v9939_v21 }
 0x58a   :  { %v6364_v36 = vpop.permute.xlu1 %6363 }
 0x58b   :  { %6770 = vmatpush1.bf16.msra.mxu1 %v9937_v45 }
 0x58c   :  { %6771 = vmatprep.subr.bf16.mxu1 %v9942_v63 }
 0x58f   :  { %6772 = vmatpush1.bf16.msra.mxu1 %v9940_v12 }
 0x590   :  { %6773 = vmatprep.subr.bf16.mxu1 %v9945_v2 }
 0x593   :  { %6774 = vmatpush1.bf16.msra.mxu1 %v9943_v61 }
 0x594   :  { %6775 = vmatprep.subr.bf16.mxu1 %v9948_v8 }
 0x597   :  { %6776 = vmatpush1.bf16.msra.mxu1 %v9946_v6 }
 0x598   :  { %6777 = vmatprep.subr.bf16.mxu1 %v9951_v43 }
 0x59b   :  { %6778 = vmatpush1.bf16.msra.mxu1 %v9949_v28 }
 0x59c   :  { %6779 = vmatprep.subr.bf16.mxu1 %v9954_v23 }
 0x59f   :  { %6780 = vmatpush1.bf16.msra.mxu1 %v9952_v29 }
 0x5a0   :  { %6781 = vmatprep.subr.bf16.mxu1 %v9957_v57 }
 0x5a3   :  { %6782 = vmatpush1.bf16.msra.mxu1 %v9955_v54 }
 0x5a4   :  { %6783 = vmatprep.subr.bf16.mxu1 %v9960_v15 }
 0x5a7   :  { %6784 = vmatpush1.bf16.msra.mxu1 %v9958_v51  ;;  %v9970_v51 = vld [vmem:[%s13077_s5 + $0x40] sm:$0xff]  }
 0x5a8   :  { %6785 = vmatprep.subr.bf16.mxu1 %v9963_v0 }
 0x5ab   :  { %6786 = vmatpush1.bf16.msra.mxu1 %v9961_v58  ;;  %v9969_v58 = vld [vmem:[%s13073_s1 + $0x10] sm:$0xff]  }
 0x5ac   :  { %6798 = vmatprep.subr.bf16.mxu1 %v9966_v4  ;;  %v9971_v4 = vld [vmem:[%s13077_s5] sm:$0xff]  }
 0x5e4   :  { %v6344_v40 = vpop.f32.mrb[40].mxu0 }
 0x5e5   :  { %v8514_v33 = vpop.f32.mrb[41].mxu0 }
 0x5e6   :  { %v6347_v39 = vpop.f32.mrb[42].mxu0  ;;  %v9973_v33 = vld [vmem:[%s13077_s5 + $0x8] sm:$0xff]  }
 0x5e7   :  { %v6301_v50 = vpop.f32.mrb[36].mxu1  ;;  %v6355_v11 = vpack.c.bf16 %v6347_v39, %v6344_v40  ;;  %v8515_v14 = vpop.f32.mrb[43].mxu0  ;;  %v9972_v40 = vld [vmem:[%s13077_s5 + $0x48] sm:$0xff]   ;;  %v9974_v39 = vld [vmem:[%s13077_s5 + $0x50] sm:$0xff]  }
 0x5e8   :  { %v6303_v9 = vpop.f32.mrb[37].mxu1  ;;  %v9977_v14 = vld [vmem:[%s13077_s5 + $0x18] sm:$0xff]  }
 0x5e9   :  { %v6305_v52 = vpop.f32.mrb[38].mxu1 }
 0x5ea   :  { %v6353_v48 = vpack.c.bf16 %v6305_v52, %v6301_v50  ;;  %v6307_v27 = vpop.f32.mrb[39].mxu1  ;;  %v9975_v50 = vld [vmem:[%s13077_s5 + $0x10] sm:$0xff]   ;;  %v9979_v52 = vld [vmem:[%s13077_s5 + $0x20] sm:$0xff]  }
 0x5eb   :  { %v6354_v26 = vpack.c.bf16 %v6307_v27, %v6303_v9  ;;  %v9978_v9 = vld [vmem:[%s13077_s5 + $0x60] sm:$0xff]   ;;  %v9982_v27 = vld [vmem:[%s13077_s5 + $0x70] sm:$0xff]  }
 0x5ed   :  { %6787 = vmatprep.mubr.bf16.mxu1 %v6354_v26  ;;  %v9983_v26 = vld [vmem:[%s13077_s5 + $0x30] sm:$0xff]  }
 0x5ee   :  { %6788 = vmatmul.mubr.bf16.vlgmr.msra.gmra.mrb[40].mxu1 %v6353_v48  ;;  %v9981_v48 = vld [vmem:[%s13077_s5 + $0x28] sm:$0xff]  }
 0x5ef   :  { %6799 = vmatpush1.bf16.msra.mxu1 %v9964_v38  ;;  %6830 = vmatprep.mubr.bf16.mxu1 %v10005_v7  ;;  %v9984_v38 = vld [vmem:[%s13077_s5 + $0x78] sm:$0x7f]  }
 0x5f0   :  { %8240 = vmatprep.subr.msk.bf16.mxu1 %vm6705_vm1, %v8239_v53  ;;  %v9985_v53 = vld [vmem:[%s13077_s5 + $0x38] sm:$0xff]   ;;  %vm7455_vm1 = vcmask 1040384  }
 0x5f3   :  { %6801 = vmatpush1.bf16.msra.mxu1 %v6707_v46 }
 0x5fa   :  { %8241 = vmatmul.mubr.msk.bf16.vlgmr.msra.gmra.mrb[40].mxu1 %vm6701_vm3, %v6355_v11  ;;  %v9976_v11 = vld [vmem:[%s13077_s5 + $0x58] sm:$0xff]   ;;  %vm7499_vm3 = vcmask 59392  }
 0x6cd   :  { %v6832_v1 = vpop.f32.mrb[40].mxu1 }
 0x6ce   :  { %v8580_v5 = vadd.f32 %v6832_v1, %v6359_v25  ;;  %v6834_v55 = vpop.f32.mrb[41].mxu1 }
 0x6cf   :  { %v8581_v59 = vadd.f32 %v6834_v55, %v6359_v25  ;;  %v6836_v30 = vpop.f32.mrb[42].mxu1 }
 0x6d0   :  { %vm6841_vm4 = vcmp.gt.f32.partialorder %v8580_v5, 0.0  ;;  %v6845_v18 = vmul.f32 0.01, %v8580_v5  ;;  %v8582_v37 = vadd.f32 %v6836_v30, %v6364_v36  ;;  %v6838_v19 = vpop.f32.mrb[43].mxu1 }
 0x6d1   :  { %vm6842_vm5 = vcmp.gt.f32.partialorder %v8581_v59, 0.0  ;;  %v6846_v56 = vmul.f32 0.01, %v8581_v59  ;;  %v8583_v49 = vadd.f32 %v6838_v19, %v6364_v36 }
 0x6d2   :  { %v6849_v7 = vsel %vm6841_vm4, %v8580_v5, %v6845_v18  ;;  %vm6843_vm6 = vcmp.gt.f32.partialorder %v8582_v37, 0.0  ;;  %v6847_v17 = vmul.f32 0.01, %v8582_v37 }
 0x6d3   :  { %v6850_v13 = vsel %vm6842_vm5, %v8581_v59, %v6846_v56  ;;  %vm6844_vm7 = vcmp.gt.f32.partialorder %v8583_v49, 0.0  ;;  %v6848_v20 = vmul.f32 0.01, %v8583_v49 }
 0x6d4   :  { %v6851_v24 = vsel %vm6843_vm6, %v8582_v37, %v6847_v17  ;;  %v8911_v62 = vpack.i.bf16 %v6850_v13, %v6849_v7 }
 0x6d5   :  { %v6917_v10 = vpack.c.bf16 %v6851_v24, %v6849_v7  ;;  %v6852_v44 = vsel %vm6844_vm7, %v8583_v49, %v6848_v20 }
 0x6d6   :  { %8912 = vrot.lane.b32.xlu0 %v8911_v62, %s10001_s10  ;;  %v8921_v22 = vpack.i.bf16 %v6852_v44, %v6851_v24  ;;  %v6918_v35 = vpack.c.bf16 %v6852_v44, %v6850_v13 }
 0x6d8   :  { %8922 = vrot.lane.b32.xlu1 %v8921_v22, %s10001_s10  ;;  %6932 = vmatprep.subr.bf16.mxu0 %v6918_v35  ;;  %v43_v35 = vld [vmem:[%s13075_s2 + $0x30] sm:$0xff] }
 0x6d9   :  { %6933 = vmatpush1.bf16.msra.mxu0 %v6917_v10 }
 0x6da   :  { %8917 = vrot.lane.b32.xlu0 %v8911_v62, %s10000_s9 }
 0x6dc   :  { %8927 = vrot.lane.b32.xlu1 %v8921_v22, %s10000_s9  ;;  %v44_v22 = vld [vmem:[%s13075_s2 + $0x38] sm:$0xff] }
 0x6de   :  { %6979 = vperm.xlu0 %8869, %v41_v31  }
 0x6e0   :  { %6984 = vperm.xlu1 %8910, %v42_v3  }
 0x748   :  { %v8913_v60 = vpop.permute.xlu0 %8912 }
 0x749   :  { %v8915_v16 = vunpack.i.h.bf16 %v8913_v60  ;;  %v8914_v42 = vunpack.i.l.bf16 %v8913_v60 }
 0x74a   :  { %v8923_v47 = vpop.permute.xlu1 %8922 }
 0x74b   :  { %v8925_v21 = vunpack.i.h.bf16 %v8923_v47  ;;  %v8924_v45 = vunpack.i.l.bf16 %v8923_v47  ;;  %v6897_v63 = vsel %vm886_vm0, %v8914_v42, %v8915_v16 }
 0x74c   :  { %v8918_v12 = vpop.permute.xlu0 %8917 }
 0x74d   :  { %v6898_v2 = vsel %vm886_vm0, %v8924_v45, %v8925_v21  ;;  %v6920_v61 = vpack.c.bf16 %v8925_v21, %v8915_v16  ;;  %v8920_v8 = vunpack.i.h.bf16 %v8918_v12  ;;  %v8919_v6 = vunpack.i.l.bf16 %v8918_v12  ;;  %v9987_v12 = vld [vmem:[%s13078_s6] sm:$0xff]  }
 0x74e   :  { %v6919_v43 = vpack.c.bf16 %v6898_v2, %v6897_v63  ;;  %v8928_v28 = vpop.permute.xlu1 %8927  ;;  %vm6928_vm0 = vcmask 392192   ;;  %v9986_v63 = vld [vmem:[%s13073_s1 + $0x18] sm:$0xff]   ;;  %v9988_v2 = vld [vmem:[%s13078_s6 + $0x8] sm:$0xff]  }
 0x74f   :  { %v8930_v23 = vunpack.i.h.bf16 %v8928_v28  ;;  %v8929_v29 = vunpack.i.l.bf16 %v8928_v28  ;;  %6934 = vmatprep.subr.bf16.mxu0 %v6920_v61  ;;  %v6911_v57 = vsel %vm950_vm2, %v8919_v6, %v8920_v8  ;;  %v9989_v61 = vld [vmem:[%s13078_s6 + $0x10] sm:$0xff]   ;;  %v9991_v6 = vld [vmem:[%s13078_s6 + $0x20] sm:$0xff]  }
 0x750   :  { %6935 = vmatpush1.bf16.msra.mxu0 %v6919_v43  ;;  %v9992_v43 = vld [vmem:[%s13078_s6 + $0x28] sm:$0xff]   ;;  %v9993_v28 = vld [vmem:[%s13078_s6 + $0x30] sm:$0xff]  }
 0x751   :  { %v6912_v54 = vsel %vm950_vm2, %v8929_v29, %v8930_v23  ;;  %v6922_v15 = vpack.c.bf16 %v8930_v23, %v8920_v8  ;;  %v9990_v8 = vld [vmem:[%s13078_s6 + $0x18] sm:$0xff]  }
 0x752   :  { %v6921_v0 = vpack.c.bf16 %v6912_v54, %v6911_v57  ;;  %v9994_v23 = vld [vmem:[%s13078_s6 + $0x38] ss:$0 sps:$4 sm:$0x77]  }
 0x753   :  { %6936 = vmatprep.subr.bf16.mxu0 %v6922_v15 }
 0x754   :  { %6937 = vmatpush1.bf16.msra.mxu0 %v6921_v0 }
 0x755   :  { %8458 = vmatprep.subr.bf16.mxu0 %v9970_v51 }
 0x757   :  { %8243 = vmatmul.mubr.msk.bf16.vlgmr.msra.gmra.mrb[44].mxu0 %vm6928_vm0, %v9969_v58 }
 0x758   :  { %8459 = vmatpush3.bf16.msra.mxu0 %v9971_v4 }
 0x759   :  { %8460 = vmatprep.subr.bf16.mxu0 %v9972_v40 }
 0x75c   :  { %8461 = vmatpush3.bf16.msra.mxu0 %v9973_v33 }
 0x75d   :  { %8462 = vmatprep.subr.bf16.mxu0 %v9974_v39  ;;  %v6980_v37 = vpop.permute.xlu0 %6979 }
 0x75f   :  { %v6985_v7 = vpop.permute.xlu1 %6984 }
 0x760   :  { %8463 = vmatpush3.bf16.msra.mxu0 %v9975_v50 }
 0x761   :  { %8464 = vmatprep.subr.bf16.mxu0 %v9976_v11 }
 0x764   :  { %8465 = vmatpush3.bf16.msra.mxu0 %v9977_v14 }
 0x765   :  { %8466 = vmatprep.subr.bf16.mxu0 %v9978_v9 }
 0x768   :  { %8467 = vmatpush3.bf16.msra.mxu0 %v9979_v52 }
 0x769   :  { %8468 = vmatprep.subr.bf16.mxu0 %v9980_v34 }
 0x76c   :  { %8469 = vmatpush3.bf16.msra.mxu0 %v9981_v48 }
 0x76d   :  { %8470 = vmatprep.subr.bf16.mxu0 %v9982_v27 }
 0x770   :  { %8471 = vmatpush3.bf16.msra.mxu0 %v9983_v26 }
 0x771   :  { %8649 = vmatprep.subr.msk.bf16.mxu0 %vm7085_vm8, %v9984_v38  ;;  %v45_v38 = vld [vmem:[%s13075_s2 + $0x40] sm:$0xff] }
 0x774   :  { %8473 = vmatpush3.bf16.msra.mxu0 %v9985_v53 }
 0x775   :  { %8516 = vmatprep.subr.bf16.mxu0 %v10007_v41 }
 0x82a   :  { %v6966_v32 = vpop.f32.mrb[44].mxu0 }
 0x82b   :  { %v6968_v46 = vpop.f32.mrb[45].mxu0 }
 0x82c   :  { %v6970_v25 = vpop.f32.mrb[46].mxu0 }
 0x82d   :  { %v6975_v1 = vpack.c.bf16 %v6970_v25, %v6966_v32  ;;  %v6972_v36 = vpop.f32.mrb[47].mxu0 }
 0x82e   :  { %v6976_v5 = vpack.c.bf16 %v6972_v36, %v6968_v46 }
 0x830   :  { %8260 = vmatprep.mubr.msk.bf16.mxu0 %vm950_vm2, %v6976_v5  ;;  %vm7277_vm2 = vcmask 1042432  }
 0x831   :  { %7122 = vmatmul.mubr.bf16.vlgmr.msra.gmra.mrb[48].mxu0 %v6975_v1  ;;  %v7279_v29 = vsel %vm7277_vm2, %v9994_v23, 0 }
 0x832   :  { %8522 = vmatprep.mubr.msk.bf16.mxu0 %vm10008_vm15, %v10007_v41 }
 0x904   :  { %v8474_v55 = vpop.f32.mrb[48].mxu0 }
 0x905   :  { %v8475_v59 = vpop.f32.mrb[49].mxu0 }
 0x906   :  { %v8476_v30 = vadd.f32 %v8475_v59, %v8474_v55  ;;  %v8477_v18 = vpop.f32.mrb[50].mxu0 }
 0x907   :  { %v8478_v19 = vpop.f32.mrb[51].mxu0 }
 0x908   :  { %v7124_v56 = vadd.f32 %v8476_v30, %v6980_v37  ;;  %v8479_v49 = vadd.f32 %v8478_v19, %v8477_v18 }
 0x90a   :  { %v7132_v17 = vmul.f32 0.01, %v7124_v56  ;;  %v7127_v13 = vadd.f32 %v8479_v49, %v6985_v7  ;;  %vm7130_vm9 = vcmp.gt.f32.partialorder %v7124_v56, 0.0 }
 0x90c   :  { %vm7131_vm10 = vcmp.gt.f32.partialorder %v7127_v13, 0.0  ;;  %v7133_v20 = vmul.f32 0.01, %v7127_v13  ;;  %v7134_v24 = vsel %vm7130_vm9, %v7124_v56, %v7132_v17 }
 0x90e   :  { %v7135_v62 = vsel %vm7131_vm10, %v7127_v13, %v7133_v20 }
 0x90f   :  { %v8936_v10 = vpack.i.bf16 %v7135_v62, %v7134_v24  ;;  %v7165_v44 = vpack.c.bf16 %v7135_v62, %v7134_v24 }
 0x911   :  { %8937 = vrot.lane.b32.xlu1 %v8936_v10, %s10000_s9  ;;  %8932 = vrot.lane.b32.xlu0 %v8936_v10, %s10001_s10 }
 0x912   :  { %8517 = vmatpush3.bf16.msra.mxu0 %v7165_v44 }
 0x913   :  { %8518 = vmatprep.subr.bf16.mxu0 %v10007_v41 }
 0x915   :  { %7225 = vperm.xlu1 %8910, %v44_v22   ;;  %7220 = vperm.xlu0 %8869, %v43_v35   ;;  %v37_v35 = vld [vmem:[%s13073_s1 + $0x20] sm:$0xf] }
 0x983   :  { %v8938_v31 = vpop.permute.xlu1 %8937  ;;  %v8933_v3 = vpop.permute.xlu0 %8932 }
 0x984   :  { %v8935_v60 = vunpack.i.h.bf16 %v8933_v3  ;;  %v8934_v16 = vunpack.i.l.bf16 %v8933_v3  ;;  %v8940_v42 = vunpack.i.h.bf16 %v8938_v31  ;;  %v8939_v47 = vunpack.i.l.bf16 %v8938_v31  ;;  %v9995_v31 = vld [vmem:[%s13079_s7] sm:$0xff]   ;;  %v9996_v3 = vld [vmem:[%s13079_s7 + $0x8] sm:$0xff]  }
 0x986   :  { %v7166_v21 = vpack.c.bf16 %v8935_v60, %v8934_v16  ;;  %v7167_v45 = vpack.c.bf16 %v8940_v42, %v8939_v47  ;;  %v9997_v60 = vld [vmem:[%s13079_s7 + $0x10] sm:$0xff]   ;;  %v9998_v16 = vld [vmem:[%s13079_s7 + $0x18] ss:$0 sps:$4 sm:$0x11]  }
 0x987   :  { %v7457_v42 = vsel %vm7455_vm1, %v9998_v16, 0 }
 0x988   :  { %8519 = vmatpush3.bf16.msra.mxu0 %v7166_v21 }
 0x989   :  { %8520 = vmatprep.subr.bf16.mxu0 %v10007_v41 }
 0x98c   :  { %8521 = vmatpush3.bf16.msra.mxu0 %v7167_v45 }
 0x98d   :  { %8526 = vmatprep.subr.bf16.mxu0 %v10007_v41 }
 0x98f   :  { %8523 = vmatmul.mubr.msk.bf16.vlgmr.msra.gmra.mrb[52].mxu0 %vm6928_vm0, %v9986_v63 }
 0x990   :  { %8527 = vmatpush3.bf16.msra.mxu0 %v9987_v12  ;;  %8542 = vmatprep.mubr.msk.bf16.mxu0 %vm10008_vm15, %v10007_v41 }
 0x991   :  { %8528 = vmatprep.subr.bf16.mxu0 %v10007_v41 }
 0x994   :  { %8529 = vmatpush3.bf16.msra.mxu0 %v9988_v2  ;;  %v7221_v58 = vpop.permute.xlu0 %7220  ;;  %v7226_v39 = vpop.permute.xlu1 %7225 }
 0x995   :  { %8530 = vmatprep.subr.bf16.mxu0 %v10007_v41 }
 0x998   :  { %8531 = vmatpush3.bf16.msra.mxu0 %v9989_v61 }
 0x999   :  { %8532 = vmatprep.subr.bf16.mxu0 %v10007_v41 }
 0x99c   :  { %8533 = vmatpush3.bf16.msra.mxu0 %v9990_v8 }
 0x99d   :  { %8534 = vmatprep.subr.bf16.mxu0 %v10007_v41 }
 0x9a0   :  { %8535 = vmatpush3.bf16.msra.mxu0 %v9991_v6 }
 0x9a1   :  { %8536 = vmatprep.subr.bf16.mxu0 %v10007_v41 }
 0x9a4   :  { %8537 = vmatpush3.bf16.msra.mxu0 %v9992_v43 }
 0x9a5   :  { %8538 = vmatprep.subr.bf16.mxu0 %v10007_v41 }
 0x9a8   :  { %8539 = vmatpush3.bf16.msra.mxu0 %v9993_v28 }
 0x9a9   :  { %8540 = vmatprep.subr.bf16.mxu0 %v10007_v41 }
 0x9ac   :  { %8541 = vmatpush3.bf16.msra.mxu0 %v7279_v29 }
 0x9ad   :  { %8546 = vmatprep.subr.bf16.mxu0 %v10007_v41 }
 0xa62   :  { %v7210_v57 = vpop.f32.mrb[52].mxu0 }
 0xa63   :  { %v8524_v54 = vpop.f32.mrb[53].mxu0 }
 0xa64   :  { %v7213_v15 = vpop.f32.mrb[54].mxu0 }
 0xa65   :  { %v7217_v51 = vpack.c.bf16 %v7213_v15, %v7210_v57  ;;  %v8525_v0 = vpop.f32.mrb[55].mxu0 }
 0xa67   :  { %8543 = vmatmul.mubr.msk.bf16.vlgmr.msra.gmra.mrb[56].mxu0 %vm7273_vm11, %v7217_v51 }
 0xa68   :  { %8560 = vmatprep.mubr.msk.bf16.mxu0 %vm10008_vm15, %v10007_v41 }
 0xb3a   :  { %v7315_v4 = vpop.f32.mrb[56].mxu0 }
 0xb3b   :  { %v7316_v40 = vadd.f32 %v7315_v4, %v7221_v58  ;;  %v8544_v33 = vpop.f32.mrb[57].mxu0 }
 0xb3c   :  { %v7318_v50 = vpop.f32.mrb[58].mxu0 }
 0xb3d   :  { %v7324_v11 = vmul.f32 0.01, %v7316_v40  ;;  %v7319_v14 = vadd.f32 %v7318_v50, %v7226_v39  ;;  %v8545_v9 = vpop.f32.mrb[59].mxu0  ;;  %vm7322_vm12 = vcmp.gt.f32.partialorder %v7316_v40, 0.0 }
 0xb3f   :  { %vm7323_vm13 = vcmp.gt.f32.partialorder %v7319_v14, 0.0  ;;  %v7325_v52 = vmul.f32 0.01, %v7319_v14  ;;  %v7326_v34 = vsel %vm7322_vm12, %v7316_v40, %v7324_v11 }
 0xb41   :  { %v7327_v48 = vsel %vm7323_vm13, %v7319_v14, %v7325_v52 }
 0xb42   :  { %v8946_v27 = vpack.i.bf16 %v7327_v48, %v7326_v34  ;;  %v7373_v26 = vpack.c.bf16 %v7327_v48, %v7326_v34 }
 0xb44   :  { %8947 = vrot.lane.b32.xlu1 %v8946_v27, %s10000_s9  ;;  %8942 = vrot.lane.b32.xlu0 %v8946_v27, %s10001_s10 }
 0xb45   :  { %8547 = vmatpush3.bf16.msra.mxu0 %v7373_v26 }
 0xb46   :  { %8548 = vmatprep.subr.bf16.mxu0 %v10007_v41 }
 0xb48   :  { %8957 = vrot.lane.b32.xlu1 %v8946_v27, %s10004_s13  ;;  %8952 = vrot.lane.b32.xlu0 %v8946_v27, %s10002_s11 }
 0xb4c   :  { %8967 = vrot.lane.b32.xlu1 %v8946_v27, %s10006_s16  ;;  %8962 = vrot.lane.b32.xlu0 %v8946_v27, %s10003_s12 }
 0xb50   :  { %7427 = vperm.xlu0 %8869, %v45_v38  }
 0xbb6   :  { %v8948_v53 = vpop.permute.xlu1 %8947  ;;  %v8943_v32 = vpop.permute.xlu0 %8942 }
 0xbb7   :  { %v8945_v46 = vunpack.i.h.bf16 %v8943_v32  ;;  %v8944_v25 = vunpack.i.l.bf16 %v8943_v32  ;;  %v8950_v1 = vunpack.i.h.bf16 %v8948_v53  ;;  %v8949_v36 = vunpack.i.l.bf16 %v8948_v53 }
 0xbb9   :  { %v7374_v5 = vpack.c.bf16 %v8945_v46, %v8944_v25  ;;  %v7375_v59 = vpack.c.bf16 %v8950_v1, %v8949_v36 }
 0xbba   :  { %v8953_v55 = vpop.permute.xlu0 %8952  ;;  %v8958_v37 = vpop.permute.xlu1 %8957 }
 0xbbb   :  { %8549 = vmatpush3.bf16.msra.mxu0 %v7374_v5  ;;  %v8955_v30 = vunpack.i.h.bf16 %v8953_v55  ;;  %v8954_v18 = vunpack.i.l.bf16 %v8953_v55  ;;  %v8960_v19 = vunpack.i.h.bf16 %v8958_v37  ;;  %v8959_v56 = vunpack.i.l.bf16 %v8958_v37 }
 0xbbc   :  { %8550 = vmatprep.subr.bf16.mxu0 %v10007_v41 }
 0xbbd   :  { %v7376_v49 = vpack.c.bf16 %v8955_v30, %v8954_v18  ;;  %v7377_v17 = vpack.c.bf16 %v8960_v19, %v8959_v56 }
 0xbbe   :  { %v8963_v7 = vpop.permute.xlu0 %8962  ;;  %v8968_v24 = vpop.permute.xlu1 %8967 }
 0xbbf   :  { %8551 = vmatpush3.bf16.msra.mxu0 %v7375_v59  ;;  %v8965_v13 = vunpack.i.h.bf16 %v8963_v7  ;;  %v8964_v20 = vunpack.i.l.bf16 %v8963_v7  ;;  %v8970_v62 = vunpack.i.h.bf16 %v8968_v24  ;;  %v8969_v10 = vunpack.i.l.bf16 %v8968_v24 }
 0xbc0   :  { %8552 = vmatprep.subr.bf16.mxu0 %v10007_v41 }
 0xbc1   :  { %v7378_v44 = vpack.c.bf16 %v8965_v13, %v8964_v20  ;;  %v7379_v22 = vpack.c.bf16 %v8970_v62, %v8969_v10 }
 0xbc3   :  { %8553 = vmatpush3.bf16.msra.mxu0 %v7376_v49 }
 0xbc4   :  { %8554 = vmatprep.subr.bf16.mxu0 %v10007_v41 }
 0xbc7   :  { %8555 = vmatpush3.bf16.msra.mxu0 %v7377_v17 }
 0xbc8   :  { %8556 = vmatprep.subr.bf16.mxu0 %v10007_v41 }
 0xbcb   :  { %8557 = vmatpush3.bf16.msra.mxu0 %v7378_v44 }
 0xbcc   :  { %8558 = vmatprep.subr.bf16.mxu0 %v10007_v41 }
 0xbcf   :  { %8559 = vmatpush3.bf16.msra.mxu0 %v7379_v22  ;;  %v7428_v2 = vpop.permute.xlu0 %7427 }
 0xbd0   :  { %8564 = vmatprep.subr.bf16.mxu0 %v10007_v41 }
 0xbd2   :  { %8561 = vmatmul.mubr.msk.bf16.vlgmr.msra.gmra.mrb[60].mxu0 %vm7380_vm14, %v37_v35 }
 0xbd3   :  { %8565 = vmatpush3.bf16.msra.mxu0 %v9995_v31  ;;  %8572 = vmatprep.mubr.msk.bf16.mxu0 %vm10008_vm15, %v10007_v41  ;;  %vm7451_vm15 = vcmask 408576  }
 0xbd4   :  { %8566 = vmatprep.subr.bf16.mxu0 %v10007_v41 }
 0xbd7   :  { %8567 = vmatpush3.bf16.msra.mxu0 %v9996_v3 }
 0xbd8   :  { %8568 = vmatprep.subr.bf16.mxu0 %v10007_v41 }
 0xbdb   :  { %8569 = vmatpush3.bf16.msra.mxu0 %v9997_v60 }
 0xbdc   :  { %8570 = vmatprep.subr.bf16.mxu0 %v10007_v41 }
 0xbdf   :  { %8571 = vmatpush3.bf16.msra.mxu0 %v7457_v42 }
 0xca5   :  { %v7418_v47 = vpop.f32.mrb[60].mxu0 }
 0xca6   :  { %v7424_v21 = vpack.c.bf16 %v7418_v47, %v7418_v47  ;;  %v8562_v45 = vpop.f32.mrb[61].mxu0 }
 0xca7   :  { %v7421_v63 = vpop.f32.mrb[62].mxu0 }
 0xca8   :  { %v8563_v12 = vpop.f32.mrb[63].mxu0  ;;  %8573 = vmatmul.mubr.msk.bf16.vlgmr.msra.gmra.mrb[64].mxu0 %vm7451_vm15, %v7424_v21 }
 0xd7b   :  { %v7493_v61 = vpop.f32.mrb[64].mxu0 }
 0xd7c   :  { %v7494_v8 = vadd.f32 %v7493_v61, %v7428_v2  ;;  %v8574_v6 = vpop.f32.mrb[65].mxu0 }
 0xd7d   :  { %v7496_v41 = vpop.f32.mrb[66].mxu0 }
 0xd7e   :  { %7500 = vst.msk [vmem:[%s13080_s8] sm:$0x7] %vm7499_vm3, %v7494_v8  ;;  %v8575_v43 = vpop.f32.mrb[67].mxu0 }

</bundles_post_ra>
